<compile_context>
chip_gen: v6e
topology: v6e:2x2x1
jax: 0.10.0
libtpu: 0.0.40
codegen_flags: <defaults>
</compile_context>

<pallas_src>
import jax
import jax.numpy as jnp
from jax.experimental import pallas as pl
from jax.experimental.pallas import tpu as pltpu

_EPS = 1e-5


def _ru(x, m):
    return (x + m - 1) // m * m


def _vmem_budget():
    """Generation-aware scoped-VMEM budget (bytes)."""
    try:
        cap = int(pltpu.get_tpu_info().vmem_capacity_bytes)
    except Exception:
        cap = 64 * 1024 * 1024            # conservative (v7x-sized) fallback
    # leave headroom for compiler scratch; v7x (64MiB) -> 40MiB, v5e/v6e -> 100MiB
    return int(min(max(cap - 24 * 1024 * 1024, 24 * 1024 * 1024),
                   100 * 1024 * 1024))


_VMEM_LIMIT = _vmem_budget()


def _pick_tile(M, cap):
    """Pick an M-tile <= cap, preferring divisors of M (no pad/slice copies)."""
    cap = max(8, min(int(cap), 1024))
    cap = (cap // 8) * 8
    for c in (1024, 768, 512, 384, 256, 128, 64, 32, 16, 8):
        if c <= cap and M % c == 0:
            return c, M
    tm = max(8, min(cap, _ru(M, 8)))
    return tm, _ru(M, tm)


_SQRT1_2 = 0.7071067811865476


def _gelu(x):
    """Exact (erf-based) GELU as in torch nn.GELU.  erf is evaluated with the
    Abramowitz-Stegun 7.1.26 rational approximation (|err| < 1.5e-7, i.e.
    exact at f32 precision) so it lowers in Mosaic using only exp/mul/add and
    maps the transcendental onto the EUP slot."""
    z = x * _SQRT1_2
    az = jnp.maximum(z, -z)
    t = 1.0 / (1.0 + 0.3275911 * az)
    poly = t * (0.254829592 + t * (-0.284496736 + t * (1.421413741
             + t * (-1.453152027 + t * 1.061405429))))
    erf_az = 1.0 - poly * jnp.exp(-az * az)
    erf_z = jnp.where(z < 0, -erf_az, erf_az)
    return 0.5 * x * (1.0 + erf_z)


# ----------------------------------------------------------------------------
# Fused matmul kernel: resident bf16 (K, N) weight, M-only grid, fused bias,
# optional LayerNorm prologue, GELU / multiply / residual-add / LayerNorm
# epilogues.  Accumulation and all epilogues are in f32.
# ----------------------------------------------------------------------------

def _make_mm_kernel(has_ln, act, has_mul, has_add, has_out_ln):
    def kernel(*refs):
        i = 0
        a_ref = refs[i]; i += 1
        if has_ln:
            g_ref, be_ref = refs[i], refs[i + 1]; i += 2
        w_ref, b_ref = refs[i], refs[i + 1]; i += 2
        if has_mul:
            m_ref = refs[i]; i += 1
        if has_add:
            r_ref = refs[i]; i += 1
        if has_out_ln:
            og_ref, ob_ref = refs[i], refs[i + 1]; i += 2
        o_ref = refs[i]

        x = a_ref[...].astype(jnp.float32)
        if has_ln:                                   # LayerNorm prologue (f32)
            mu = jnp.mean(x, axis=-1, keepdims=True)
            var = jnp.mean((x - mu) ** 2, axis=-1, keepdims=True)
            x = (x - mu) * jax.lax.rsqrt(var + _EPS)
            x = x * g_ref[...] + be_ref[...]
        y = jnp.dot(x.astype(jnp.bfloat16), w_ref[...],   # bf16 MXU, f32 acc
                    preferred_element_type=jnp.float32)
        y = y + b_ref[...]                           # fused bias
        if act == "gelu":
            y = _gelu(y)
        if has_mul:
            y = y * m_ref[...].astype(jnp.float32)   # fused q * modulator
        if has_add:
            y = y + r_ref[...].astype(jnp.float32)   # fused residual add
        if has_out_ln:                               # LayerNorm epilogue (f32)
            mu = jnp.mean(y, axis=-1, keepdims=True)
            var = jnp.mean((y - mu) ** 2, axis=-1, keepdims=True)
            y = (y - mu) * jax.lax.rsqrt(var + _EPS)
            y = y * og_ref[...] + ob_ref[...]
        o_ref[...] = y.astype(o_ref.dtype)
    return kernel


def pallas_matmul(a, w, b=None, ln=None, out_ln=None, act=None,
                  mul_in=None, add_in=None):
    """y = [LN_out(] op(LN_in(a) @ w + b) [)] with op = gelu/mul/add epilogues.

    a:(M,K) f32, w:(K,N) f32 (stored resident in VMEM as bf16).  Only the M
    axis is tiled; it is marked parallel for megacore sharding."""
    M, K = a.shape
    K2, N = w.shape
    assert K == K2
    if b is None:
        b = jnp.zeros((N,), jnp.float32)

    # Small-K hedge (only triggers for 1-channel input projections).
    if K % 8 != 0 and ln is None:
        kp = _ru(K, 8)
        a = jnp.pad(a, ((0, 0), (0, kp - K)))
        w = jnp.pad(w, ((0, kp - K), (0, 0)))
        K = kp

    wk = w.astype(jnp.bfloat16)

    n_side = 1 + (mul_in is not None) + (add_in is not None)
    row_bytes = 8 * K + 8 * N * (1 + n_side)          # double-buffered rows
    cap = (_VMEM_LIMIT // 2 - 2 * K * N * 2) // max(row_bytes, 1)
    tm, Mp = _pick_tile(M, cap)

    def padM(t):
        return t if Mp == M else jnp.pad(t, ((0, Mp - M), (0, 0)))

    inputs = [padM(a)]
    in_specs = [pl.BlockSpec((tm, K), lambda i: (i, 0))]
    if ln is not None:
        g, be = ln
        inputs += [g.reshape(1, K), be.reshape(1, K)]
        in_specs += [pl.BlockSpec((1, K), lambda i: (0, 0))] * 2
    inputs += [wk, b.reshape(1, N).astype(jnp.float32)]
    in_specs += [pl.BlockSpec((K, N), lambda i: (0, 0)),
                 pl.BlockSpec((1, N), lambda i: (0, 0))]
    if mul_in is not None:
        inputs.append(padM(mul_in))
        in_specs.append(pl.BlockSpec((tm, N), lambda i: (i, 0)))
    if add_in is not None:
        inputs.append(padM(add_in))
        in_specs.append(pl.BlockSpec((tm, N), lambda i: (i, 0)))
    if out_ln is not None:
        og, ob = out_ln
        inputs += [og.reshape(1, N), ob.reshape(1, N)]
        in_specs += [pl.BlockSpec((1, N), lambda i: (0, 0))] * 2

    out = pl.pallas_call(
        _make_mm_kernel(ln is not None, act, mul_in is not None,
                        add_in is not None, out_ln is not None),
        out_shape=jax.ShapeDtypeStruct((Mp, N), jnp.float32),
        grid_spec=pltpu.PrefetchScalarGridSpec(
            num_scalar_prefetch=0,
            grid=(Mp // tm,),
            in_specs=in_specs,
            out_specs=pl.BlockSpec((tm, N), lambda i: (i, 0))),
        compiler_params=pltpu.CompilerParams(
            dimension_semantics=("parallel",),
            vmem_limit_bytes=_VMEM_LIMIT),
        cost_estimate=pl.CostEstimate(
            flops=2 * Mp * K * N, transcendentals=0,
            bytes_accessed=4 * (Mp * K + Mp * N * (1 + n_side)) + 2 * K * N),
    )(*inputs)
    return out if Mp == M else out[:M]


# ----------------------------------------------------------------------------
# Slab-tiled streamed-tap 3D convolution (dense + depthwise), channels-last.
# The zero-padded volume stays in HBM; each grid step DMAs a (tm + halo) row
# slab into VMEM.  Dense conv groups all k^3 taps into one bf16 MXU dot per
# tile; the depthwise conv accumulates per-tap VPU FMAs.
# ----------------------------------------------------------------------------

def _make_dense_conv_kernel(tap_offsets, tm, slab, cin, act):
    def kernel(x_hbm, w_ref, o_ref, buf, lhs, sem):
        b = pl.program_id(0)
        start = pl.multiple_of(pl.program_id(1) * tm, 8)
        cp = pltpu.make_async_copy(x_hbm.at[b, pl.ds(start, slab), :], buf, sem)
        cp.start()
        cp.wait()
        for t, off in enumerate(tap_offsets):          # gather taps -> bf16 LHS
            lhs[:, t * cin:(t + 1) * cin] = (
                buf[pl.ds(off, tm), :].astype(jnp.bfloat16))
        y = jnp.dot(lhs[...], w_ref[...],              # one MXU dot, K = 27*Cin
                    preferred_element_type=jnp.float32)
        if act == "gelu":
            y = _gelu(y)
        o_ref[0] = y.astype(o_ref.dtype)
    return kernel


def _make_dw_conv_kernel(tap_offsets, tm, slab, act):
    def kernel(x_hbm, w_ref, o_ref, buf, sem):
        b = pl.program_id(0)
        start = pl.multiple_of(pl.program_id(1) * tm, 8)
        cp = pltpu.make_async_copy(x_hbm.at[b, pl.ds(start, slab), :], buf, sem)
        cp.start()
        cp.wait()
        acc = buf[pl.ds(tap_offsets[0], tm), :].astype(jnp.float32) * w_ref[0]
        for t in range(1, len(tap_offsets)):
            acc = acc + (buf[pl.ds(tap_offsets[t], tm), :].astype(jnp.float32)
                         * w_ref[t])
        if act == "gelu":
            acc = _gelu(acc)
        o_ref[0] = acc.astype(o_ref.dtype)
    return kernel


def _conv3d_streamed(x, w_taps, k, cout, depthwise, act=None):
    """'same' (zero-pad) stride-1 conv.  x:(B,D,H,W,Cin) -> (B,D,H,W,cout)."""
    B, D, H, W, Cin = x.shape

    # Hedge: 8-multiple contraction dim for the dense (MXU) conv.
    if (not depthwise) and Cin % 8 != 0:
        cpad = _ru(Cin, 8) - Cin
        x = jnp.pad(x, ((0, 0), (0, 0), (0, 0), (0, 0), (0, cpad)))
        w_taps = jnp.pad(w_taps, ((0, 0), (0, cpad), (0, 0)))
        Cin += cpad

    pad = (k - 1) // 2
    Hp, Wp = H + 2 * pad, W + 2 * pad
    plane = Hp * Wp
    anchors = D * plane                       # one anchor row per padded (h,w)
    max_off = (k - 1) * (plane + Wp + 1)      # halo rows needed beyond a tile

    if depthwise:
        # keep the f32 accumulator within a handful of vregs
        cap = max(8, min(1024, (8192 // max(Cin, 1)) // 8 * 8))
    else:
        per_row = (k ** 3) * Cin * 2 + Cin * 4 + 2 * cout * 4
        fixed = max_off * Cin * 4 + 2 * (k ** 3) * Cin * cout * 2
        cap = (_VMEM_LIMIT // 3 - fixed) // max(per_row, 1)
        cap = max(8, min(4096, (cap // 8) * 8))
    tm = min(cap, _ru(anchors, 8))
    n_tiles = -(-anchors // tm)
    rows = n_tiles * tm
    slab = tm + max_off

    # Pad depth with extra planes so every slab DMA stays in bounds.
    p_needed = rows + max_off
    p_base = (D + 2 * pad) * plane
    extra_planes = 0 if p_needed <= p_base else -(-(p_needed - p_base) // plane)
    xp = jnp.pad(x, ((0, 0), (pad, pad + extra_planes),
                     (pad, pad), (pad, pad), (0, 0)))
    P = xp.shape[1] * plane
    xf = xp.reshape(B, P, Cin)

    taps = [dz * plane + dy * Wp + dx
            for dz in range(k) for dy in range(k) for dx in range(k)]

    if depthwise:
        kern = _make_dw_conv_kernel(taps, tm, slab, act)
        scratch = [pltpu.VMEM((slab, Cin), jnp.float32),
                   pltpu.SemaphoreType.DMA(())]
        wk = w_taps                                          # (k^3, 1, C) f32
        flops = 2 * B * rows * len(taps) * Cin
    else:
        kern = _make_dense_conv_kernel(taps, tm, slab, Cin, act)
        scratch = [pltpu.VMEM((slab, Cin), jnp.float32),
                   pltpu.VMEM((tm, len(taps) * Cin), jnp.bfloat16),
                   pltpu.SemaphoreType.DMA(())]
        wk = w_taps.reshape(len(taps) * Cin, cout).astype(jnp.bfloat16)
        flops = 2 * B * rows * len(taps) * Cin * cout

    w_ndim = wk.ndim
    out = pl.pallas_call(
        kern,
        out_shape=jax.ShapeDtypeStruct((B, rows, cout), jnp.float32),
        grid_spec=pltpu.PrefetchScalarGridSpec(
            num_scalar_prefetch=0,
            grid=(B, n_tiles),
            in_specs=[pl.BlockSpec(memory_space=pl.ANY),
                      pl.BlockSpec(wk.shape, lambda b, i: (0,) * w_ndim)],
            out_specs=pl.BlockSpec((1, tm, cout), lambda b, i: (b, i, 0)),
            scratch_shapes=scratch),
        compiler_params=pltpu.CompilerParams(
            dimension_semantics=("parallel", "parallel"),
            vmem_limit_bytes=_VMEM_LIMIT),
        cost_estimate=pl.CostEstimate(
            flops=int(flops), transcendentals=0,
            bytes_accessed=int(4 * (B * n_tiles * slab * Cin + B * rows * cout)
                               + 2 * wk.size)),
    )(xf, wk)

    y = out[:, :anchors].reshape(B, D, Hp, Wp, cout)[:, :, :H, :W, :]
    return y


def conv3d(x, w, b=None):
    """Dense 3D conv, channels-last x:(B,D,H,W,C), PyTorch weight (O,C,k,k,k)."""
    O, C, k = w.shape[0], w.shape[1], w.shape[2]
    if k == 1:                                # 1x1x1 conv == per-voxel linear
        y = pallas_matmul(x.reshape(-1, C), w.reshape(O, C).T, b)
        return y.reshape(x.shape[:-1] + (O,))
    w_taps = w.transpose(2, 3, 4, 1, 0).reshape(k ** 3, C, O)
    y = _conv3d_streamed(x, w_taps, k, O, depthwise=False)
    if b is not None:
        y = y + b.reshape(1, 1, 1, 1, O)
    return y


def depthwise_conv3d(x, w, act=None):
    """Depthwise (groups=C) 3D conv, padding k//2, no bias, fused activation."""
    C, k = w.shape[0], w.shape[2]
    w_taps = w.transpose(2, 3, 4, 1, 0).reshape(k ** 3, 1, C)
    return _conv3d_streamed(x, w_taps, k, C, depthwise=True, act=act)


# ----------------------------------------------------------------------------
# Normalization kernels
# ----------------------------------------------------------------------------

def _rownorm_kernel(x_ref, g_ref, b_ref, o_ref):
    x = x_ref[...].astype(jnp.float32)
    mu = jnp.mean(x, axis=-1, keepdims=True)
    var = jnp.mean((x - mu) ** 2, axis=-1, keepdims=True)
    y = (x - mu) * jax.lax.rsqrt(var + _EPS)
    o_ref[...] = (y * g_ref[...] + b_ref[...]).astype(o_ref.dtype)


def pallas_layer_norm(x2d, g=None, b=None):
    """LayerNorm over the last dim of x:(M,N); optional affine."""
    M, N = x2d.shape
    if g is None:
        g = jnp.ones((N,), jnp.float32)
    if b is None:
        b = jnp.zeros((N,), jnp.float32)
    cap = _VMEM_LIMIT // (64 * max(N, 1))
    tm, Mp = _pick_tile(M, cap)
    x_p = x2d if Mp == M else jnp.pad(x2d, ((0, Mp - M), (0, 0)))
    out = pl.pallas_call(
        _rownorm_kernel,
        out_shape=jax.ShapeDtypeStruct((Mp, N), jnp.float32),
        grid_spec=pltpu.PrefetchScalarGridSpec(
            num_scalar_prefetch=0,
            grid=(Mp // tm,),
            in_specs=[pl.BlockSpec((tm, N), lambda i: (i, 0)),
                      pl.BlockSpec((1, N), lambda i: (0, 0)),
                      pl.BlockSpec((1, N), lambda i: (0, 0))],
            out_specs=pl.BlockSpec((tm, N), lambda i: (i, 0))),
        compiler_params=pltpu.CompilerParams(
            dimension_semantics=("parallel",),
            vmem_limit_bytes=_VMEM_LIMIT),
    )(x_p, g.reshape(1, N), b.reshape(1, N))
    return out if Mp == M else out[:M]


def _make_inorm_fused_kernel(has_res, act):
    def kernel(*refs):
        x_ref = refs[0]
        r_ref = refs[1] if has_res else None
        o_ref = refs[-1]
        x = x_ref[0].astype(jnp.float32)               # (S, C), channels in lanes
        mu = jnp.mean(x, axis=0, keepdims=True)
        var = jnp.mean((x - mu) ** 2, axis=0, keepdims=True)
        y = (x - mu) * jax.lax.rsqrt(var + _EPS)
        if has_res:
            y = y + r_ref[0].astype(jnp.float32)       # fused residual add
        if act == "lrelu":
            y = jnp.where(y >= 0, y, 0.01 * y)         # fused LeakyReLU
        o_ref[0] = y.astype(o_ref.dtype)
    return kernel


def _make_inorm_stats_kernel(count):
    inv = 1.0 / float(count)

    def kernel(x_ref, o_ref, acc_ref):
        i = pl.program_id(1)

        @pl.when(i == 0)
        def _init():
            acc_ref[...] = jnp.zeros_like(acc_ref)

        x = x_ref[0].astype(jnp.float32)
        acc_ref[0:1, :] = acc_ref[0:1, :] + jnp.sum(x, axis=0, keepdims=True)
        acc_ref[1:2, :] = acc_ref[1:2, :] + jnp.sum(x * x, axis=0, keepdims=True)

        @pl.when(i == pl.num_programs(1) - 1)
        def _fin():
            mu = acc_ref[0:1, :] * inv
            var = jnp.maximum(acc_ref[1:2, :] * inv - mu * mu, 0.0)
            rstd = jax.lax.rsqrt(var + _EPS)
            o_ref[0] = jnp.concatenate([mu, rstd], axis=0)
    return kernel


def _make_inorm_apply_kernel(has_res, act):
    def kernel(*refs):
        x_ref, st_ref = refs[0], refs[1]
        r_ref = refs[2] if has_res else None
        o_ref = refs[-1]
        st = st_ref[0]                                  # (2, C): [mean; rstd]
        mu = st[0:1, :]
        rstd = st[1:2, :]
        y = (x_ref[0].astype(jnp.float32) - mu) * rstd
        if has_res:
            y = y + r_ref[0].astype(jnp.float32)
        if act == "lrelu":
            y = jnp.where(y >= 0, y, 0.01 * y)
        o_ref[0] = y.astype(o_ref.dtype)
    return kernel


def instance_norm(x, act=None, residual=None):
    """Per-(sample, channel) normalization over spatial dims, channels-last.
    Fuses an optional residual add and LeakyReLU.  Large volumes use a
    two-pass tiled (sum/sumsq accumulator) scheme so VMEM stays bounded."""
    B, D, H, W, C = x.shape
    S = D * H * W
    xf = x.reshape(B, S, C)
    rf = residual.reshape(B, S, C) if residual is not None else None

    ts = min(2048, _ru(S, 8))
    if S <= ts:                                        # single-tile fast path
        inputs = [xf]
        in_specs = [pl.BlockSpec((1, S, C), lambda b: (b, 0, 0))]
        if rf is not None:
            inputs.append(rf)
            in_specs.append(pl.BlockSpec((1, S, C), lambda b: (b, 0, 0)))
        out = pl.pallas_call(
            _make_inorm_fused_kernel(rf is not None, act),
            out_shape=jax.ShapeDtypeStruct((B, S, C), jnp.float32),
            grid_spec=pltpu.PrefetchScalarGridSpec(
                num_scalar_prefetch=0, grid=(B,),
                in_specs=in_specs,
                out_specs=pl.BlockSpec((1, S, C), lambda b: (b, 0, 0))),
            compiler_params=pltpu.CompilerParams(
                dimension_semantics=("parallel",),
                vmem_limit_bytes=_VMEM_LIMIT),
        )(*inputs)
        return out.reshape(B, D, H, W, C)

    Sp = _ru(S, ts)
    nt = Sp // ts
    if Sp != S:                     # zero padding keeps sum/sumsq exact
        xf = jnp.pad(xf, ((0, 0), (0, Sp - S), (0, 0)))
        if rf is not None:
            rf = jnp.pad(rf, ((0, 0), (0, Sp - S), (0, 0)))

    stats = pl.pallas_call(
        _make_inorm_stats_kernel(S),
        out_shape=jax.ShapeDtypeStruct((B, 2, C), jnp.float32),
        grid_spec=pltpu.PrefetchScalarGridSpec(
            num_scalar_prefetch=0, grid=(B, nt),
            in_specs=[pl.BlockSpec((1, ts, C), lambda b, i: (b, i, 0))],
            out_specs=pl.BlockSpec((1, 2, C), lambda b, i: (b, 0, 0)),
            scratch_shapes=[pltpu.VMEM((2, C), jnp.float32)]),
        compiler_params=pltpu.CompilerParams(
            dimension_semantics=("parallel", "arbitrary"),
            vmem_limit_bytes=_VMEM_LIMIT),
    )(xf)

    inputs = [xf, stats]
    in_specs = [pl.BlockSpec((1, ts, C), lambda b, i: (b, i, 0)),
                pl.BlockSpec((1, 2, C), lambda b, i: (b, 0, 0))]
    if rf is not None:
        inputs.append(rf)
        in_specs.append(pl.BlockSpec((1, ts, C), lambda b, i: (b, i, 0)))
    out = pl.pallas_call(
        _make_inorm_apply_kernel(rf is not None, act),
        out_shape=jax.ShapeDtypeStruct((B, Sp, C), jnp.float32),
        grid_spec=pltpu.PrefetchScalarGridSpec(
            num_scalar_prefetch=0, grid=(B, nt),
            in_specs=in_specs,
            out_specs=pl.BlockSpec((1, ts, C), lambda b, i: (b, i, 0))),
        compiler_params=pltpu.CompilerParams(
            dimension_semantics=("parallel", "parallel"),
            vmem_limit_bytes=_VMEM_LIMIT),
    )(*inputs)
    if Sp != S:
        out = out[:, :S]
    return out.reshape(B, D, H, W, C)


# ----------------------------------------------------------------------------
# Ops built on the kernels (channels-last everywhere)
# ----------------------------------------------------------------------------

def patch_embed(x, prm, patch, norm=True):
    """Strided conv (kernel=stride=patch) as gather + fused matmul (+LN)."""
    B, D, H, W, C = x.shape
    Do, Ho, Wo = D // patch, H // patch, W // patch
    xr = x.reshape(B, Do, patch, Ho, patch, Wo, patch, C)
    xr = xr.transpose(0, 1, 3, 5, 2, 4, 6, 7).reshape(
        B * Do * Ho * Wo, C * patch ** 3)
    w = prm['proj_w']                                  # (E, C, p, p, p)
    E = w.shape[0]
    w2 = w.transpose(2, 3, 4, 1, 0).reshape(patch ** 3 * C, E)
    out_ln = (prm['norm_w'], prm['norm_b']) if norm else None
    y = pallas_matmul(xr, w2, prm['proj_b'], out_ln=out_ln)
    return y.reshape(B, Do * Ho * Wo, E), Do, Ho, Wo


def reshape_tokens_to_volumes(x, d, h, w, normalize=False):
    b, L, c = x.shape
    if normalize:
        x = pallas_layer_norm(x.reshape(b * L, c)).reshape(b, L, c)
    return x.reshape(b, d, h, w, c)                    # channels-last volume


def get_attentional_residual(residual, vesselness_map):
    if vesselness_map is not None:
        # TODO(synk): trilinear align_corners=True interpolation of vesselness_map
        raise NotImplementedError("vesselness_map attention path not implemented")
    return residual


def transp_conv3d_2x(x, w):
    """ConvTranspose3d kernel=2, stride=2, no bias.  w:(Cin, Cout, 2,2,2).
    Weight is reordered so the matmul output columns are (kd,kh,kw,Co) and the
    channel axis stays lane-contiguous through the spatial interleave."""
    B, D, H, W, C = x.shape
    Cin, Co = w.shape[0], w.shape[1]
    w2 = jnp.transpose(w, (0, 2, 3, 4, 1)).reshape(Cin, 8 * Co)
    y = pallas_matmul(x.reshape(B * D * H * W, C), w2)
    y = y.reshape(B, D, H, W, 2, 2, 2, Co)
    y = y.transpose(0, 1, 4, 2, 5, 3, 6, 7).reshape(B, 2 * D, 2 * H, 2 * W, Co)
    return y


# ----------------------------------------------------------------------------
# FocalUNETR building blocks
# ----------------------------------------------------------------------------

def focal_block(x, D, H, W, prm, focal_level):
    B, L, C = x.shape
    shortcut = x.reshape(B * L, C)
    mod = prm['mod']
    # focal modulation; norm1 fused into the f-linear prologue
    t = pallas_matmul(shortcut, mod['f_w'], mod['f_b'],
                      ln=(prm['norm1_w'], prm['norm1_b']))
    t = t.reshape(B, D, H, W, 2 * C + focal_level + 1)
    q = t[..., :C]
    ctx = t[..., C:2 * C]
    gates = t[..., 2 * C:]
    ctx_all = jnp.zeros_like(ctx)
    for l in range(focal_level):
        ctx = depthwise_conv3d(ctx, mod['focal_w'][l], act='gelu')  # fused GELU
        ctx_all = ctx_all + ctx * gates[..., l:l + 1]
    ctx_global = _gelu(jnp.mean(ctx, axis=(1, 2, 3), keepdims=True))
    ctx_all = ctx_all + ctx_global * gates[..., focal_level:focal_level + 1]
    # h-linear with fused q-modulation; proj with fused shortcut residual
    x_mod = pallas_matmul(ctx_all.reshape(B * L, C), mod['h_w'], mod['h_b'],
                          mul_in=q.reshape(B * L, C))
    x = pallas_matmul(x_mod, mod['proj_w'], mod['proj_b'], add_in=shortcut)
    # MLP: norm2 fused prologue, GELU fused into fc1, residual fused into fc2
    h = pallas_matmul(x, prm['fc1_w'], prm['fc1_b'],
                      ln=(prm['norm2_w'], prm['norm2_b']), act='gelu')
    x = pallas_matmul(h, prm['fc2_w'], prm['fc2_b'], add_in=x)
    return x.reshape(B, L, C)


def basic_layer(x, D, H, W, prm, dim, focal_level):
    B = x.shape[0]
    for blk in prm['blocks']:
        x = focal_block(x, D, H, W, blk, focal_level)
    xv = x.reshape(B, D, H, W, dim)                    # tokens -> NDHWC volume
    x, D, H, W = patch_embed(xv, prm['downsample'], patch=2, norm=True)
    return x, D, H, W


def unet_res_block(x, prm):
    """MONAI UnetResBlock: conv-IN-lrelu-conv-IN (+1x1 residual) -> add -> lrelu.
    IN kernel fuses the LeakyReLU and the residual add."""
    h = conv3d(x, prm['conv1_w'])
    h = instance_norm(h, act='lrelu')
    h = conv3d(h, prm['conv2_w'])
    if 'conv3_w' in prm:
        res = instance_norm(conv3d(x, prm['conv3_w']))
    else:
        res = x
    return instance_norm(h, act='lrelu', residual=res)


def unetr_up_block(x, skip, prm):
    up = transp_conv3d_2x(x, prm['transp_w'])
    cat = jnp.concatenate([up, skip], axis=-1)
    return unet_res_block(cat, prm['res'])


# ----------------------------------------------------------------------------
# Parameter init (deterministic, synthetic - shapes follow FocalUNETR.__init__)
# ----------------------------------------------------------------------------

def init_params(key, cfg):
    keys = iter(jax.random.split(key, 256))

    def W(*shape):
        return 0.02 * jax.random.normal(next(keys), shape, jnp.float32)

    def zeros(*shape):
        return jnp.zeros(shape, jnp.float32)

    def ones(*shape):
        return jnp.ones(shape, jnp.float32)

    E, Cin, ps = cfg['embed_dim'], cfg['in_chans'], cfg['patch_size']
    params = {'patch_embed': dict(proj_w=W(E, Cin, ps, ps, ps), proj_b=zeros(E),
                                  norm_w=ones(E), norm_b=zeros(E))}
    dims = [E * 2 ** i for i in range(len(cfg['depths']) + 1)]
    layers = []
    for i, depth in enumerate(cfg['depths']):
        dim, out_dim = dims[i], dims[i + 1]
        fl, fw = cfg['focal_levels'][i], cfg['focal_windows'][i]
        blocks = []
        for _ in range(depth):
            hidden = int(dim * cfg['mlp_ratio'])
            mod = dict(
                f_w=W(dim, 2 * dim + fl + 1), f_b=zeros(2 * dim + fl + 1),
                focal_w=[W(dim, 1, 2 * l + fw, 2 * l + fw, 2 * l + fw)
                         for l in range(fl)],
                h_w=W(dim, dim), h_b=zeros(dim),
                proj_w=W(dim, dim), proj_b=zeros(dim))
            blocks.append(dict(
                norm1_w=ones(dim), norm1_b=zeros(dim),
                norm2_w=ones(dim), norm2_b=zeros(dim),
                mod=mod,
                fc1_w=W(dim, hidden), fc1_b=zeros(hidden),
                fc2_w=W(hidden, dim), fc2_b=zeros(dim)))
        downsample = dict(proj_w=W(out_dim, dim, 2, 2, 2), proj_b=zeros(out_dim),
                          norm_w=ones(out_dim), norm_b=zeros(out_dim))
        layers.append(dict(blocks=blocks, downsample=downsample))
    params['layers'] = layers

    def res_block(cin, cout):
        d = dict(conv1_w=W(cout, cin, 3, 3, 3), conv2_w=W(cout, cout, 3, 3, 3))
        if cin != cout:
            d['conv3_w'] = W(cout, cin, 1, 1, 1)
        return d

    params['encoder1'] = res_block(Cin, E)
    params['encoder2'] = res_block(E, E)
    params['encoder3'] = res_block(2 * E, 2 * E)
    params['encoder4'] = res_block(4 * E, 4 * E)
    params['encoder10'] = res_block(16 * E, 16 * E)

    def up_block(cin, cout):
        return dict(transp_w=W(cin, cout, 2, 2, 2), res=res_block(2 * cout, cout))

    params['decoder5'] = up_block(16 * E, 8 * E)
    params['decoder4'] = up_block(8 * E, 4 * E)
    params['decoder3'] = up_block(4 * E, 2 * E)
    params['decoder2'] = up_block(2 * E, E)
    params['decoder1'] = up_block(E, E)
    params['out_w'] = W(cfg['num_classes'], E, 1, 1, 1)
    params['out_b'] = zeros(cfg['num_classes'])
    return params


# ----------------------------------------------------------------------------
# Full forward pass
# ----------------------------------------------------------------------------

def focal_unetr_forward(params, x_in, cfg, vesselness_map=None):
    dims = [cfg['embed_dim'] * 2 ** i for i in range(len(cfg['depths']) + 1)]
    x_cl = jnp.transpose(x_in, (0, 2, 3, 4, 1))        # NCDHW -> NDHWC once

    x, D, H, W = patch_embed(x_cl, params['patch_embed'],
                             patch=cfg['patch_size'], norm=True)
    hs = [reshape_tokens_to_volumes(x, D, H, W, True)]
    for i, lp in enumerate(params['layers']):
        x, D, H, W = basic_layer(x, D, H, W, lp, dims[i], cfg['focal_levels'][i])
        hs.append(reshape_tokens_to_volumes(x, D, H, W, True))

    enc0 = unet_res_block(x_cl, params['encoder1'])
    enc1 = unet_res_block(hs[0], params['encoder2'])
    enc2 = unet_res_block(hs[1], params['encoder3'])
    enc3 = unet_res_block(hs[2], params['encoder4'])
    dec4 = unet_res_block(hs[4], params['encoder10'])

    dec3 = unetr_up_block(dec4, get_attentional_residual(hs[3], vesselness_map),
                          params['decoder5'])
    dec2 = unetr_up_block(dec3, get_attentional_residual(enc3, vesselness_map),
                          params['decoder4'])
    dec1 = unetr_up_block(dec2, get_attentional_residual(enc2, vesselness_map),
                          params['decoder3'])
    dec0 = unetr_up_block(dec1, get_attentional_residual(enc1, vesselness_map),
                          params['decoder2'])
    out = unetr_up_block(dec0, get_attentional_residual(enc0, vesselness_map),
                         params['decoder1'])
    logits = conv3d(out, params['out_w'], params['out_b'])   # 1x1x1 out conv
    return jnp.transpose(logits, (0, 4, 1, 2, 3))            # back to NCDHW


if __name__ == "__main__":
    # Small but structurally valid config: img 32^3 -> patch res 16 -> 8 -> 4 -> 2 -> 1
    cfg = dict(img_size=32, patch_size=2, in_chans=1, num_classes=2, embed_dim=8,
               depths=(1, 1, 1, 1), mlp_ratio=4.0,
               focal_levels=(2, 2, 2, 2), focal_windows=(3, 3, 3, 3))
    key = jax.random.PRNGKey(0)
    pkey, xkey = jax.random.split(key)
    params = init_params(pkey, cfg)
    x_in = jax.random.normal(
        xkey, (1, cfg['in_chans'], cfg['img_size'], cfg['img_size'], cfg['img_size']),
        jnp.float32)

    logits = focal_unetr_forward(params, x_in, cfg)
    logits = jax.block_until_ready(logits)
    assert logits.shape == (1, cfg['num_classes'],
                            cfg['img_size'], cfg['img_size'], cfg['img_size'])
    assert jnp.all(jnp.isfinite(logits))
    print("KERNEL_OK")
</pallas_src>

<mosaic_0001>
module attributes {stable_mosaic.version = 11 : i64} {
  func.func @kernel(%arg0: i32, %arg1: memref<1024x8xf32, #tpu.memory_space<vmem>>, %arg2: memref<8x8xbf16, #tpu.memory_space<vmem>>, %arg3: memref<1x8xf32, #tpu.memory_space<vmem>>, %arg4: memref<1x8xf32, #tpu.memory_space<vmem>>, %arg5: memref<1x8xf32, #tpu.memory_space<vmem>>, %arg6: memref<1024x8xf32, #tpu.memory_space<vmem>>) attributes {dimension_semantics = [#tpu.dimension_semantics<parallel>], iteration_bounds = array<i64: 4>, scalar_prefetch = 0 : i64, scratch_operands = 0 : i64, tpu.core_type = #tpu.core_type<tc>, window_params = [{transform_indices = @transform_0, window_bounds = array<i64: 1024, 8>}, {pipeline_mode = #tpu.pipeline_mode<synchronous>, transform_indices = @transform_1, window_bounds = array<i64: 8, 8>}, {pipeline_mode = #tpu.pipeline_mode<synchronous>, transform_indices = @transform_2, window_bounds = array<i64: 1, 8>}, {pipeline_mode = #tpu.pipeline_mode<synchronous>, transform_indices = @transform_3, window_bounds = array<i64: 1, 8>}, {pipeline_mode = #tpu.pipeline_mode<synchronous>, transform_indices = @transform_4, window_bounds = array<i64: 1, 8>}, {transform_indices = @transform_5, window_bounds = array<i64: 1024, 8>}]} {
    %c0 = arith.constant 0 : index
    %c0_0 = arith.constant 0 : index
    %0 = vector.load %arg1[%c0, %c0_0] : memref<1024x8xf32, #tpu.memory_space<vmem>>, vector<1024x8xf32>
    %1 = arith.truncf %0 : vector<1024x8xf32> to vector<1024x8xbf16>
    %c0_1 = arith.constant 0 : index
    %c0_2 = arith.constant 0 : index
    %2 = vector.load %arg2[%c0_1, %c0_2] : memref<8x8xbf16, #tpu.memory_space<vmem>>, vector<8x8xbf16>
    %cst = arith.constant dense<0.000000e+00> : vector<1024x8xf32>
    %3 = tpu.matmul %1, %2, %cst {dimension_numbers = #tpu.dot_dimension_numbers<[1], [0], [0], [1], [0, 0, 1, 1], [], []>} : vector<1024x8xbf16>, vector<8x8xbf16>, vector<1024x8xf32> -> vector<1024x8xf32>
    %c0_3 = arith.constant 0 : index
    %c0_4 = arith.constant 0 : index
    %4 = vector.load %arg3[%c0_3, %c0_4] : memref<1x8xf32, #tpu.memory_space<vmem>>, vector<1x8xf32>
    %5 = vector.broadcast %4 : vector<1x8xf32> to vector<1024x8xf32>
    %6 = arith.addf %3, %5 : vector<1024x8xf32>
    %cst_5 = arith.constant dense<0.000000e+00> : vector<1024xf32>
    %7 = vector.multi_reduction <add>, %6, %cst_5 [1] : vector<1024x8xf32> to vector<1024xf32>
    %8 = vector.shape_cast %7 : vector<1024xf32> to vector<1024x1xf32>
    %cst_6 = arith.constant 8.000000e+00 : f32
    %9 = vector.broadcast %cst_6 : f32 to vector<1024x1xf32>
    %10 = arith.divf %8, %9 : vector<1024x1xf32>
    %11 = vector.broadcast %10 : vector<1024x1xf32> to vector<1024x8xf32>
    %12 = arith.subf %6, %11 : vector<1024x8xf32>
    %13 = arith.mulf %12, %12 : vector<1024x8xf32>
    %cst_7 = arith.constant dense<0.000000e+00> : vector<1024xf32>
    %14 = vector.multi_reduction <add>, %13, %cst_7 [1] : vector<1024x8xf32> to vector<1024xf32>
    %15 = vector.shape_cast %14 : vector<1024xf32> to vector<1024x1xf32>
    %cst_8 = arith.constant 8.000000e+00 : f32
    %16 = vector.broadcast %cst_8 : f32 to vector<1024x1xf32>
    %17 = arith.divf %15, %16 : vector<1024x1xf32>
    %18 = vector.broadcast %10 : vector<1024x1xf32> to vector<1024x8xf32>
    %19 = arith.subf %6, %18 : vector<1024x8xf32>
    %cst_9 = arith.constant 9.99999974E-6 : f32
    %20 = vector.broadcast %cst_9 : f32 to vector<1024x1xf32>
    %21 = arith.addf %17, %20 : vector<1024x1xf32>
    %22 = math.rsqrt %21 : vector<1024x1xf32>
    %23 = vector.broadcast %22 : vector<1024x1xf32> to vector<1024x8xf32>
    %24 = arith.mulf %19, %23 : vector<1024x8xf32>
    %c0_10 = arith.constant 0 : index
    %c0_11 = arith.constant 0 : index
    %25 = vector.load %arg4[%c0_10, %c0_11] : memref<1x8xf32, #tpu.memory_space<vmem>>, vector<1x8xf32>
    %26 = vector.broadcast %25 : vector<1x8xf32> to vector<1024x8xf32>
    %27 = arith.mulf %24, %26 : vector<1024x8xf32>
    %c0_12 = arith.constant 0 : index
    %c0_13 = arith.constant 0 : index
    %28 = vector.load %arg5[%c0_12, %c0_13] : memref<1x8xf32, #tpu.memory_space<vmem>>, vector<1x8xf32>
    %29 = vector.broadcast %28 : vector<1x8xf32> to vector<1024x8xf32>
    %30 = arith.addf %27, %29 : vector<1024x8xf32>
    %c0_14 = arith.constant 0 : index
    %c0_15 = arith.constant 0 : index
    %31 = vector.load %arg6[%c0_14, %c0_15] : memref<1024x8xf32, #tpu.memory_space<vmem>>, vector<1024x8xf32>
    tpu.vector_store %arg6[%c0_14, %c0_15], %30 {strides = array<i32>} : memref<1024x8xf32, #tpu.memory_space<vmem>>, vector<1024x8xf32>,
    return
  }
  func.func @transform_0(%arg0: i32) -> (i32, i32) {
    %c0_i32 = arith.constant 0 : i32
    %c0_i32_0 = arith.constant 0 : i32
    return %arg0, %c0_i32 : i32, i32
  }
  func.func @transform_1(%arg0: i32) -> (i32, i32) {
    %c0_i32 = arith.constant 0 : i32
    %c0_i32_0 = arith.constant 0 : i32
    %c0_i32_1 = arith.constant 0 : i32
    return %c0_i32, %c0_i32_0 : i32, i32
  }
  func.func @transform_2(%arg0: i32) -> (i32, i32) {
    %c0_i32 = arith.constant 0 : i32
    %c0_i32_0 = arith.constant 0 : i32
    %c0_i32_1 = arith.constant 0 : i32
    return %c0_i32, %c0_i32_0 : i32, i32
  }
  func.func @transform_3(%arg0: i32) -> (i32, i32) {
    %c0_i32 = arith.constant 0 : i32
    %c0_i32_0 = arith.constant 0 : i32
    %c0_i32_1 = arith.constant 0 : i32
    return %c0_i32, %c0_i32_0 : i32, i32
  }
  func.func @transform_4(%arg0: i32) -> (i32, i32) {
    %c0_i32 = arith.constant 0 : i32
    %c0_i32_0 = arith.constant 0 : i32
    %c0_i32_1 = arith.constant 0 : i32
    return %c0_i32, %c0_i32_0 : i32, i32
  }
  func.func @transform_5(%arg0: i32) -> (i32, i32) {
    %c0_i32 = arith.constant 0 : i32
    %c0_i32_0 = arith.constant 0 : i32
    return %arg0, %c0_i32 : i32, i32
  }
}

</mosaic_0001>

<bundles_post_ra>
// kernel: tpu_custom_call.1
= control target key start
LH: loop header
LB: loop body
LE: loop exit
PB: predicated region body
PF: predicated region fallthrough
CT: control target
= control target key end

     0   :  { %s3874_s18 = smov 0   ;;  %s6703_s0 = inlined_call_operand.vmem [shape: f32[4096,8], index: 0, kind: input, shape index: {}]   ;;  %s6704_s1 = inlined_call_operand.vmem [shape: bf16[8,8], index: 1, kind: input, shape index: {}]   ;;  %s6705_s2 = inlined_call_operand.vmem [shape: f32[1,8], index: 2, kind: input, shape index: {}]   ;;  %s6706_s3 = inlined_call_operand.vmem [shape: f32[1,8], index: 3, kind: input, shape index: {}]   ;;  %s6707_s4 = inlined_call_operand.vmem [shape: f32[1,8], index: 4, kind: input, shape index: {}]   ;;  %s6708_s5 = inlined_call_operand.vmem [shape: f32[4096,8], index: 5, kind: output, shape index: {}]  }
   0x1 LB: > { %s3290_s19 = sadd.s32 4294967295, %s3842_s18   ;;  %p3294_p0 = scmp.ge.s32.totalorder %s3842_s18, 1  ;;  %s3842_s18 = sphi %s3874_s18, %s15_s18  }
   0x2   : > { %p188_p1 = scmp.lt.s32.totalorder %s3842_s18, 5 }
   0x4   : > { %p189_p2 = pnand %p3294_p0, %p188_p1 }
   0x6   : > { %192 = sbr.rel (%p189_p2) target bundleno = 889 (0x379), region = 40 }
   0xb   : > { %v421_v0 = vld [vmem:[%s6704_s1] sm:$0xf]  ;;  %vm622_vm0 = vcmask 1043456   ;;  %s3295_s22 = sshll.u32 %s3290_s19, 7  ;;  %vm429_vm1 = vcmask 64512  }
   0xc   : > { %3565 = vmatprep.subr.msk.bf16.mxu0 %vm622_vm0, %v421_v0  ;;  %3566 = vmatprep.subr.msk.bf16.mxu1 %vm622_vm0, %v421_v0  ;;  %v624_v1 = vsel %vm622_vm0, %v421_v0, 0  ;;  %p217_p3 = scmp.lt.s32.totalorder %s3295_s22, 511 }
   0xd   : > { %3434 = vmatpush3.bf16.msra.mxu0 %v624_v1  ;;  %3564 = vmatpush3.bf16.msra.mxu1 %v624_v1 }
   0xe   : > { %s7416_s22 = smov (!%p217_p3, %s3295_s22), 511 }
   0xf   : > { %s3296_s23 = sshll.u32 %s7416_s22, 3 }
  0x10   : > { %s3893_s26 = scalar_lea.vmem %s6703_s0, %s3296_s23  ;;  %s5821_s12 = scalar_lea.vmem %s6708_s5, %s3296_s23 }
  0x11   : > { %v229_v2 = vld [vmem:[%s3893_s26] sm:$0xff]  ;;  %v230_v3 = vld [vmem:[%s3893_s26 + $0x8] sm:$0xff]  ;;  %v231_v7 = vld [vmem:[%s3893_s26 + $0x10] sm:$0xff] }
  0x12   : > { %v293_v4 = vld [vmem:[%s3893_s26 + $0x200] sm:$0xff]  ;;  %v357_v5 = vpack.c.bf16 %v230_v3, %v229_v2  ;;  %v294_v6 = vld [vmem:[%s3893_s26 + $0x208] sm:$0xff]  ;;  %v232_v8 = vld [vmem:[%s3893_s26 + $0x18] sm:$0xff] }
  0x13   : > { %v389_v9 = vpack.c.bf16 %v294_v6, %v293_v4  ;;  %v358_v10 = vpack.c.bf16 %v232_v8, %v231_v7  ;;  %v295_v11 = vld [vmem:[%s3893_s26 + $0x210] sm:$0xff]  ;;  %v296_v12 = vld [vmem:[%s3893_s26 + $0x218] sm:$0xff]  ;;  %v233_v13 = vld [vmem:[%s3893_s26 + $0x20] sm:$0xff] }
  0x14   : > { %3435 = vmatprep.mubr.msk.bf16.mxu0 %vm429_vm1, %v357_v5  ;;  %v390_v14 = vpack.c.bf16 %v296_v12, %v295_v11  ;;  %v234_v15 = vld [vmem:[%s3893_s26 + $0x28] sm:$0xff]  ;;  %v297_v17 = vld [vmem:[%s3893_s26 + $0x220] sm:$0xff]  ;;  %v235_v19 = vld [vmem:[%s3893_s26 + $0x30] sm:$0xff] }
  0x15   : > { %3499 = vmatprep.mubr.msk.bf16.mxu1 %vm429_vm1, %v389_v9  ;;  %3436 = vmatmul.mubr.msk.bf16.vlgmr.msra.gmra.mxu0 %vm429_vm1, %v358_v10  ;;  %v359_v16 = vpack.c.bf16 %v234_v15, %v233_v13  ;;  %v298_v18 = vld [vmem:[%s3893_s26 + $0x228] sm:$0xff]  ;;  %v236_v20 = vld [vmem:[%s3893_s26 + $0x38] sm:$0xff]  ;;  %v299_v22 = vld [vmem:[%s3893_s26 + $0x230] sm:$0xff] }
  0x16   : > { %3500 = vmatmul.mubr.msk.bf16.vlgmr.msra.gmra.mxu1 %vm429_vm1, %v390_v14  ;;  %v391_v21 = vpack.c.bf16 %v298_v18, %v297_v17  ;;  %v300_v23 = vld [vmem:[%s3893_s26 + $0x238] sm:$0xff]  ;;  %v237_v24 = vld [vmem:[%s3893_s26 + $0x40] sm:$0xff]  ;;  %v238_v25 = vld [vmem:[%s3893_s26 + $0x48] sm:$0xff]  ;;  %v360_v28 = vpack.c.bf16 %v236_v20, %v235_v19 }
  0x17   : > { %3439 = vmatprep.mubr.msk.bf16.mxu0 %vm429_vm1, %v359_v16  ;;  %v301_v26 = vld [vmem:[%s3893_s26 + $0x240] sm:$0xff]  ;;  %v302_v27 = vld [vmem:[%s3893_s26 + $0x248] sm:$0xff]  ;;  %v392_v29 = vpack.c.bf16 %v300_v23, %v299_v22  ;;  %v361_v30 = vpack.c.bf16 %v238_v25, %v237_v24  ;;  %v239_v32 = vld [vmem:[%s3893_s26 + $0x50] sm:$0xff] }
  0x18   : > { %3503 = vmatprep.mubr.msk.bf16.mxu1 %vm429_vm1, %v391_v21  ;;  %v393_v31 = vpack.c.bf16 %v302_v27, %v301_v26  ;;  %v240_v33 = vld [vmem:[%s3893_s26 + $0x58] sm:$0xff]  ;;  %v303_v34 = vld [vmem:[%s3893_s26 + $0x250] sm:$0xff]  ;;  %v241_v36 = vld [vmem:[%s3893_s26 + $0x60] sm:$0xff] }
  0x19   : > { %v304_v35 = vld [vmem:[%s3893_s26 + $0x258] sm:$0xff]  ;;  %v242_v37 = vld [vmem:[%s3893_s26 + $0x68] sm:$0xff]  ;;  %v305_v38 = vld [vmem:[%s3893_s26 + $0x260] sm:$0xff]  ;;  %v362_v40 = vpack.c.bf16 %v240_v33, %v239_v32 }
  0x1a   : > { %v306_v39 = vld [vmem:[%s3893_s26 + $0x268] sm:$0xff]  ;;  %v394_v41 = vpack.c.bf16 %v304_v35, %v303_v34  ;;  %v363_v42 = vpack.c.bf16 %v242_v37, %v241_v36  ;;  %v243_v44 = vld [vmem:[%s3893_s26 + $0x70] sm:$0xff]  ;;  %v244_v45 = vld [vmem:[%s3893_s26 + $0x78] sm:$0xff] }
  0x1b   : > { %v395_v43 = vpack.c.bf16 %v306_v39, %v305_v38  ;;  %v307_v46 = vld [vmem:[%s3893_s26 + $0x270] sm:$0xff]  ;;  %v308_v47 = vld [vmem:[%s3893_s26 + $0x278] sm:$0xff]  ;;  %v245_v48 = vld [vmem:[%s3893_s26 + $0x80] sm:$0xff]  ;;  %v364_v52 = vpack.c.bf16 %v244_v45, %v243_v44 }
  0x1c   : > { %v246_v49 = vld [vmem:[%s3893_s26 + $0x88] sm:$0xff]  ;;  %v309_v50 = vld [vmem:[%s3893_s26 + $0x280] sm:$0xff]  ;;  %v396_v53 = vpack.c.bf16 %v308_v47, %v307_v46  ;;  %v247_v56 = vld [vmem:[%s3893_s26 + $0x90] sm:$0xff] }
  0x1d   : > { %3440 = vmatmul.mubr.msk.bf16.gmra.mxu0 %vm429_vm1, %v360_v28  ;;  %v310_v51 = vld [vmem:[%s3893_s26 + $0x288] sm:$0xff]  ;;  %v365_v54 = vpack.c.bf16 %v246_v49, %v245_v48  ;;  %v248_v57 = vld [vmem:[%s3893_s26 + $0x98] sm:$0xff]  ;;  %v311_v58 = vld [vmem:[%s3893_s26 + $0x290] sm:$0xff] }
  0x1e   : > { %3504 = vmatmul.mubr.msk.bf16.gmra.mxu1 %vm429_vm1, %v392_v29  ;;  %3443 = vmatprep.mubr.msk.bf16.mxu0 %vm429_vm1, %v361_v30  ;;  %v397_v55 = vpack.c.bf16 %v310_v51, %v309_v50  ;;  %v312_v59 = vld [vmem:[%s3893_s26 + $0x298] sm:$0xff]  ;;  %v249_v60 = vld [vmem:[%s3893_s26 + $0xa0] sm:$0xff]  ;;  %v250_v61 = vld [vmem:[%s3893_s26 + $0xa8] sm:$0xff]  ;;  %v366_v0 = vpack.c.bf16 %v248_v57, %v247_v56 }
  0x1f   : > { %3507 = vmatprep.mubr.msk.bf16.mxu1 %vm429_vm1, %v393_v31  ;;  %v313_v62 = vld [vmem:[%s3893_s26 + $0x2a0] sm:$0xff]  ;;  %v314_v63 = vld [vmem:[%s3893_s26 + $0x2a8] sm:$0xff]  ;;  %v398_v1 = vpack.c.bf16 %v312_v59, %v311_v58  ;;  %v367_v2 = vpack.c.bf16 %v250_v61, %v249_v60  ;;  %v251_v4 = vld [vmem:[%s3893_s26 + $0xb0] sm:$0xff] }
  0x20   : > { %v399_v3 = vpack.c.bf16 %v314_v63, %v313_v62  ;;  %v252_v5 = vld [vmem:[%s3893_s26 + $0xb8] sm:$0xff]  ;;  %v315_v6 = vld [vmem:[%s3893_s26 + $0x2b0] sm:$0xff]  ;;  %v253_v8 = vld [vmem:[%s3893_s26 + $0xc0] sm:$0xff] }
  0x21   : > { %v316_v7 = vld [vmem:[%s3893_s26 + $0x2b8] sm:$0xff]  ;;  %v254_v9 = vld [vmem:[%s3893_s26 + $0xc8] sm:$0xff]  ;;  %v317_v10 = vld [vmem:[%s3893_s26 + $0x2c0] sm:$0xff]  ;;  %v368_v12 = vpack.c.bf16 %v252_v5, %v251_v4 }
  0x22   : > { %v318_v11 = vld [vmem:[%s3893_s26 + $0x2c8] sm:$0xff]  ;;  %v400_v13 = vpack.c.bf16 %v316_v7, %v315_v6  ;;  %v369_v14 = vpack.c.bf16 %v254_v9, %v253_v8  ;;  %v255_v16 = vld [vmem:[%s3893_s26 + $0xd0] sm:$0xff]  ;;  %v256_v17 = vld [vmem:[%s3893_s26 + $0xd8] sm:$0xff] }
  0x23   : > { %v401_v15 = vpack.c.bf16 %v318_v11, %v317_v10  ;;  %v319_v18 = vld [vmem:[%s3893_s26 + $0x2d0] sm:$0xff]  ;;  %v320_v19 = vld [vmem:[%s3893_s26 + $0x2d8] sm:$0xff]  ;;  %v257_v20 = vld [vmem:[%s3893_s26 + $0xe0] sm:$0xff]  ;;  %v370_v24 = vpack.c.bf16 %v256_v17, %v255_v16 }
  0x24   : > { %v258_v21 = vld [vmem:[%s3893_s26 + $0xe8] sm:$0xff]  ;;  %v321_v22 = vld [vmem:[%s3893_s26 + $0x2e0] sm:$0xff]  ;;  %v402_v25 = vpack.c.bf16 %v320_v19, %v319_v18  ;;  %v259_v28 = vld [vmem:[%s3893_s26 + $0xf0] sm:$0xff] }
  0x25   : > { %3444 = vmatmul.mubr.msk.bf16.gmra.mxu0 %vm429_vm1, %v362_v40  ;;  %v322_v23 = vld [vmem:[%s3893_s26 + $0x2e8] sm:$0xff]  ;;  %v371_v26 = vpack.c.bf16 %v258_v21, %v257_v20  ;;  %v260_v29 = vld [vmem:[%s3893_s26 + $0xf8] sm:$0xff]  ;;  %v323_v30 = vld [vmem:[%s3893_s26 + $0x2f0] sm:$0xff] }
  0x26   : > { %3508 = vmatmul.mubr.msk.bf16.gmra.mxu1 %vm429_vm1, %v394_v41  ;;  %3447 = vmatprep.mubr.msk.bf16.mxu0 %vm429_vm1, %v363_v42  ;;  %v403_v27 = vpack.c.bf16 %v322_v23, %v321_v22  ;;  %v324_v31 = vld [vmem:[%s3893_s26 + $0x2f8] sm:$0xff]  ;;  %v261_v32 = vld [vmem:[%s3893_s26 + $0x100] sm:$0xff]  ;;  %v262_v33 = vld [vmem:[%s3893_s26 + $0x108] sm:$0xff]  ;;  %v372_v36 = vpack.c.bf16 %v260_v29, %v259_v28 }
  0x27   : > { %3511 = vmatprep.mubr.msk.bf16.mxu1 %vm429_vm1, %v395_v43  ;;  %v325_v34 = vld [vmem:[%s3893_s26 + $0x300] sm:$0xff]  ;;  %v326_v35 = vld [vmem:[%s3893_s26 + $0x308] sm:$0xff]  ;;  %v404_v37 = vpack.c.bf16 %v324_v31, %v323_v30  ;;  %v373_v38 = vpack.c.bf16 %v262_v33, %v261_v32  ;;  %v263_v40 = vld [vmem:[%s3893_s26 + $0x110] sm:$0xff] }
  0x28   : > { %v405_v39 = vpack.c.bf16 %v326_v35, %v325_v34  ;;  %v264_v41 = vld [vmem:[%s3893_s26 + $0x118] sm:$0xff]  ;;  %v327_v42 = vld [vmem:[%s3893_s26 + $0x310] sm:$0xff]  ;;  %v265_v44 = vld [vmem:[%s3893_s26 + $0x120] sm:$0xff] }
  0x29   : > { %v328_v43 = vld [vmem:[%s3893_s26 + $0x318] sm:$0xff]  ;;  %v266_v45 = vld [vmem:[%s3893_s26 + $0x128] sm:$0xff]  ;;  %v329_v46 = vld [vmem:[%s3893_s26 + $0x320] sm:$0xff]  ;;  %v374_v48 = vpack.c.bf16 %v264_v41, %v263_v40 }
  0x2a   : > { %v330_v47 = vld [vmem:[%s3893_s26 + $0x328] sm:$0xff]  ;;  %v406_v49 = vpack.c.bf16 %v328_v43, %v327_v42  ;;  %v375_v50 = vpack.c.bf16 %v266_v45, %v265_v44  ;;  %v269_v56 = vld [vmem:[%s3893_s26 + $0x140] sm:$0xff] }
  0x2b   : > { %v407_v51 = vpack.c.bf16 %v330_v47, %v329_v46  ;;  %v270_v57 = vld [vmem:[%s3893_s26 + $0x148] sm:$0xff]  ;;  %v333_v58 = vld [vmem:[%s3893_s26 + $0x340] sm:$0xff] }
  0x2c   : > { %v334_v59 = vld [vmem:[%s3893_s26 + $0x348] sm:$0xff]  ;;  %v377_v62 = vpack.c.bf16 %v270_v57, %v269_v56  ;;  %v273_v4 = vld [vmem:[%s3893_s26 + $0x160] sm:$0xff] }
  0x2d   : > { %3448 = vmatmul.mubr.msk.bf16.gmra.mxu0 %vm429_vm1, %v364_v52  ;;  %v267_v52 = vld [vmem:[%s3893_s26 + $0x130] sm:$0xff]  ;;  %v409_v63 = vpack.c.bf16 %v334_v59, %v333_v58  ;;  %v274_v5 = vld [vmem:[%s3893_s26 + $0x168] sm:$0xff]  ;;  %v337_v6 = vld [vmem:[%s3893_s26 + $0x360] sm:$0xff] }
  0x2e   : > { %3512 = vmatmul.mubr.msk.bf16.gmra.mxu1 %vm429_vm1, %v396_v53  ;;  %3451 = vmatprep.mubr.msk.bf16.mxu0 %vm429_vm1, %v365_v54  ;;  %v268_v53 = vld [vmem:[%s3893_s26 + $0x138] sm:$0xff]  ;;  %v331_v54 = vld [vmem:[%s3893_s26 + $0x330] sm:$0xff]  ;;  %v338_v7 = vld [vmem:[%s3893_s26 + $0x368] sm:$0xff]  ;;  %v379_v10 = vpack.c.bf16 %v274_v5, %v273_v4 }
  0x2f   : > { %3515 = vmatprep.mubr.msk.bf16.mxu1 %vm429_vm1, %v397_v55  ;;  %v332_v55 = vld [vmem:[%s3893_s26 + $0x338] sm:$0xff]  ;;  %v376_v60 = vpack.c.bf16 %v268_v53, %v267_v52  ;;  %v411_v11 = vpack.c.bf16 %v338_v7, %v337_v6  ;;  %v277_v16 = vld [vmem:[%s3893_s26 + $0x180] sm:$0xff]  ;;  %v278_v17 = vld [vmem:[%s3893_s26 + $0x188] sm:$0xff] }
  0x30   : > { %v408_v61 = vpack.c.bf16 %v332_v55, %v331_v54  ;;  %v341_v18 = vld [vmem:[%s3893_s26 + $0x380] sm:$0xff]  ;;  %v342_v19 = vld [vmem:[%s3893_s26 + $0x388] sm:$0xff]  ;;  %v381_v22 = vpack.c.bf16 %v278_v17, %v277_v16 }
  0x31   : > { %v413_v23 = vpack.c.bf16 %v342_v19, %v341_v18  ;;  %v281_v28 = vld [vmem:[%s3893_s26 + $0x1a0] sm:$0xff]  ;;  %v282_v29 = vld [vmem:[%s3893_s26 + $0x1a8] sm:$0xff] }
  0x32   : > { %v345_v30 = vld [vmem:[%s3893_s26 + $0x3a0] sm:$0xff]  ;;  %v346_v31 = vld [vmem:[%s3893_s26 + $0x3a8] sm:$0xff]  ;;  %v383_v34 = vpack.c.bf16 %v282_v29, %v281_v28 }
  0x33   : > { %v415_v35 = vpack.c.bf16 %v346_v31, %v345_v30  ;;  %v285_v40 = vld [vmem:[%s3893_s26 + $0x1c0] sm:$0xff]  ;;  %v286_v41 = vld [vmem:[%s3893_s26 + $0x1c8] sm:$0xff] }
  0x34   : > { %v349_v42 = vld [vmem:[%s3893_s26 + $0x3c0] sm:$0xff]  ;;  %v350_v43 = vld [vmem:[%s3893_s26 + $0x3c8] sm:$0xff]  ;;  %v385_v46 = vpack.c.bf16 %v286_v41, %v285_v40 }
  0x35   : > { %3452 = vmatmul.mubr.msk.bf16.gmra.mxu0 %vm429_vm1, %v366_v0  ;;  %v271_v0 = vld [vmem:[%s3893_s26 + $0x150] sm:$0xff]  ;;  %v417_v47 = vpack.c.bf16 %v350_v43, %v349_v42  ;;  %v289_v52 = vld [vmem:[%s3893_s26 + $0x1e0] sm:$0xff]  ;;  %v290_v53 = vld [vmem:[%s3893_s26 + $0x1e8] sm:$0xff] }
  0x36   : > { %3516 = vmatmul.mubr.msk.bf16.gmra.mxu1 %vm429_vm1, %v398_v1  ;;  %3455 = vmatprep.mubr.msk.bf16.mxu0 %vm429_vm1, %v367_v2  ;;  %v272_v1 = vld [vmem:[%s3893_s26 + $0x158] sm:$0xff]  ;;  %v335_v2 = vld [vmem:[%s3893_s26 + $0x350] sm:$0xff]  ;;  %v353_v54 = vld [vmem:[%s3893_s26 + $0x3e0] sm:$0xff]  ;;  %v387_v58 = vpack.c.bf16 %v290_v53, %v289_v52 }
  0x37   : > { %3519 = vmatprep.mubr.msk.bf16.mxu1 %vm429_vm1, %v399_v3  ;;  %v336_v3 = vld [vmem:[%s3893_s26 + $0x358] sm:$0xff]  ;;  %v378_v8 = vpack.c.bf16 %v272_v1, %v271_v0  ;;  %v354_v55 = vld [vmem:[%s3893_s26 + $0x3e8] sm:$0xff] }
  0x38   : > { %v410_v9 = vpack.c.bf16 %v336_v3, %v335_v2  ;;  %v419_v59 = vpack.c.bf16 %v354_v55, %v353_v54  ;;  %v4090_v2 = vld [vmem:[%s6705_s2] ss:$0 sm:$0xff] }
  0x3d   : > { %3456 = vmatmul.mubr.msk.bf16.gmra.mxu0 %vm429_vm1, %v368_v12  ;;  %v275_v12 = vld [vmem:[%s3893_s26 + $0x170] sm:$0xff] }
  0x3e   : > { %3520 = vmatmul.mubr.msk.bf16.gmra.mxu1 %vm429_vm1, %v400_v13  ;;  %3459 = vmatprep.mubr.msk.bf16.mxu0 %vm429_vm1, %v369_v14  ;;  %v276_v13 = vld [vmem:[%s3893_s26 + $0x178] sm:$0xff]  ;;  %v339_v14 = vld [vmem:[%s3893_s26 + $0x370] sm:$0xff] }
  0x3f   : > { %3523 = vmatprep.mubr.msk.bf16.mxu1 %vm429_vm1, %v401_v15  ;;  %v340_v15 = vld [vmem:[%s3893_s26 + $0x378] sm:$0xff]  ;;  %v380_v20 = vpack.c.bf16 %v276_v13, %v275_v12 }
  0x40   : > { %v412_v21 = vpack.c.bf16 %v340_v15, %v339_v14 }
  0x45   : > { %3460 = vmatmul.mubr.msk.bf16.gmra.mxu0 %vm429_vm1, %v370_v24  ;;  %v279_v24 = vld [vmem:[%s3893_s26 + $0x190] sm:$0xff] }
  0x46   : > { %3524 = vmatmul.mubr.msk.bf16.gmra.mxu1 %vm429_vm1, %v402_v25  ;;  %3463 = vmatprep.mubr.msk.bf16.mxu0 %vm429_vm1, %v371_v26  ;;  %v280_v25 = vld [vmem:[%s3893_s26 + $0x198] sm:$0xff]  ;;  %v343_v26 = vld [vmem:[%s3893_s26 + $0x390] sm:$0xff] }
  0x47   : > { %3527 = vmatprep.mubr.msk.bf16.mxu1 %vm429_vm1, %v403_v27  ;;  %v344_v27 = vld [vmem:[%s3893_s26 + $0x398] sm:$0xff]  ;;  %v382_v32 = vpack.c.bf16 %v280_v25, %v279_v24 }
  0x48   : > { %v414_v33 = vpack.c.bf16 %v344_v27, %v343_v26 }
  0x4d   : > { %3464 = vmatmul.mubr.msk.bf16.gmra.mxu0 %vm429_vm1, %v372_v36  ;;  %v283_v36 = vld [vmem:[%s3893_s26 + $0x1b0] sm:$0xff] }
  0x4e   : > { %3528 = vmatmul.mubr.msk.bf16.gmra.mxu1 %vm429_vm1, %v404_v37  ;;  %3467 = vmatprep.mubr.msk.bf16.mxu0 %vm429_vm1, %v373_v38  ;;  %v284_v37 = vld [vmem:[%s3893_s26 + $0x1b8] sm:$0xff]  ;;  %v347_v38 = vld [vmem:[%s3893_s26 + $0x3b0] sm:$0xff] }
  0x4f   : > { %3531 = vmatprep.mubr.msk.bf16.mxu1 %vm429_vm1, %v405_v39  ;;  %v348_v39 = vld [vmem:[%s3893_s26 + $0x3b8] sm:$0xff]  ;;  %v384_v44 = vpack.c.bf16 %v284_v37, %v283_v36 }
  0x50   : > { %v416_v45 = vpack.c.bf16 %v348_v39, %v347_v38 }
  0x55   : > { %3468 = vmatmul.mubr.msk.bf16.gmra.mxu0 %vm429_vm1, %v374_v48  ;;  %v287_v48 = vld [vmem:[%s3893_s26 + $0x1d0] sm:$0xff] }
  0x56   : > { %3532 = vmatmul.mubr.msk.bf16.gmra.mxu1 %vm429_vm1, %v406_v49  ;;  %3471 = vmatprep.mubr.msk.bf16.mxu0 %vm429_vm1, %v375_v50  ;;  %v288_v49 = vld [vmem:[%s3893_s26 + $0x1d8] sm:$0xff]  ;;  %v351_v50 = vld [vmem:[%s3893_s26 + $0x3d0] sm:$0xff] }
  0x57   : > { %3535 = vmatprep.mubr.msk.bf16.mxu1 %vm429_vm1, %v407_v51  ;;  %v352_v51 = vld [vmem:[%s3893_s26 + $0x3d8] sm:$0xff]  ;;  %v386_v56 = vpack.c.bf16 %v288_v49, %v287_v48 }
  0x58   : > { %v418_v57 = vpack.c.bf16 %v352_v51, %v351_v50 }
  0x5d   : > { %3472 = vmatmul.mubr.msk.bf16.gmra.mxu0 %vm429_vm1, %v376_v60  ;;  %v291_v60 = vld [vmem:[%s3893_s26 + $0x1f0] sm:$0xff] }
  0x5e   : > { %3536 = vmatmul.mubr.msk.bf16.gmra.mxu1 %vm429_vm1, %v408_v61  ;;  %3475 = vmatprep.mubr.msk.bf16.mxu0 %vm429_vm1, %v377_v62  ;;  %v292_v61 = vld [vmem:[%s3893_s26 + $0x1f8] sm:$0xff]  ;;  %v355_v62 = vld [vmem:[%s3893_s26 + $0x3f0] sm:$0xff] }
  0x5f   : > { %3539 = vmatprep.mubr.msk.bf16.mxu1 %vm429_vm1, %v409_v63  ;;  %v356_v63 = vld [vmem:[%s3893_s26 + $0x3f8] sm:$0xff]  ;;  %v388_v0 = vpack.c.bf16 %v292_v61, %v291_v60 }
  0x60   : > { %v420_v1 = vpack.c.bf16 %v356_v63, %v355_v62 }
  0x65   : > { %3476 = vmatmul.mubr.msk.bf16.gmra.mxu0 %vm429_vm1, %v378_v8 }
  0x66   : > { %3540 = vmatmul.mubr.msk.bf16.gmra.mxu1 %vm429_vm1, %v410_v9  ;;  %3479 = vmatprep.mubr.msk.bf16.mxu0 %vm429_vm1, %v379_v10 }
  0x67   : > { %3543 = vmatprep.mubr.msk.bf16.mxu1 %vm429_vm1, %v411_v11 }
  0x6d   : > { %3480 = vmatmul.mubr.msk.bf16.gmra.mxu0 %vm429_vm1, %v380_v20 }
  0x6e   : > { %3544 = vmatmul.mubr.msk.bf16.gmra.mxu1 %vm429_vm1, %v412_v21  ;;  %3483 = vmatprep.mubr.msk.bf16.mxu0 %vm429_vm1, %v381_v22 }
  0x6f   : > { %3547 = vmatprep.mubr.msk.bf16.mxu1 %vm429_vm1, %v413_v23 }
  0x75   : > { %3484 = vmatmul.mubr.msk.bf16.gmra.mxu0 %vm429_vm1, %v382_v32 }
  0x76   : > { %3548 = vmatmul.mubr.msk.bf16.gmra.mxu1 %vm429_vm1, %v414_v33  ;;  %3487 = vmatprep.mubr.msk.bf16.mxu0 %vm429_vm1, %v383_v34 }
  0x77   : > { %3551 = vmatprep.mubr.msk.bf16.mxu1 %vm429_vm1, %v415_v35 }
  0x7d   : > { %3488 = vmatmul.mubr.msk.bf16.gmra.mxu0 %vm429_vm1, %v384_v44 }
  0x7e   : > { %3552 = vmatmul.mubr.msk.bf16.gmra.mxu1 %vm429_vm1, %v416_v45  ;;  %3491 = vmatprep.mubr.msk.bf16.mxu0 %vm429_vm1, %v385_v46 }
  0x7f   : > { %3555 = vmatprep.mubr.msk.bf16.mxu1 %vm429_vm1, %v417_v47 }
  0x85   : > { %3492 = vmatmul.mubr.msk.bf16.gmra.mxu0 %vm429_vm1, %v386_v56 }
  0x86   : > { %3556 = vmatmul.mubr.msk.bf16.gmra.mxu1 %vm429_vm1, %v418_v57  ;;  %3495 = vmatprep.mubr.msk.bf16.mxu0 %vm429_vm1, %v387_v58 }
  0x87   : > { %3559 = vmatprep.mubr.msk.bf16.mxu1 %vm429_vm1, %v419_v59 }
  0x8d   : > { %3496 = vmatmul.mubr.msk.bf16.gmra.mxu0 %vm429_vm1, %v388_v0 }
  0x8e   : > { %3560 = vmatmul.mubr.msk.bf16.gmra.mxu1 %vm429_vm1, %v420_v1 }
  0xd5   : > { %v3437_v3 = vpop.f32.mrf.mxu0 }
  0xd6   : > { %v4093_v4 = vadd.f32 %v3437_v3, %v4090_v2  ;;  %v3501_v5 = vpop.f32.mrf.mxu1 }
  0xd7   : > { %v4096_v6 = vadd.f32 %v3501_v5, %v4090_v2  ;;  %v660_v7 = vpop.f32.mrf.mxu0 }
  0xd8   : > { %v916_v8 = vpop.f32.mrf.mxu1  ;;  %v1177_v9 = vsel %vm429_vm1, %v4093_v4, 0.0  ;;  %v4101_v10 = vadd.f32 %v4090_v2, %v660_v7 }
  0xd9   : > { %v1369_v11 = vsel %vm429_vm1, %v4096_v6, 0.0  ;;  %1178 = vadd.xlane.f32.xlu1 %v1177_v9  ;;  %v3438_v12 = vpop.f32.mrf.mxu0  ;;  %v4114_v18 = vadd.f32 %v4090_v2, %v916_v8 }
  0xda   : > { %1370 = vadd.xlane.f32.xlu0 %v1369_v11  ;;  %v3502_v13 = vpop.f32.mrf.mxu1  ;;  %v4106_v14 = vadd.f32 %v3438_v12, %v4090_v2  ;;  %v1171_v21 = vsel %vm429_vm1, %v4101_v10, 0.0 }
  0xdb   : > { %v663_v15 = vpop.f32.mrf.mxu0  ;;  %v4109_v16 = vadd.f32 %v3502_v13, %v4090_v2  ;;  %v1363_v28 = vsel %vm429_vm1, %v4114_v18, 0.0 }
  0xdc   : > { %v1180_v17 = vsel %vm429_vm1, %v4106_v14, 0.0  ;;  %v919_v19 = vpop.f32.mrf.mxu1  ;;  %v4124_v26 = vadd.f32 %v4090_v2, %v663_v15 }
  0xdd   : > { %1181 = vadd.xlane.f32.xlu1 %v1180_v17  ;;  %v3441_v20 = vpop.f32.mrf.mxu0  ;;  %v4119_v24 = vadd.f32 %v4090_v2, %v919_v19  ;;  %v1372_v25 = vsel %vm429_vm1, %v4109_v16, 0.0 }
  0xde   : > { %1172 = vadd.xlane.f32.xlu0 %v1171_v21  ;;  %v3505_v23 = vpop.f32.mrf.mxu1  ;;  %v4134_v32 = vadd.f32 %v3441_v20, %v4090_v2  ;;  %v1174_v33 = vsel %vm429_vm1, %v4124_v26, 0.0 }
  0xdf   : > { %v676_v22 = vpop.f32.mrf.mxu0  ;;  %v1366_v31 = vsel %vm429_vm1, %v4119_v24, 0.0  ;;  %v4144_v37 = vadd.f32 %v3505_v23, %v4090_v2 }
  0xe0   : > { %v932_v29 = vpop.f32.mrf.mxu1  ;;  %v1189_v39 = vsel %vm429_vm1, %v4134_v32, 0.0  ;;  %v4154_v43 = vadd.f32 %v4090_v2, %v676_v22 }
  0xe1   : > { %1373 = vadd.xlane.f32.xlu1 %v1372_v25  ;;  %v3442_v27 = vpop.f32.mrf.mxu0  ;;  %v1381_v45 = vsel %vm429_vm1, %v4144_v37, 0.0  ;;  %v4164_v50 = vadd.f32 %v4090_v2, %v932_v29 }
  0xe2   : > { %1364 = vadd.xlane.f32.xlu0 %v1363_v28  ;;  %v4129_v30 = vadd.f32 %v3442_v27, %v4090_v2  ;;  %v3506_v34 = vpop.f32.mrf.mxu1  ;;  %v1183_v51 = vsel %vm429_vm1, %v4154_v43, 0.0 }
  0xe3   : > { %v4139_v35 = vadd.f32 %v3506_v34, %v4090_v2  ;;  %v679_v38 = vpop.f32.mrf.mxu0  ;;  %v1375_v57 = vsel %vm429_vm1, %v4164_v50, 0.0 }
  0xe4   : > { %v1192_v36 = vsel %vm429_vm1, %v4129_v30, 0.0  ;;  %v4149_v41 = vadd.f32 %v4090_v2, %v679_v38  ;;  %v935_v44 = vpop.f32.mrf.mxu1 }
  0xe5   : > { %1367 = vadd.xlane.f32.xlu1 %v1366_v31  ;;  %v3445_v40 = vpop.f32.mrf.mxu0  ;;  %v1384_v42 = vsel %vm429_vm1, %v4139_v35, 0.0  ;;  %v4159_v48 = vadd.f32 %v4090_v2, %v935_v44 }
  0xe6   : > { %1175 = vadd.xlane.f32.xlu0 %v1174_v33  ;;  %v3509_v47 = vpop.f32.mrf.mxu1  ;;  %v1186_v49 = vsel %vm429_vm1, %v4149_v41, 0.0  ;;  %v4174_v56 = vadd.f32 %v3445_v40, %v4090_v2 }
  0xe7   : > { %v692_v46 = vpop.f32.mrf.mxu0  ;;  %v1378_v55 = vsel %vm429_vm1, %v4159_v48, 0.0  ;;  %v4184_v61 = vadd.f32 %v3509_v47, %v4090_v2 }
  0xe8   : > { %v948_v53 = vpop.f32.mrf.mxu1  ;;  %v1201_v63 = vsel %vm429_vm1, %v4174_v56, 0.0  ;;  %v4194_v5 = vadd.f32 %v4090_v2, %v692_v46 }
  0xe9   : > { %1193 = vadd.xlane.f32.xlu1 %v1192_v36  ;;  %v3446_v52 = vpop.f32.mrf.mxu0  ;;  %v1393_v8 = vsel %vm429_vm1, %v4184_v61, 0.0  ;;  %v4204_v15 = vadd.f32 %v4090_v2, %v948_v53 }
  0xea   : > { %1190 = vadd.xlane.f32.xlu0 %v1189_v39  ;;  %v4169_v54 = vadd.f32 %v3446_v52, %v4090_v2  ;;  %v3510_v58 = vpop.f32.mrf.mxu1  ;;  %v1195_v17 = vsel %vm429_vm1, %v4194_v5, 0.0 }
  0xeb   : > { %v4179_v59 = vadd.f32 %v3510_v58, %v4090_v2  ;;  %v695_v62 = vpop.f32.mrf.mxu0  ;;  %6920 = vst [vmem:[#allocation3_spill] sm:$0xff] %v4204_v15  ;;  %v1387_v25 = vsel %vm429_vm1, %v4204_v15, 0.0 }
  0xec   : > { %v1204_v60 = vsel %vm429_vm1, %v4169_v54, 0.0  ;;  %v4189_v1 = vadd.f32 %v4090_v2, %v695_v62  ;;  %v951_v7 = vpop.f32.mrf.mxu1 }
  0xed   : > { %1385 = vadd.xlane.f32.xlu1 %v1384_v42  ;;  %v3449_v0 = vpop.f32.mrf.mxu0  ;;  %v1396_v3 = vsel %vm429_vm1, %v4179_v59, 0.0  ;;  %v4199_v12 = vadd.f32 %v4090_v2, %v951_v7 }
  0xee   : > { %1382 = vadd.xlane.f32.xlu0 %v1381_v45  ;;  %v3513_v11 = vpop.f32.mrf.mxu1  ;;  %v1198_v13 = vsel %vm429_vm1, %v4189_v1, 0.0  ;;  %v4214_v23 = vadd.f32 %v3449_v0, %v4090_v2 }
  0xef   : > { %v708_v9 = vpop.f32.mrf.mxu0  ;;  %6919 = vst [vmem:[#allocation2_spill] sm:$0xff] %v4199_v12  ;;  %v1390_v22 = vsel %vm429_vm1, %v4199_v12, 0.0  ;;  %v4224_v31 = vadd.f32 %v3513_v11, %v4090_v2 }
  0xf0   : > { %v964_v20 = vpop.f32.mrf.mxu1  ;;  %6922 = vst [vmem:[#allocation5_spill] sm:$0xff] %v4214_v23  ;;  %v1213_v34 = vsel %vm429_vm1, %v4214_v23, 0.0  ;;  %v4234_v40 = vadd.f32 %v4090_v2, %v708_v9 }
  0xf1   : > { %1187 = vadd.xlane.f32.xlu1 %v1186_v49  ;;  %v3450_v19 = vpop.f32.mrf.mxu0  ;;  %6924 = vst [vmem:[#allocation7_spill] sm:$0xff] %v4224_v31  ;;  %v1405_v44 = vsel %vm429_vm1, %v4224_v31, 0.0 }
  0xf2   : > { %1184 = vadd.xlane.f32.xlu0 %v1183_v51  ;;  %v4209_v21 = vadd.f32 %v3450_v19, %v4090_v2  ;;  %v3514_v27 = vpop.f32.mrf.mxu1  ;;  %6926 = vst [vmem:[#allocation9_spill] sm:$0xff] %v4234_v40  ;;  %v4244_v51 = vadd.f32 %v4090_v2, %v964_v20  ;;  %v1207_v52 = vsel %vm429_vm1, %v4234_v40, 0.0 }
  0xf3   : > { %v4219_v28 = vadd.f32 %v3514_v27, %v4090_v2  ;;  %v711_v33 = vpop.f32.mrf.mxu0 }
  0xf4   : > { %6921 = vst [vmem:[#allocation4_spill] sm:$0xff] %v4209_v21  ;;  %v1216_v29 = vsel %vm429_vm1, %v4209_v21, 0.0  ;;  %v4229_v38 = vadd.f32 %v4090_v2, %v711_v33  ;;  %v967_v42 = vpop.f32.mrf.mxu1  ;;  %6928 = vst [vmem:[#allocation11_spill] sm:$0xff] %v4244_v51  ;;  %v1399_v62 = vsel %vm429_vm1, %v4244_v51, 0.0 }
  0xf5   : > { %1379 = vadd.xlane.f32.xlu1 %v1378_v55  ;;  %6923 = vst [vmem:[#allocation6_spill] sm:$0xff] %v4219_v28  ;;  %v3453_v36 = vpop.f32.mrf.mxu0  ;;  %v1408_v39 = vsel %vm429_vm1, %v4219_v28, 0.0  ;;  %v4239_v47 = vadd.f32 %v4090_v2, %v967_v42 }
  0xf6   : > { %1376 = vadd.xlane.f32.xlu0 %v1375_v57  ;;  %6925 = vst [vmem:[#allocation8_spill] sm:$0xff] %v4229_v38  ;;  %v3517_v46 = vpop.f32.mrf.mxu1  ;;  %v1210_v49 = vsel %vm429_vm1, %v4229_v38, 0.0 }
  0xf7   : > { %v724_v45 = vpop.f32.mrf.mxu0  ;;  %6927 = vst [vmem:[#allocation10_spill] sm:$0xff] %v4239_v47  ;;  %v1402_v58 = vsel %vm429_vm1, %v4239_v47, 0.0  ;;  %v4264_v7 = vadd.f32 %v3517_v46, %v4090_v2 }
  0xf8   : > { %v980_v55 = vpop.f32.mrf.mxu1  ;;  %v4274_v19 = vadd.f32 %v4090_v2, %v724_v45 }
  0xf9   : > { %1205 = vadd.xlane.f32.xlu1 %v1204_v60  ;;  %v3454_v53 = vpop.f32.mrf.mxu0  ;;  %v4254_v60 = vadd.f32 %v3453_v36, %v4090_v2  ;;  %6932 = vst [vmem:[#allocation15_spill] sm:$0xff] %v4264_v7 }
  0xfa   : > { %1202 = vadd.xlane.f32.xlu0 %v1201_v63  ;;  %v4249_v57 = vadd.f32 %v3454_v53, %v4090_v2  ;;  %v3518_v63 = vpop.f32.mrf.mxu1  ;;  %6934 = vst [vmem:[#allocation17_spill] sm:$0xff] %v4274_v19  ;;  %v1219_v36 = vsel %vm429_vm1, %v4274_v19, 0.0 }
  0xfb   : > { %6930 = vst [vmem:[#allocation13_spill] sm:$0xff] %v4254_v60  ;;  %v4259_v0 = vadd.f32 %v3518_v63, %v4090_v2  ;;  %v1225_v9 = vsel %vm429_vm1, %v4254_v60, 0.0 }
  0xfc   : > { %6929 = vst [vmem:[#allocation12_spill] sm:$0xff] %v4249_v57  ;;  %v983_v20 = vpop.f32.mrf.mxu1 }
  0xfd   : > { %1397 = vadd.xlane.f32.xlu1 %v1396_v3  ;;  %6931 = vst [vmem:[#allocation14_spill] sm:$0xff] %v4259_v0  ;;  %v1228_v3 = vsel %vm429_vm1, %v4249_v57, 0.0 }
  0xfe   : > { %1394 = vadd.xlane.f32.xlu0 %v1393_v8  ;;  %v727_v8 = vpop.f32.mrf.mxu0  ;;  %v3521_v27 = vpop.f32.mrf.mxu1 }
 0x100   : > { %v3457_v11 = vpop.f32.mrf.mxu0  ;;  %v996_v42 = vpop.f32.mrf.mxu1 }
 0x101   : > { %1199 = vadd.xlane.f32.xlu1 %v1198_v13  ;;  %v4269_v13 = vadd.f32 %v4090_v2, %v727_v8  ;;  %v4294_v46 = vadd.f32 %v3457_v11, %v4090_v2 }
 0x102   : > { %1196 = vadd.xlane.f32.xlu0 %v1195_v17  ;;  %v1420_v17 = vsel %vm429_vm1, %v4259_v0, 0.0 }
 0x103   : > { %6933 = vst [vmem:[#allocation16_spill] sm:$0xff] %v4269_v13  ;;  %v1222_v33 = vsel %vm429_vm1, %v4269_v13, 0.0  ;;  %6938 = vst [vmem:[#allocation21_spill] sm:$0xff] %v4294_v46  ;;  %v1237_v63 = vsel %vm429_vm1, %v4294_v46, 0.0 }
 0x105   : > { %1391 = vadd.xlane.f32.xlu1 %v1390_v22  ;;  %v1417_v22 = vsel %vm429_vm1, %v4264_v7, 0.0 }
 0x106   : > { %1388 = vadd.xlane.f32.xlu0 %v1387_v25  ;;  %v740_v25 = vpop.f32.mrf.mxu0 }
 0x107   : > { %v4314_v11 = vadd.f32 %v4090_v2, %v740_v25 }
 0x109   : > { %1217 = vadd.xlane.f32.xlu1 %v1216_v29  ;;  %v4279_v29 = vadd.f32 %v4090_v2, %v983_v20  ;;  %6942 = vst [vmem:[#allocation25_spill] sm:$0xff] %v4314_v11  ;;  %v1231_v25 = vsel %vm429_vm1, %v4314_v11, 0.0 }
 0x10a   : > { %1214 = vadd.xlane.f32.xlu0 %v1213_v34  ;;  %v4284_v34 = vadd.f32 %v4090_v2, %v980_v55 }
 0x10b   : > { %6935 = vst [vmem:[#allocation18_spill] sm:$0xff] %v4279_v29  ;;  %v1414_v45 = vsel %vm429_vm1, %v4279_v29, 0.0 }
 0x10c   : > { %6936 = vst [vmem:[#allocation19_spill] sm:$0xff] %v4284_v34 }
 0x10d   : > { %1409 = vadd.xlane.f32.xlu1 %v1408_v39  ;;  %v3458_v39 = vpop.f32.mrf.mxu0 }
 0x10e   : > { %1406 = vadd.xlane.f32.xlu0 %v1405_v44  ;;  %v4289_v44 = vadd.f32 %v3458_v39, %v4090_v2  ;;  %v4324_v39 = vadd.f32 %v4090_v2, %v996_v42 }
 0x110   : > { %6937 = vst [vmem:[#allocation20_spill] sm:$0xff] %v4289_v44  ;;  %v1240_v55 = vsel %vm429_vm1, %v4289_v44, 0.0  ;;  %6944 = vst [vmem:[#allocation27_spill] sm:$0xff] %v4324_v39  ;;  %v1423_v42 = vsel %vm429_vm1, %v4324_v39, 0.0 }
 0x111   : > { %1211 = vadd.xlane.f32.xlu1 %v1210_v49  ;;  %v1411_v49 = vsel %vm429_vm1, %v4284_v34, 0.0 }
 0x112   : > { %1208 = vadd.xlane.f32.xlu0 %v1207_v52  ;;  %v3522_v52 = vpop.f32.mrf.mxu1 }
 0x113   : > { %v4299_v53 = vadd.f32 %v3522_v52, %v4090_v2 }
 0x115   : > { %1403 = vadd.xlane.f32.xlu1 %v1402_v58  ;;  %6939 = vst [vmem:[#allocation22_spill] sm:$0xff] %v4299_v53  ;;  %v4304_v58 = vadd.f32 %v3521_v27, %v4090_v2 }
 0x116   : > { %1400 = vadd.xlane.f32.xlu0 %v1399_v62  ;;  %v743_v62 = vpop.f32.mrf.mxu0 }
 0x117   : > { %6940 = vst [vmem:[#allocation23_spill] sm:$0xff] %v4304_v58  ;;  %v4309_v8 = vadd.f32 %v4090_v2, %v743_v62  ;;  %v1429_v20 = vsel %vm429_vm1, %v4304_v58, 0.0 }
 0x119   : > { %1229 = vadd.xlane.f32.xlu1 %v1228_v3  ;;  %v3461_v3 = vpop.f32.mrf.mxu0  ;;  %6941 = vst [vmem:[#allocation24_spill] sm:$0xff] %v4309_v8 }
 0x11a   : > { %1226 = vadd.xlane.f32.xlu0 %v1225_v9  ;;  %v1432_v9 = vsel %vm429_vm1, %v4299_v53, 0.0  ;;  %v4334_v62 = vadd.f32 %v3461_v3, %v4090_v2 }
 0x11c   : > { %6946 = vst [vmem:[#allocation29_spill] sm:$0xff] %v4334_v62  ;;  %v1249_v3 = vsel %vm429_vm1, %v4334_v62, 0.0 }
 0x11d   : > { %1421 = vadd.xlane.f32.xlu1 %v1420_v17  ;;  %v999_v17 = vpop.f32.mrf.mxu1 }
 0x11e   : > { %1418 = vadd.xlane.f32.xlu0 %v1417_v22  ;;  %v756_v22 = vpop.f32.mrf.mxu0 }
 0x11f   : > { %v3525_v27 = vpop.f32.mrf.mxu1 }
 0x121   : > { %1223 = vadd.xlane.f32.xlu1 %v1222_v33  ;;  %v4319_v33 = vadd.f32 %v4090_v2, %v999_v17 }
 0x122   : > { %1220 = vadd.xlane.f32.xlu0 %v1219_v36  ;;  %v1234_v36 = vsel %vm429_vm1, %v4309_v8, 0.0 }
 0x123   : > { %6943 = vst [vmem:[#allocation26_spill] sm:$0xff] %v4319_v33 }
 0x125   : > { %1415 = vadd.xlane.f32.xlu1 %v1414_v45  ;;  %v3462_v45 = vpop.f32.mrf.mxu0 }
 0x126   : > { %1412 = vadd.xlane.f32.xlu0 %v1411_v49  ;;  %v1012_v49 = vpop.f32.mrf.mxu1  ;;  %v4329_v52 = vadd.f32 %v3462_v45, %v4090_v2 }
 0x127   : > { %v4364_v62 = vadd.f32 %v4090_v2, %v1012_v49 }
 0x128   : > { %6945 = vst [vmem:[#allocation28_spill] sm:$0xff] %v4329_v52  ;;  %v1252_v17 = vsel %vm429_vm1, %v4329_v52, 0.0 }
 0x129   : > { %1241 = vadd.xlane.f32.xlu1 %v1240_v55  ;;  %v1426_v55 = vsel %vm429_vm1, %v4319_v33, 0.0  ;;  %6952 = vst [vmem:[#allocation35_spill] sm:$0xff] %v4364_v62  ;;  %v1435_v49 = vsel %vm429_vm1, %v4364_v62, 0.0 }
 0x12a   : > { %1238 = vadd.xlane.f32.xlu0 %v1237_v63  ;;  %v3526_v63 = vpop.f32.mrf.mxu1 }
 0x12d   : > { %1433 = vadd.xlane.f32.xlu1 %v1432_v9  ;;  %v4339_v9 = vadd.f32 %v3526_v63, %v4090_v2  ;;  %v1015_v63 = vpop.f32.mrf.mxu1 }
 0x12e   : > { %1430 = vadd.xlane.f32.xlu0 %v1429_v20  ;;  %v4344_v20 = vadd.f32 %v3525_v27, %v4090_v2 }
 0x12f   : > { %6947 = vst [vmem:[#allocation30_spill] sm:$0xff] %v4339_v9  ;;  %v3529_v52 = vpop.f32.mrf.mxu1 }
 0x130   : > { %6948 = vst [vmem:[#allocation31_spill] sm:$0xff] %v4344_v20  ;;  %v1441_v27 = vsel %vm429_vm1, %v4344_v20, 0.0 }
 0x131   : > { %1235 = vadd.xlane.f32.xlu1 %v1234_v36  ;;  %v759_v36 = vpop.f32.mrf.mxu0 }
 0x132   : > { %1232 = vadd.xlane.f32.xlu0 %v1231_v25  ;;  %v4349_v45 = vadd.f32 %v4090_v2, %v759_v36 }
 0x133   : > { %v3465_v25 = vpop.f32.mrf.mxu0 }
 0x134   : > { %6949 = vst [vmem:[#allocation32_spill] sm:$0xff] %v4349_v45  ;;  %v1246_v36 = vsel %vm429_vm1, %v4349_v45, 0.0  ;;  %v4374_v20 = vadd.f32 %v3465_v25, %v4090_v2 }
 0x135   : > { %1427 = vadd.xlane.f32.xlu1 %v1426_v55  ;;  %v1444_v55 = vsel %vm429_vm1, %v4339_v9, 0.0  ;;  %v1028_v9 = vpop.f32.mrf.mxu1 }
 0x136   : > { %1424 = vadd.xlane.f32.xlu0 %v1423_v42  ;;  %v4354_v42 = vadd.f32 %v4090_v2, %v756_v22  ;;  %6954 = vst [vmem:[#allocation37_spill] sm:$0xff] %v4374_v20  ;;  %v1261_v25 = vsel %vm429_vm1, %v4374_v20, 0.0  ;;  %v4404_v20 = vadd.f32 %v4090_v2, %v1028_v9 }
 0x138   : > { %6950 = vst [vmem:[#allocation33_spill] sm:$0xff] %v4354_v42  ;;  %v1243_v22 = vsel %vm429_vm1, %v4354_v42, 0.0  ;;  %6960 = vst [vmem:[#allocation43_spill] sm:$0xff] %v4404_v20  ;;  %v1447_v9 = vsel %vm429_vm1, %v4404_v20, 0.0 }
 0x139   : > { %1253 = vadd.xlane.f32.xlu1 %v1252_v17  ;;  %v772_v17 = vpop.f32.mrf.mxu0 }
 0x13a   : > { %1250 = vadd.xlane.f32.xlu0 %v1249_v3  ;;  %v4359_v3 = vadd.f32 %v4090_v2, %v1015_v63 }
 0x13c   : > { %6951 = vst [vmem:[#allocation34_spill] sm:$0xff] %v4359_v3  ;;  %v1438_v63 = vsel %vm429_vm1, %v4359_v3, 0.0 }
 0x13d   : > { %1445 = vadd.xlane.f32.xlu1 %v1444_v55  ;;  %v3466_v55 = vpop.f32.mrf.mxu0 }
 0x13e   : > { %1442 = vadd.xlane.f32.xlu0 %v1441_v27  ;;  %v4369_v27 = vadd.f32 %v3466_v55, %v4090_v2  ;;  %v4384_v55 = vadd.f32 %v3529_v52, %v4090_v2 }
 0x13f   : > { %v775_v45 = vpop.f32.mrf.mxu0 }
 0x140   : > { %6953 = vst [vmem:[#allocation36_spill] sm:$0xff] %v4369_v27  ;;  %6956 = vst [vmem:[#allocation39_spill] sm:$0xff] %v4384_v55  ;;  %v4389_v62 = vadd.f32 %v4090_v2, %v775_v45  ;;  %v1453_v52 = vsel %vm429_vm1, %v4384_v55, 0.0 }
 0x141   : > { %1247 = vadd.xlane.f32.xlu1 %v1246_v36  ;;  %v3530_v36 = vpop.f32.mrf.mxu1 }
 0x142   : > { %1244 = vadd.xlane.f32.xlu0 %v1243_v22  ;;  %v4379_v42 = vadd.f32 %v3530_v36, %v4090_v2  ;;  %v1264_v22 = vsel %vm429_vm1, %v4369_v27, 0.0  ;;  %6957 = vst [vmem:[#allocation40_spill] sm:$0xff] %v4389_v62  ;;  %v4394_v36 = vadd.f32 %v4090_v2, %v772_v17  ;;  %v1258_v45 = vsel %vm429_vm1, %v4389_v62, 0.0 }
 0x143   : > { %v1031_v27 = vpop.f32.mrf.mxu1 }
 0x144   : > { %6955 = vst [vmem:[#allocation38_spill] sm:$0xff] %v4379_v42  ;;  %6958 = vst [vmem:[#allocation41_spill] sm:$0xff] %v4394_v36  ;;  %v1255_v17 = vsel %vm429_vm1, %v4394_v36, 0.0 }
 0x145   : > { %1439 = vadd.xlane.f32.xlu1 %v1438_v63  ;;  %v3469_v63 = vpop.f32.mrf.mxu0  ;;  %v3533_v3 = vpop.f32.mrf.mxu1 }
 0x146   : > { %1436 = vadd.xlane.f32.xlu0 %v1435_v49  ;;  %v1456_v49 = vsel %vm429_vm1, %v4379_v42, 0.0  ;;  %v4414_v55 = vadd.f32 %v3469_v63, %v4090_v2 }
 0x147   : > { %v1044_v42 = vpop.f32.mrf.mxu1 }
 0x148   : > { %6962 = vst [vmem:[#allocation45_spill] sm:$0xff] %v4414_v55  ;;  %v1273_v63 = vsel %vm429_vm1, %v4414_v55, 0.0  ;;  %v4444_v55 = vadd.f32 %v4090_v2, %v1044_v42 }
 0x149   : > { %1265 = vadd.xlane.f32.xlu1 %v1264_v22  ;;  %v788_v22 = vpop.f32.mrf.mxu0 }
 0x14a   : > { %1262 = vadd.xlane.f32.xlu0 %v1261_v25  ;;  %v4399_v25 = vadd.f32 %v4090_v2, %v1031_v27  ;;  %6968 = vst [vmem:[#allocation51_spill] sm:$0xff] %v4444_v55 }
 0x14c   : > { %6959 = vst [vmem:[#allocation42_spill] sm:$0xff] %v4399_v25  ;;  %v1450_v27 = vsel %vm429_vm1, %v4399_v25, 0.0  ;;  %v4434_v25 = vadd.f32 %v4090_v2, %v788_v22 }
 0x14d   : > { %1457 = vadd.xlane.f32.xlu1 %v1456_v49  ;;  %v3470_v49 = vpop.f32.mrf.mxu0 }
 0x14e   : > { %1454 = vadd.xlane.f32.xlu0 %v1453_v52  ;;  %v4409_v52 = vadd.f32 %v3470_v49, %v4090_v2  ;;  %v4424_v49 = vadd.f32 %v3533_v3, %v4090_v2  ;;  %6966 = vst [vmem:[#allocation49_spill] sm:$0xff] %v4434_v25  ;;  %v1267_v22 = vsel %vm429_vm1, %v4434_v25, 0.0 }
 0x14f   : > { %v791_v62 = vpop.f32.mrf.mxu0 }
 0x150   : > { %6961 = vst [vmem:[#allocation44_spill] sm:$0xff] %v4409_v52  ;;  %6964 = vst [vmem:[#allocation47_spill] sm:$0xff] %v4424_v49  ;;  %v4429_v20 = vadd.f32 %v4090_v2, %v791_v62  ;;  %v1465_v3 = vsel %vm429_vm1, %v4424_v49, 0.0 }
 0x151   : > { %1259 = vadd.xlane.f32.xlu1 %v1258_v45  ;;  %v3534_v45 = vpop.f32.mrf.mxu1 }
 0x152   : > { %1256 = vadd.xlane.f32.xlu0 %v1255_v17  ;;  %v4419_v36 = vadd.f32 %v3534_v45, %v4090_v2  ;;  %v1276_v17 = vsel %vm429_vm1, %v4409_v52, 0.0  ;;  %6965 = vst [vmem:[#allocation48_spill] sm:$0xff] %v4429_v20  ;;  %v1270_v62 = vsel %vm429_vm1, %v4429_v20, 0.0 }
 0x154   : > { %6963 = vst [vmem:[#allocation46_spill] sm:$0xff] %v4419_v36  ;;  %v1468_v45 = vsel %vm429_vm1, %v4419_v36, 0.0 }
 0x155   : > { %1451 = vadd.xlane.f32.xlu1 %v1450_v27  ;;  %v3473_v27 = vpop.f32.mrf.mxu0 }
 0x156   : > { %1448 = vadd.xlane.f32.xlu0 %v1447_v9  ;;  %v1047_v9 = vpop.f32.mrf.mxu1  ;;  %v4458_v42 = vadd.f32 %v3473_v27, %v4090_v2 }
 0x157   : > { %v804_v52 = vpop.f32.mrf.mxu0 }
 0x158   : > { %6970 = vst [vmem:[#allocation53_spill] sm:$0xff] %v4458_v42 }
 0x159   : > { %1277 = vadd.xlane.f32.xlu1 %v1276_v17  ;;  %v3537_v17 = vpop.f32.mrf.mxu1 }
 0x15a   : > { %1274 = vadd.xlane.f32.xlu0 %v1273_v63  ;;  %v4439_v63 = vadd.f32 %v4090_v2, %v1047_v9 }
 0x15c   : > { %6967 = vst [vmem:[#allocation50_spill] sm:$0xff] %v4439_v63  ;;  %v1462_v20 = vsel %vm429_vm1, %v4439_v63, 0.0  ;;  %v4472_v63 = vadd.f32 %v3537_v17, %v4090_v2  ;;  %v4486_v17 = vadd.f32 %v4090_v2, %v804_v52 }
 0x15d   : > { %1469 = vadd.xlane.f32.xlu1 %v1468_v45  ;;  %v1060_v45 = vpop.f32.mrf.mxu1 }
 0x15e   : > { %1466 = vadd.xlane.f32.xlu0 %v1465_v3  ;;  %v3474_v3 = vpop.f32.mrf.mxu0  ;;  %6972 = vst [vmem:[#allocation55_spill] sm:$0xff] %v4472_v63  ;;  %6974 = vst [vmem:[#allocation57_spill] sm:$0xff] %v4486_v17  ;;  %v4500_v52 = vadd.f32 %v4090_v2, %v1060_v45 }
 0x15f   : > { %v4453_v9 = vadd.f32 %v3474_v3, %v4090_v2  ;;  %v3538_v25 = vpop.f32.mrf.mxu1 }
 0x160   : > { %v4467_v33 = vadd.f32 %v3538_v25, %v4090_v2  ;;  %v807_v27 = vpop.f32.mrf.mxu0  ;;  %6976 = vst [vmem:[#allocation59_spill] sm:$0xff] %v4500_v52 }
 0x161   : > { %1271 = vadd.xlane.f32.xlu1 %v1270_v62  ;;  %6969 = vst [vmem:[#allocation52_spill] sm:$0xff] %v4453_v9  ;;  %v1459_v62 = vsel %vm429_vm1, %v4444_v55, 0.0  ;;  %v1288_v3 = vsel %vm429_vm1, %v4453_v9, 0.0  ;;  %v4481_v25 = vadd.f32 %v4090_v2, %v807_v27  ;;  %v1063_v8 = vpop.f32.mrf.mxu1 }
 0x162   : > { %1268 = vadd.xlane.f32.xlu0 %v1267_v22  ;;  %v4448_v36 = vpop.xlane.xlu1 %1178  ;;  %6971 = vst [vmem:[#allocation54_spill] sm:$0xff] %v4467_v33  ;;  %v3477_v11 = vpop.f32.mrf.mxu0  ;;  %v1480_v9 = vsel %vm429_vm1, %v4467_v33, 0.0  ;;  %v4495_v27 = vadd.f32 %v4090_v2, %v1063_v8 }
 0x163   : > { %v4450_v49 = vpop.xlane.xlu0 %1370  ;;  %6973 = vst [vmem:[#allocation56_spill] sm:$0xff] %v4481_v25  ;;  %v1282_v33 = vsel %vm429_vm1, %v4481_v25, 0.0  ;;  %v4514_v45 = vadd.f32 %v3477_v11, %v4090_v2 }
 0x164   : > { %v820_v58 = vpop.f32.mrf.mxu0  ;;  %6975 = vst [vmem:[#allocation58_spill] sm:$0xff] %v4495_v27  ;;  %v1474_v25 = vsel %vm429_vm1, %v4495_v27, 0.0 }
 0x165   : > { %1463 = vadd.xlane.f32.xlu1 %v1462_v20  ;;  %v1285_v20 = vsel %vm429_vm1, %v4458_v42, 0.0  ;;  %v3541_v42 = vpop.f32.mrf.mxu1  ;;  %6978 = vst [vmem:[#allocation61_spill] sm:$0xff] %v4514_v45 }
 0x166   : > { %1460 = vadd.xlane.f32.xlu0 %v1459_v62  ;;  %v4462_v22 = vpop.xlane.xlu1 %1181  ;;  %v3478_v46 = vpop.f32.mrf.mxu0  ;;  %v4528_v27 = vadd.f32 %v3541_v42, %v4090_v2  ;;  %v4542_v42 = vadd.f32 %v4090_v2, %v820_v58 }
 0x167   : > { %v4464_v39 = vpop.xlane.xlu0 %1172  ;;  %v4509_v8 = vadd.f32 %v3478_v46, %v4090_v2 }
 0x168   : > { %6980 = vst [vmem:[#allocation63_spill] sm:$0xff] %v4528_v27  ;;  %v823_v11 = vpop.f32.mrf.mxu0  ;;  %6982 = vst [vmem:[#allocation65_spill] sm:$0xff] %v4542_v42 }
 0x169   : > { %1289 = vadd.xlane.f32.xlu1 %v1288_v3  ;;  %v1477_v3 = vsel %vm429_vm1, %v4472_v63, 0.0  ;;  %6977 = vst [vmem:[#allocation60_spill] sm:$0xff] %v4509_v8  ;;  %v1300_v46 = vsel %vm429_vm1, %v4509_v8, 0.0 }
 0x16a   : > { %1286 = vadd.xlane.f32.xlu0 %v1285_v20  ;;  %v4476_v62 = vpop.xlane.xlu1 %1373  ;;  %v3481_v19 = vpop.f32.mrf.mxu0 }
 0x16b   : > { %v4478_v55 = vpop.xlane.xlu0 %1364 }
 0x16c   : > { %v836_v7 = vpop.f32.mrf.mxu0 }
 0x16d   : > { %1481 = vadd.xlane.f32.xlu1 %v1480_v9  ;;  %v1279_v9 = vsel %vm429_vm1, %v4486_v17, 0.0 }
 0x16e   : > { %1478 = vadd.xlane.f32.xlu0 %v1477_v3  ;;  %v4490_v20 = vpop.xlane.xlu1 %1367  ;;  %v1076_v3 = vpop.f32.mrf.mxu1 }
 0x16f   : > { %v4492_v53 = vpop.xlane.xlu0 %1175  ;;  %v4556_v58 = vadd.f32 %v4090_v2, %v1076_v3  ;;  %v3482_v60 = vpop.f32.mrf.mxu0  ;;  %v4570_v3 = vadd.f32 %v3481_v19, %v4090_v2 }
 0x170   : > { %v3542_v17 = vpop.f32.mrf.mxu1 }
 0x171   : > { %1283 = vadd.xlane.f32.xlu1 %v1282_v33  ;;  %v1471_v33 = vsel %vm429_vm1, %v4500_v52, 0.0  ;;  %v4523_v29 = vadd.f32 %v3542_v17, %v4090_v2  ;;  %v4537_v17 = vadd.f32 %v4090_v2, %v823_v11  ;;  %6984 = vst [vmem:[#allocation67_spill] sm:$0xff] %v4556_v58  ;;  %6986 = vst [vmem:[#allocation69_spill] sm:$0xff] %v4570_v3  ;;  %v839_v19 = vpop.f32.mrf.mxu0 }
 0x172   : > { %1280 = vadd.xlane.f32.xlu0 %v1279_v9  ;;  %v4504_v63 = vpop.xlane.xlu1 %1193  ;;  %v1079_v13 = vpop.f32.mrf.mxu1 }
 0x173   : > { %v4506_v44 = vpop.xlane.xlu0 %1190  ;;  %6979 = vst [vmem:[#allocation62_spill] sm:$0xff] %v4523_v29  ;;  %6981 = vst [vmem:[#allocation64_spill] sm:$0xff] %v4537_v17  ;;  %v1492_v8 = vsel %vm429_vm1, %v4523_v29, 0.0  ;;  %v4551_v11 = vadd.f32 %v4090_v2, %v1079_v13  ;;  %v1294_v29 = vsel %vm429_vm1, %v4537_v17, 0.0  ;;  %v4565_v13 = vadd.f32 %v3482_v60, %v4090_v2  ;;  %v3485_v40 = vpop.f32.mrf.mxu0 }
 0x175   : > { %1475 = vadd.xlane.f32.xlu1 %v1474_v25  ;;  %v1297_v25 = vsel %vm429_vm1, %v4514_v45, 0.0  ;;  %v3545_v45 = vpop.f32.mrf.mxu1  ;;  %6983 = vst [vmem:[#allocation66_spill] sm:$0xff] %v4551_v11  ;;  %6985 = vst [vmem:[#allocation68_spill] sm:$0xff] %v4565_v13  ;;  %v1486_v17 = vsel %vm429_vm1, %v4551_v11, 0.0  ;;  %v1312_v60 = vsel %vm429_vm1, %v4565_v13, 0.0  ;;  %v852_v31 = vpop.f32.mrf.mxu0 }
 0x176   : > { %1472 = vadd.xlane.f32.xlu0 %v1471_v33  ;;  %v4518_v9 = vpop.xlane.xlu1 %1385  ;;  %v4584_v11 = vadd.f32 %v3545_v45, %v4090_v2  ;;  %v4598_v45 = vadd.f32 %v4090_v2, %v836_v7 }
 0x177   : > { %v4520_v34 = vpop.xlane.xlu0 %1382  ;;  %v3486_v23 = vpop.f32.mrf.mxu0 }
 0x178   : > { %6988 = vst [vmem:[#allocation71_spill] sm:$0xff] %v4584_v11  ;;  %6990 = vst [vmem:[#allocation73_spill] sm:$0xff] %v4598_v45 }
 0x179   : > { %1301 = vadd.xlane.f32.xlu1 %v1300_v46  ;;  %v1489_v46 = vsel %vm429_vm1, %v4528_v27, 0.0 }
 0x17a   : > { %1298 = vadd.xlane.f32.xlu0 %v1297_v25  ;;  %v4532_v33 = vpop.xlane.xlu1 %1187 }
 0x17b   : > { %v4534_v52 = vpop.xlane.xlu0 %1184 }
 0x17d   : > { %1493 = vadd.xlane.f32.xlu1 %v1492_v8  ;;  %v1291_v8 = vsel %vm429_vm1, %v4542_v42, 0.0 }
 0x17e   : > { %1490 = vadd.xlane.f32.xlu0 %v1489_v46  ;;  %v4546_v25 = vpop.xlane.xlu1 %1379  ;;  %v1092_v46 = vpop.f32.mrf.mxu1 }
 0x17f   : > { %v4548_v0 = vpop.xlane.xlu0 %1376  ;;  %v4612_v7 = vadd.f32 %v4090_v2, %v1092_v46  ;;  %v4626_v46 = vadd.f32 %v3485_v40, %v4090_v2  ;;  %v855_v40 = vpop.f32.mrf.mxu0 }
 0x180   : > { %v3546_v42 = vpop.f32.mrf.mxu1 }
 0x181   : > { %1295 = vadd.xlane.f32.xlu1 %v1294_v29  ;;  %v1483_v29 = vsel %vm429_vm1, %v4556_v58, 0.0  ;;  %v4579_v47 = vadd.f32 %v3546_v42, %v4090_v2  ;;  %v4593_v42 = vadd.f32 %v4090_v2, %v839_v19  ;;  %6992 = vst [vmem:[#allocation75_spill] sm:$0xff] %v4612_v7  ;;  %6996 = vst [vmem:[#allocation79_spill] sm:$0xff] %v4626_v46 }
 0x182   : > { %1292 = vadd.xlane.f32.xlu0 %v1291_v8  ;;  %v4560_v27 = vpop.xlane.xlu1 %1205  ;;  %v1095_v38 = vpop.f32.mrf.mxu1 }
 0x183   : > { %v4562_v57 = vpop.xlane.xlu0 %1202  ;;  %6987 = vst [vmem:[#allocation70_spill] sm:$0xff] %v4579_v47  ;;  %6989 = vst [vmem:[#allocation72_spill] sm:$0xff] %v4593_v42  ;;  %v1504_v13 = vsel %vm429_vm1, %v4579_v47, 0.0  ;;  %v4607_v19 = vadd.f32 %v4090_v2, %v1095_v38  ;;  %v1306_v47 = vsel %vm429_vm1, %v4593_v42, 0.0  ;;  %v4621_v38 = vadd.f32 %v3486_v23, %v4090_v2 }
 0x185   : > { %1487 = vadd.xlane.f32.xlu1 %v1486_v17  ;;  %v1309_v17 = vsel %vm429_vm1, %v4570_v3, 0.0  ;;  %v3549_v3 = vpop.f32.mrf.mxu1  ;;  %6991 = vst [vmem:[#allocation74_spill] sm:$0xff] %v4607_v19  ;;  %6995 = vst [vmem:[#allocation78_spill] sm:$0xff] %v4621_v38  ;;  %v1498_v42 = vsel %vm429_vm1, %v4607_v19, 0.0  ;;  %v1324_v23 = vsel %vm429_vm1, %v4621_v38, 0.0 }
 0x186   : > { %1484 = vadd.xlane.f32.xlu0 %v1483_v29  ;;  %v4574_v8 = vpop.xlane.xlu1 %1397  ;;  %v4640_v19 = vadd.f32 %v3549_v3, %v4090_v2  ;;  %v4654_v3 = vadd.f32 %v4090_v2, %v852_v31 }
 0x187   : > { %v4576_v51 = vpop.xlane.xlu0 %1394 }
 0x188   : > { %7000 = vst [vmem:[#allocation83_spill] sm:$0xff] %v4640_v19  ;;  %7004 = vst [vmem:[#allocation87_spill] sm:$0xff] %v4654_v3 }
 0x189   : > { %1313 = vadd.xlane.f32.xlu1 %v1312_v60  ;;  %v1501_v60 = vsel %vm429_vm1, %v4584_v11, 0.0 }
 0x18a   : > { %1310 = vadd.xlane.f32.xlu0 %v1309_v17  ;;  %v4588_v29 = vpop.xlane.xlu1 %1199 }
 0x18b   : > { %v4590_v58 = vpop.xlane.xlu0 %1196 }
 0x18d   : > { %1505 = vadd.xlane.f32.xlu1 %v1504_v13  ;;  %v1303_v13 = vsel %vm429_vm1, %v4598_v45, 0.0 }
 0x18e   : > { %1502 = vadd.xlane.f32.xlu0 %v1501_v60  ;;  %v4602_v17 = vpop.xlane.xlu1 %1391  ;;  %v1108_v60 = vpop.f32.mrf.mxu1 }
 0x18f   : > { %v4604_v28 = vpop.xlane.xlu0 %1388  ;;  %v4668_v31 = vadd.f32 %v4090_v2, %v1108_v60 }
 0x190   : > { %v3550_v45 = vpop.f32.mrf.mxu1 }
 0x191   : > { %1307 = vadd.xlane.f32.xlu1 %v1306_v47  ;;  %v1495_v47 = vsel %vm429_vm1, %v4612_v7, 0.0  ;;  %7008 = vst [vmem:[#allocation91_spill] sm:$0xff] %v4668_v31 }
 0x192   : > { %1304 = vadd.xlane.f32.xlu0 %v1303_v13  ;;  %v4616_v11 = vpop.xlane.xlu1 %1217 }
 0x193   : > { %6993 = vst [vmem:[#allocation76_spill] sm:$0xff] %v4616_v11  ;;  %v4618_v21 = vpop.xlane.xlu0 %1214 }
 0x194   : > { %6994 = vst [vmem:[#allocation77_spill] sm:$0xff] %v4618_v21  ;;  %v4635_v21 = vadd.f32 %v3550_v45, %v4090_v2  ;;  %v4649_v45 = vadd.f32 %v4090_v2, %v855_v40 }
 0x195   : > { %1499 = vadd.xlane.f32.xlu1 %v1498_v42  ;;  %v1321_v42 = vsel %vm429_vm1, %v4626_v46, 0.0 }
 0x196   : > { %1496 = vadd.xlane.f32.xlu0 %v1495_v47  ;;  %v4630_v13 = vpop.xlane.xlu1 %1409  ;;  %6999 = vst [vmem:[#allocation82_spill] sm:$0xff] %v4635_v21  ;;  %7003 = vst [vmem:[#allocation86_spill] sm:$0xff] %v4649_v45  ;;  %v1516_v38 = vsel %vm429_vm1, %v4635_v21, 0.0  ;;  %v1318_v21 = vsel %vm429_vm1, %v4649_v45, 0.0 }
 0x197   : > { %6997 = vst [vmem:[#allocation80_spill] sm:$0xff] %v4630_v13  ;;  %v4632_v15 = vpop.xlane.xlu0 %1406  ;;  %v1111_v13 = vpop.f32.mrf.mxu1 }
 0x198   : > { %6998 = vst [vmem:[#allocation81_spill] sm:$0xff] %v4632_v15  ;;  %v3489_v15 = vpop.f32.mrf.mxu0  ;;  %v4663_v40 = vadd.f32 %v4090_v2, %v1111_v13 }
 0x199   : > { %1325 = vadd.xlane.f32.xlu1 %v1324_v23  ;;  %v1513_v23 = vsel %vm429_vm1, %v4640_v19, 0.0  ;;  %v3553_v46 = vpop.f32.mrf.mxu1  ;;  %v4682_v60 = vadd.f32 %v3489_v15, %v4090_v2 }
 0x19a   : > { %1322 = vadd.xlane.f32.xlu0 %v1321_v42  ;;  %v4644_v47 = vpop.xlane.xlu1 %1211  ;;  %7007 = vst [vmem:[#allocation90_spill] sm:$0xff] %v4663_v40  ;;  %v1510_v45 = vsel %vm429_vm1, %v4663_v40, 0.0  ;;  %v4696_v40 = vadd.f32 %v3553_v46, %v4090_v2 }
 0x19b   : > { %7001 = vst [vmem:[#allocation84_spill] sm:$0xff] %v4644_v47  ;;  %v4646_v7 = vpop.xlane.xlu0 %1208  ;;  %7012 = vst [vmem:[#allocation95_spill] sm:$0xff] %v4682_v60 }
 0x19c   : > { %7002 = vst [vmem:[#allocation85_spill] sm:$0xff] %v4646_v7  ;;  %v868_v7 = vpop.f32.mrf.mxu0  ;;  %7016 = vst [vmem:[#allocation99_spill] sm:$0xff] %v4696_v40 }
 0x19d   : > { %1517 = vadd.xlane.f32.xlu1 %v1516_v38  ;;  %v1315_v38 = vsel %vm429_vm1, %v4654_v3, 0.0  ;;  %v4710_v46 = vadd.f32 %v4090_v2, %v868_v7 }
 0x19e   : > { %1514 = vadd.xlane.f32.xlu0 %v1513_v23  ;;  %v4658_v42 = vpop.xlane.xlu1 %1403  ;;  %v1124_v23 = vpop.f32.mrf.mxu1 }
 0x19f   : > { %7005 = vst [vmem:[#allocation88_spill] sm:$0xff] %v4658_v42  ;;  %v4660_v47 = vpop.xlane.xlu0 %1400  ;;  %v3490_v42 = vpop.f32.mrf.mxu0  ;;  %7020 = vst [vmem:[#allocation103_spill] sm:$0xff] %v4710_v46  ;;  %v4724_v7 = vadd.f32 %v4090_v2, %v1124_v23 }
 0x1a0   : > { %7006 = vst [vmem:[#allocation89_spill] sm:$0xff] %v4660_v47  ;;  %v4677_v13 = vadd.f32 %v3490_v42, %v4090_v2  ;;  %v3554_v3 = vpop.f32.mrf.mxu1 }
 0x1a1   : > { %1319 = vadd.xlane.f32.xlu1 %v1318_v21  ;;  %v1507_v21 = vsel %vm429_vm1, %v4668_v31, 0.0  ;;  %v871_v15 = vpop.f32.mrf.mxu0  ;;  %7024 = vst [vmem:[#allocation107_spill] sm:$0xff] %v4724_v7 }
 0x1a2   : > { %1316 = vadd.xlane.f32.xlu0 %v1315_v38  ;;  %v4672_v19 = vpop.xlane.xlu1 %1229  ;;  %7011 = vst [vmem:[#allocation94_spill] sm:$0xff] %v4677_v13  ;;  %v1336_v42 = vsel %vm429_vm1, %v4677_v13, 0.0 }
 0x1a3   : > { %7009 = vst [vmem:[#allocation92_spill] sm:$0xff] %v4672_v19  ;;  %v4674_v11 = vpop.xlane.xlu0 %1226 }
 0x1a4   : > { %7010 = vst [vmem:[#allocation93_spill] sm:$0xff] %v4674_v11  ;;  %v4691_v11 = vadd.f32 %v3554_v3, %v4090_v2  ;;  %v4705_v3 = vadd.f32 %v4090_v2, %v871_v15 }
 0x1a5   : > { %1511 = vadd.xlane.f32.xlu1 %v1510_v45  ;;  %v1333_v45 = vsel %vm429_vm1, %v4682_v60, 0.0 }
 0x1a6   : > { %1508 = vadd.xlane.f32.xlu0 %v1507_v21  ;;  %v4686_v38 = vpop.xlane.xlu1 %1421  ;;  %7015 = vst [vmem:[#allocation98_spill] sm:$0xff] %v4691_v11  ;;  %7019 = vst [vmem:[#allocation102_spill] sm:$0xff] %v4705_v3  ;;  %v1528_v13 = vsel %vm429_vm1, %v4691_v11, 0.0  ;;  %v1330_v11 = vsel %vm429_vm1, %v4705_v3, 0.0 }
 0x1a7   : > { %7013 = vst [vmem:[#allocation96_spill] sm:$0xff] %v4686_v38  ;;  %v4688_v19 = vpop.xlane.xlu0 %1418  ;;  %v1127_v38 = vpop.f32.mrf.mxu1 }
 0x1a8   : > { %7014 = vst [vmem:[#allocation97_spill] sm:$0xff] %v4688_v19  ;;  %v3493_v19 = vpop.f32.mrf.mxu0  ;;  %v4719_v15 = vadd.f32 %v4090_v2, %v1127_v38 }
 0x1a9   : > { %1337 = vadd.xlane.f32.xlu1 %v1336_v42  ;;  %v1525_v42 = vsel %vm429_vm1, %v4696_v40, 0.0  ;;  %v3557_v60 = vpop.f32.mrf.mxu1  ;;  %v4738_v23 = vadd.f32 %v3493_v19, %v4090_v2 }
 0x1aa   : > { %1334 = vadd.xlane.f32.xlu0 %v1333_v45  ;;  %v4700_v21 = vpop.xlane.xlu1 %1223  ;;  %7023 = vst [vmem:[#allocation106_spill] sm:$0xff] %v4719_v15  ;;  %v1522_v3 = vsel %vm429_vm1, %v4719_v15, 0.0  ;;  %v4752_v15 = vadd.f32 %v3557_v60, %v4090_v2  ;;  %v3831_v60 = vld [vmem:[%s6705_s2] ss:$0 sm:$0xff] }
 0x1ab   : > { %7017 = vst [vmem:[#allocation100_spill] sm:$0xff] %v4700_v21  ;;  %v4702_v31 = vpop.xlane.xlu0 %1220  ;;  %7028 = vst [vmem:[#allocation111_spill] sm:$0xff] %v4738_v23 }
 0x1ac   : > { %7018 = vst [vmem:[#allocation101_spill] sm:$0xff] %v4702_v31  ;;  %v884_v31 = vpop.f32.mrf.mxu0  ;;  %7032 = vst [vmem:[#allocation115_spill] sm:$0xff] %v4752_v15 }
 0x1ad   : > { %1529 = vadd.xlane.f32.xlu1 %v1528_v13  ;;  %v1327_v13 = vsel %vm429_vm1, %v4710_v46, 0.0 }
 0x1ae   : > { %1526 = vadd.xlane.f32.xlu0 %v1525_v42  ;;  %v4714_v45 = vpop.xlane.xlu1 %1415  ;;  %v1140_v42 = vpop.f32.mrf.mxu1 }
 0x1af   : > { %7021 = vst [vmem:[#allocation104_spill] sm:$0xff] %v4714_v45  ;;  %v4716_v21 = vpop.xlane.xlu0 %1412  ;;  %v3494_v45 = vpop.f32.mrf.mxu0 }
 0x1b0   : > { %7022 = vst [vmem:[#allocation105_spill] sm:$0xff] %v4716_v21  ;;  %v4733_v38 = vadd.f32 %v3494_v45, %v4090_v2  ;;  %v3558_v46 = vpop.f32.mrf.mxu1  ;;  %v4780_v21 = vadd.f32 %v3831_v60, %v1140_v42 }
 0x1b1   : > { %1331 = vadd.xlane.f32.xlu1 %v1330_v11  ;;  %v1519_v11 = vsel %vm429_vm1, %v4724_v7, 0.0  ;;  %v887_v19 = vpop.f32.mrf.mxu0 }
 0x1b2   : > { %1328 = vadd.xlane.f32.xlu0 %v1327_v13  ;;  %v4728_v40 = vpop.xlane.xlu1 %1241  ;;  %7027 = vst [vmem:[#allocation110_spill] sm:$0xff] %v4733_v38  ;;  %v1348_v45 = vsel %vm429_vm1, %v4733_v38, 0.0  ;;  %7040 = vst [vmem:[#allocation123_spill] sm:$0xff] %v4780_v21 }
 0x1b3   : > { %7025 = vst [vmem:[#allocation108_spill] sm:$0xff] %v4728_v40  ;;  %v4730_v47 = vpop.xlane.xlu0 %1238 }
 0x1b4   : > { %7026 = vst [vmem:[#allocation109_spill] sm:$0xff] %v4730_v47  ;;  %v4747_v47 = vadd.f32 %v3558_v46, %v4090_v2  ;;  %v4761_v46 = vadd.f32 %v4090_v2, %v887_v19 }
 0x1b5   : > { %1523 = vadd.xlane.f32.xlu1 %v1522_v3  ;;  %v1345_v3 = vsel %vm429_vm1, %v4738_v23, 0.0 }
 0x1b6   : > { %1520 = vadd.xlane.f32.xlu0 %v1519_v11  ;;  %v4742_v13 = vpop.xlane.xlu1 %1433  ;;  %7031 = vst [vmem:[#allocation114_spill] sm:$0xff] %v4747_v47  ;;  %7035 = vst [vmem:[#allocation118_spill] sm:$0xff] %v4761_v46  ;;  %v1540_v38 = vsel %vm429_vm1, %v4747_v47, 0.0  ;;  %v1342_v47 = vsel %vm429_vm1, %v4761_v46, 0.0 }
 0x1b7   : > { %7029 = vst [vmem:[#allocation112_spill] sm:$0xff] %v4742_v13  ;;  %v4744_v40 = vpop.xlane.xlu0 %1430  ;;  %v1143_v13 = vpop.f32.mrf.mxu1 }
 0x1b8   : > { %7030 = vst [vmem:[#allocation113_spill] sm:$0xff] %v4744_v40  ;;  %v3497_v40 = vpop.f32.mrf.mxu0 }
 0x1b9   : > { %1349 = vadd.xlane.f32.xlu1 %v1348_v45  ;;  %v4768_v45 = vadd.f32 %v3831_v60, %v884_v31 }
 0x1ba   : > { %1346 = vadd.xlane.f32.xlu0 %v1345_v3  ;;  %v4756_v11 = vpop.xlane.xlu1 %1235  ;;  %v1537_v3 = vsel %vm429_vm1, %v4752_v15, 0.0  ;;  %v900_v2 = vpop.f32.mrf.mxu0 }
 0x1bb   : > { %7033 = vst [vmem:[#allocation116_spill] sm:$0xff] %v4756_v11  ;;  %v4758_v7 = vpop.xlane.xlu0 %1232  ;;  %7036 = vst [vmem:[#allocation119_spill] sm:$0xff] %v4768_v45  ;;  %v4776_v11 = vadd.f32 %v3831_v60, %v1143_v13  ;;  %v1339_v31 = vsel %vm429_vm1, %v4768_v45, 0.0 }
 0x1bc   : > { %7034 = vst [vmem:[#allocation117_spill] sm:$0xff] %v4758_v7  ;;  %v3561_v7 = vpop.f32.mrf.mxu1  ;;  %v3498_v15 = vpop.f32.mrf.mxu0 }
 0x1bd   : > { %1541 = vadd.xlane.f32.xlu1 %v1540_v38  ;;  %7039 = vst [vmem:[#allocation122_spill] sm:$0xff] %v4776_v11  ;;  %v4788_v12 = vadd.f32 %v3831_v60, %v3498_v15  ;;  %v1534_v13 = vsel %vm429_vm1, %v4776_v11, 0.0 }
 0x1be   : > { %1538 = vadd.xlane.f32.xlu0 %v1537_v3  ;;  %v4772_v23 = vpop.xlane.xlu1 %1427  ;;  %v1156_v38 = vpop.f32.mrf.mxu1 }
 0x1bf   : > { %7037 = vst [vmem:[#allocation120_spill] sm:$0xff] %v4772_v23  ;;  %v4774_v19 = vpop.xlane.xlu0 %1424  ;;  %7042 = vst [vmem:[#allocation125_spill] sm:$0xff] %v4788_v12  ;;  %v1360_v15 = vsel %vm429_vm1, %v4788_v12, 0.0  ;;  %v903_v11 = vpop.f32.mrf.mxu0  ;;  %v4818_v12 = vadd.f32 %v3831_v60, %v900_v2  ;;  %v1622_v2 = vmul.f32 0.125, %v4450_v49 }
 0x1c0   : > { %7038 = vst [vmem:[#allocation121_spill] sm:$0xff] %v4774_v19  ;;  %v4792_v19 = vadd.f32 %v3831_v60, %v3497_v40 }
 0x1c1   : > { %1343 = vadd.xlane.f32.xlu1 %v1342_v47  ;;  %v1531_v47 = vsel %vm429_vm1, %v4780_v21, 0.0  ;;  %v1559_v21 = vmul.f32 0.125, %v4462_v22  ;;  %7049 = vst [vmem:[#allocation132_spill] sm:$0xff] %v4818_v12 }
 0x1c2   : > { %1340 = vadd.xlane.f32.xlu0 %v1339_v31  ;;  %v4784_v3 = vpop.xlane.xlu1 %1253  ;;  %7043 = vst [vmem:[#allocation126_spill] sm:$0xff] %v4792_v19  ;;  %v3562_v31 = vpop.f32.mrf.mxu1  ;;  %v1357_v40 = vsel %vm429_vm1, %v4792_v19, 0.0 }
 0x1c3   : > { %v4786_v23 = vpop.xlane.xlu0 %1250  ;;  %v4800_v46 = vadd.f32 %v3831_v60, %v3562_v31  ;;  %v4827_v22 = vsub.f32 %v4106_v14, %v1559_v21 }
 0x1c4   : > { %7041 = vst [vmem:[#allocation124_spill] sm:$0xff] %v4786_v23  ;;  %v4804_v23 = vadd.f32 %v3831_v60, %v3561_v7  ;;  %v1558_v7 = vmul.f32 0.125, %v4448_v36 }
 0x1c5   : > { %1535 = vadd.xlane.f32.xlu1 %v1534_v13  ;;  %7045 = vst [vmem:[#allocation128_spill] sm:$0xff] %v4800_v46  ;;  %v1552_v31 = vsel %vm429_vm1, %v4800_v46, 0.0  ;;  %7050 = vst [vmem:[#allocation133_spill] sm:$0xff] %v4827_v22  ;;  %v1815_v49 = vmul.f32 %v4827_v22, %v4827_v22 }
 0x1c6   : > { %1532 = vadd.xlane.f32.xlu0 %v1531_v47  ;;  %v4796_v42 = vpop.xlane.xlu1 %1445  ;;  %7046 = vst [vmem:[#allocation129_spill] sm:$0xff] %v4804_v23 }
 0x1c7   : > { %v4798_v45 = vpop.xlane.xlu0 %1442 }
 0x1c8   : > { %7044 = vst [vmem:[#allocation127_spill] sm:$0xff] %v4798_v45  ;;  %v4813_v45 = vadd.f32 %v3831_v60, %v903_v11  ;;  %v1623_v11 = vmul.f32 0.125, %v4476_v62 }
 0x1c9   : > { %1361 = vadd.xlane.f32.xlu1 %v1360_v15  ;;  %v1159_v15 = vpop.f32.mrf.mxu1 }
 0x1ca   : > { %1358 = vadd.xlane.f32.xlu0 %v1357_v40  ;;  %v4808_v13 = vpop.xlane.xlu1 %1247  ;;  %7048 = vst [vmem:[#allocation131_spill] sm:$0xff] %v4813_v45  ;;  %v1549_v40 = vsel %vm429_vm1, %v4804_v23, 0.0  ;;  %v4830_v46 = vadd.f32 %v3831_v60, %v1159_v15  ;;  %v1354_v36 = vsel %vm429_vm1, %v4813_v45, 0.0  ;;  %v1351_v23 = vsel %vm429_vm1, %v4818_v12, 0.0 }
 0x1cb   : > { %v4810_v47 = vpop.xlane.xlu0 %1244  ;;  %v4847_v21 = vsub.f32 %v4109_v16, %v1623_v11  ;;  %v1557_v15 = vmul.f32 0.125, %v4492_v53  ;;  %v1621_v11 = vmul.f32 0.125, %v4490_v20 }
 0x1cc   : > { %7047 = vst [vmem:[#allocation130_spill] sm:$0xff] %v4810_v47  ;;  %7051 = vst [vmem:[#allocation134_spill] sm:$0xff] %v4830_v46 }
 0x1cd   : > { %1553 = vadd.xlane.f32.xlu1 %v1552_v31  ;;  %v4836_v31 = vsub.f32 %v4093_v4, %v1558_v7  ;;  %7054 = vst [vmem:[#allocation137_spill] sm:$0xff] %v4847_v21  ;;  %v1546_v4 = vsel %vm429_vm1, %v4830_v46, 0.0  ;;  %v7076_v46 = vld [vmem:[#allocation76_spill] sm:$0xff] }
 0x1ce   : > { %1550 = vadd.xlane.f32.xlu0 %v1549_v40  ;;  %v4822_v19 = vpop.xlane.xlu1 %1439  ;;  %v4838_v40 = vadd.f32 %v3831_v60, %v1156_v38  ;;  %v4855_v60 = vsub.f32 %v4096_v6, %v1622_v2  ;;  %v1949_v6 = vsel %vm429_vm1, %v1815_v49, 0.0  ;;  %v1563_v49 = vmul.f32 0.125, %v4504_v63 }
 0x1cf   : > { %v4824_v47 = vpop.xlane.xlu0 %1436  ;;  %7052 = vst [vmem:[#allocation135_spill] sm:$0xff] %v4836_v31  ;;  %v1814_v16 = vmul.f32 %v4836_v31, %v4836_v31  ;;  %v1571_v45 = vmul.f32 0.125, %v7076_v46 }
 0x1d0   : > { %7053 = vst [vmem:[#allocation136_spill] sm:$0xff] %v4838_v40  ;;  %7055 = vst [vmem:[#allocation138_spill] sm:$0xff] %v4855_v60  ;;  %v1543_v38 = vsel %vm429_vm1, %v4838_v40, 0.0  ;;  %v1878_v40 = vmul.f32 %v4855_v60, %v4855_v60 }
 0x1d1   : > { %1355 = vadd.xlane.f32.xlu1 %v1354_v36  ;;  %v4868_v36 = vsub.f32 %v4124_v26, %v1557_v15  ;;  %v4885_v15 = vsub.f32 %v4119_v24, %v1621_v11  ;;  %v4903_v11 = vsub.f32 %v4129_v30, %v1563_v49 }
 0x1d2   : > { %1352 = vadd.xlane.f32.xlu0 %v1351_v23  ;;  %v4842_v14 = vpop.xlane.xlu1 %1265  ;;  %v1556_v23 = vmul.f32 0.125, %v4464_v39  ;;  %v1879_v39 = vmul.f32 %v4847_v21, %v4847_v21 }
 0x1d3   : > { %v4844_v62 = vpop.xlane.xlu0 %1262  ;;  %7056 = vst [vmem:[#allocation139_spill] sm:$0xff] %v4868_v36  ;;  %7058 = vst [vmem:[#allocation141_spill] sm:$0xff] %v4885_v15 }
 0x1d4   : > { %v4874_v2 = vsub.f32 %v4101_v10, %v1556_v23  ;;  %v2141_v10 = vsel %vm429_vm1, %v1879_v39, 0.0  ;;  %7060 = vst [vmem:[#allocation143_spill] sm:$0xff] %v4903_v11  ;;  %v1627_v39 = vmul.f32 0.125, %v4518_v9 }
 0x1d5   : > { %1547 = vadd.xlane.f32.xlu1 %v1546_v4  ;;  %v1620_v4 = vmul.f32 0.125, %v4478_v55  ;;  %v1813_v55 = vmul.f32 %v4868_v36, %v4868_v36 }
 0x1d6   : > { %1544 = vadd.xlane.f32.xlu0 %v1543_v38  ;;  %v4862_v53 = vpop.xlane.xlu1 %1457  ;;  %7057 = vst [vmem:[#allocation140_spill] sm:$0xff] %v4874_v2  ;;  %v1946_v38 = vsel %vm429_vm1, %v1814_v16, 0.0  ;;  %v1562_v16 = vmul.f32 0.125, %v4506_v44  ;;  %v1877_v44 = vmul.f32 %v4885_v15, %v4885_v15  ;;  %v4921_v49 = vsub.f32 %v4139_v35, %v1627_v39 }
 0x1d7   : > { %v4864_v7 = vpop.xlane.xlu0 %1454  ;;  %v4892_v23 = vsub.f32 %v4114_v18, %v1620_v4  ;;  %v1943_v18 = vsel %vm429_vm1, %v1813_v55, 0.0  ;;  %v1626_v4 = vmul.f32 0.125, %v4520_v34  ;;  %v1561_v55 = vmul.f32 0.125, %v4532_v33 }
 0x1d8   : > { %7062 = vst [vmem:[#allocation145_spill] sm:$0xff] %v4921_v49  ;;  %v1819_v34 = vmul.f32 %v4903_v11, %v4903_v11 }
 0x1d9   : > { %1950 = vadd.xlane.f32.xlu1 %v1949_v6  ;;  %7059 = vst [vmem:[#allocation142_spill] sm:$0xff] %v4892_v23  ;;  %v2138_v6 = vsel %vm429_vm1, %v1878_v40, 0.0  ;;  %v4910_v40 = vsub.f32 %v4134_v32, %v1562_v16  ;;  %v2135_v32 = vsel %vm429_vm1, %v1877_v44, 0.0  ;;  %v4928_v16 = vsub.f32 %v4144_v37, %v1626_v4 }
 0x1da   : > { %1947 = vadd.xlane.f32.xlu0 %v1946_v38  ;;  %v4880_v20 = vpop.xlane.xlu1 %1259  ;;  %v1812_v38 = vmul.f32 %v4874_v2, %v4874_v2  ;;  %v4939_v39 = vsub.f32 %v4149_v41, %v1561_v55  ;;  %v1625_v44 = vmul.f32 0.125, %v4546_v25  ;;  %v1961_v37 = vsel %vm429_vm1, %v1819_v34, 0.0 }
 0x1db   : > { %v4882_v26 = vpop.xlane.xlu0 %1256  ;;  %7061 = vst [vmem:[#allocation144_spill] sm:$0xff] %v4910_v40  ;;  %7063 = vst [vmem:[#allocation146_spill] sm:$0xff] %v4928_v16  ;;  %v1567_v34 = vmul.f32 0.125, %v4560_v27 }
 0x1dc   : > { %7064 = vst [vmem:[#allocation147_spill] sm:$0xff] %v4939_v39  ;;  %v4957_v55 = vsub.f32 %v4159_v48, %v1625_v44 }
 0x1dd   : > { %2142 = vadd.xlane.f32.xlu1 %v2141_v10  ;;  %v1940_v10 = vsel %vm429_vm1, %v1812_v38, 0.0  ;;  %v1560_v38 = vmul.f32 0.125, %v4534_v52  ;;  %v1883_v52 = vmul.f32 %v4921_v49, %v4921_v49  ;;  %v4975_v44 = vsub.f32 %v4169_v54, %v1567_v34 }
 0x1de   : > { %2139 = vadd.xlane.f32.xlu0 %v2138_v6  ;;  %v4898_v24 = vpop.xlane.xlu1 %1451  ;;  %v1876_v6 = vmul.f32 %v4892_v23, %v4892_v23  ;;  %7066 = vst [vmem:[#allocation149_spill] sm:$0xff] %v4957_v55 }
 0x1df   : > { %v4900_v63 = vpop.xlane.xlu0 %1448  ;;  %v4946_v4 = vsub.f32 %v4154_v43, %v1560_v38  ;;  %v2153_v43 = vsel %vm429_vm1, %v1883_v52, 0.0  ;;  %7068 = vst [vmem:[#allocation151_spill] sm:$0xff] %v4975_v44  ;;  %v1631_v52 = vmul.f32 0.125, %v4574_v8 }
 0x1e1   : > { %1944 = vadd.xlane.f32.xlu1 %v1943_v18  ;;  %v2132_v18 = vsel %vm429_vm1, %v1876_v6, 0.0  ;;  %7065 = vst [vmem:[#allocation148_spill] sm:$0xff] %v4946_v4  ;;  %v1624_v6 = vmul.f32 0.125, %v4548_v0  ;;  %v1817_v0 = vmul.f32 %v4939_v39, %v4939_v39  ;;  %v4993_v34 = vsub.f32 %v4179_v59, %v1631_v52 }
 0x1e2   : > { %1941 = vadd.xlane.f32.xlu0 %v1940_v10  ;;  %v4916_v30 = vpop.xlane.xlu1 %1277  ;;  %v1818_v10 = vmul.f32 %v4910_v40, %v4910_v40 }
 0x1e3   : > { %v4918_v9 = vpop.xlane.xlu0 %1274  ;;  %v4964_v38 = vsub.f32 %v4164_v50, %v1624_v6  ;;  %v1955_v50 = vsel %vm429_vm1, %v1817_v0, 0.0  ;;  %7070 = vst [vmem:[#allocation153_spill] sm:$0xff] %v4993_v34  ;;  %v1565_v0 = vmul.f32 0.125, %v4588_v29 }
 0x1e5   : > { %2136 = vadd.xlane.f32.xlu1 %v2135_v32  ;;  %v1958_v32 = vsel %vm429_vm1, %v1818_v10, 0.0  ;;  %7067 = vst [vmem:[#allocation150_spill] sm:$0xff] %v4964_v38  ;;  %v1566_v10 = vmul.f32 0.125, %v4562_v57  ;;  %v1881_v57 = vmul.f32 %v4957_v55, %v4957_v55  ;;  %v5011_v52 = vsub.f32 %v4189_v1, %v1565_v0  ;;  %v7074_v0 = vld [vmem:[#allocation2_spill] sm:$0xff] }
 0x1e6   : > { %2133 = vadd.xlane.f32.xlu0 %v2132_v18  ;;  %v4934_v35 = vpop.xlane.xlu1 %1469  ;;  %v1882_v18 = vmul.f32 %v4928_v16, %v4928_v16 }
 0x1e7   : > { %v4936_v33 = vpop.xlane.xlu0 %1466  ;;  %v4982_v6 = vsub.f32 %v4174_v56, %v1566_v10  ;;  %v2147_v56 = vsel %vm429_vm1, %v1881_v57, 0.0  ;;  %7072 = vst [vmem:[#allocation155_spill] sm:$0xff] %v5011_v52  ;;  %v1629_v57 = vmul.f32 0.125, %v4602_v17 }
 0x1e9   : > { %1962 = vadd.xlane.f32.xlu1 %v1961_v37  ;;  %v2150_v37 = vsel %vm429_vm1, %v1882_v18, 0.0  ;;  %7069 = vst [vmem:[#allocation152_spill] sm:$0xff] %v4982_v6  ;;  %v1630_v18 = vmul.f32 0.125, %v4576_v51  ;;  %v1823_v51 = vmul.f32 %v4975_v44, %v4975_v44 }
 0x1ea   : > { %1959 = vadd.xlane.f32.xlu0 %v1958_v32  ;;  %v4952_v41 = vpop.xlane.xlu1 %1271  ;;  %v1816_v32 = vmul.f32 %v4946_v4, %v4946_v4 }
 0x1eb   : > { %v4954_v25 = vpop.xlane.xlu0 %1268  ;;  %v5000_v10 = vsub.f32 %v4184_v61, %v1630_v18  ;;  %v1973_v61 = vsel %vm429_vm1, %v1823_v51, 0.0  ;;  %v5029_v51 = vsub.f32 %v7074_v0, %v1629_v57 }
 0x1ed   : > { %2154 = vadd.xlane.f32.xlu1 %v2153_v43  ;;  %v1952_v43 = vsel %vm429_vm1, %v1816_v32, 0.0  ;;  %7071 = vst [vmem:[#allocation154_spill] sm:$0xff] %v5000_v10  ;;  %v1564_v32 = vmul.f32 0.125, %v4590_v58  ;;  %v1887_v58 = vmul.f32 %v4993_v34, %v4993_v34  ;;  %7075 = vst [vmem:[#allocation2_spill] sm:$0xff] %v5029_v51 }
 0x1ee   : > { %2151 = vadd.xlane.f32.xlu0 %v2150_v37  ;;  %v4970_v48 = vpop.xlane.xlu1 %1463  ;;  %v1880_v37 = vmul.f32 %v4964_v38, %v4964_v38 }
 0x1ef   : > { %v4972_v27 = vpop.xlane.xlu0 %1460  ;;  %v5018_v18 = vsub.f32 %v4194_v5, %v1564_v32  ;;  %v2165_v5 = vsel %vm429_vm1, %v1887_v58, 0.0  ;;  %v7077_v32 = vld [vmem:[#allocation3_spill] sm:$0xff]  ;;  %v7080_v58 = vld [vmem:[#allocation4_spill] sm:$0xff] }
 0x1f0   : > { %v5047_v0 = vsub.f32 %v7080_v58, %v1571_v45 }
 0x1f1   : > { %1956 = vadd.xlane.f32.xlu1 %v1955_v50  ;;  %v2144_v50 = vsel %vm429_vm1, %v1880_v37, 0.0  ;;  %7073 = vst [vmem:[#allocation156_spill] sm:$0xff] %v5018_v18  ;;  %v1628_v37 = vmul.f32 0.125, %v4604_v28  ;;  %v1821_v28 = vmul.f32 %v5011_v52, %v5011_v52  ;;  %v7082_v52 = vld [vmem:[#allocation80_spill] sm:$0xff] }
 0x1f2   : > { %1953 = vadd.xlane.f32.xlu0 %v1952_v43  ;;  %v4988_v54 = vpop.xlane.xlu1 %1289  ;;  %v1822_v43 = vmul.f32 %v4982_v6, %v4982_v6  ;;  %7081 = vst [vmem:[#allocation3_spill] sm:$0xff] %v5047_v0  ;;  %v1635_v34 = vmul.f32 0.125, %v7082_v52 }
 0x1f3   : > { %v4990_v8 = vpop.xlane.xlu0 %1286 }
 0x1f5   : > { %2148 = vadd.xlane.f32.xlu1 %v2147_v56  ;;  %v1970_v56 = vsel %vm429_vm1, %v1822_v43, 0.0  ;;  %v5036_v43 = vsub.f32 %v7077_v32, %v1628_v37  ;;  %v1967_v37 = vsel %vm429_vm1, %v1821_v28, 0.0  ;;  %v7083_v32 = vld [vmem:[#allocation5_spill] sm:$0xff]  ;;  %v7086_v28 = vld [vmem:[#allocation6_spill] sm:$0xff] }
 0x1f6   : > { %2145 = vadd.xlane.f32.xlu0 %v2144_v50  ;;  %v5006_v59 = vpop.xlane.xlu1 %1481  ;;  %v1886_v50 = vmul.f32 %v5000_v10, %v5000_v10  ;;  %v1820_v10 = vmul.f32 %v5018_v18, %v5018_v18  ;;  %v5065_v58 = vsub.f32 %v7086_v28, %v1635_v34 }
 0x1f7   : > { %v5008_v29 = vpop.xlane.xlu0 %1478  ;;  %7078 = vst [vmem:[#allocation76_spill] sm:$0xff] %v5036_v43  ;;  %v1884_v6 = vmul.f32 %v5036_v43, %v5036_v43 }
 0x1f8   : > { %7087 = vst [vmem:[#allocation4_spill] sm:$0xff] %v5065_v58 }
 0x1f9   : > { %1974 = vadd.xlane.f32.xlu1 %v1973_v61  ;;  %v7079_v61 = vld [vmem:[#allocation77_spill] sm:$0xff] }
 0x1fa   : > { %1971 = vadd.xlane.f32.xlu0 %v1970_v56  ;;  %v5024_v1 = vpop.xlane.xlu1 %1283  ;;  %v1570_v12 = vmul.f32 0.125, %v7079_v61  ;;  %v2162_v56 = vsel %vm429_vm1, %v1886_v50, 0.0  ;;  %v7085_v61 = vld [vmem:[#allocation81_spill] sm:$0xff] }
 0x1fb   : > { %v5026_v17 = vpop.xlane.xlu0 %1280  ;;  %v1634_v18 = vmul.f32 0.125, %v7085_v61  ;;  %v7091_v61 = vld [vmem:[#allocation85_spill] sm:$0xff] }
 0x1fc   : > { %v5054_v50 = vsub.f32 %v7083_v32, %v1570_v12  ;;  %v7089_v32 = vld [vmem:[#allocation7_spill] sm:$0xff]  ;;  %v1568_v43 = vmul.f32 0.125, %v7091_v61  ;;  %v7097_v61 = vld [vmem:[#allocation89_spill] sm:$0xff] }
 0x1fd   : > { %2166 = vadd.xlane.f32.xlu1 %v2165_v5  ;;  %v1885_v5 = vmul.f32 %v5029_v51, %v5029_v51  ;;  %v7088_v51 = vld [vmem:[#allocation84_spill] sm:$0xff] }
 0x1fe   : > { %2163 = vadd.xlane.f32.xlu0 %v2162_v56  ;;  %v5042_v57 = vpop.xlane.xlu1 %1475  ;;  %7084 = vst [vmem:[#allocation77_spill] sm:$0xff] %v5054_v50  ;;  %v1964_v56 = vsel %vm429_vm1, %v1820_v10, 0.0  ;;  %v1569_v44 = vmul.f32 0.125, %v7088_v51  ;;  %v5072_v10 = vsub.f32 %v7089_v32, %v1634_v18  ;;  %v1826_v38 = vmul.f32 %v5054_v50, %v5054_v50  ;;  %v7095_v32 = vld [vmem:[#allocation9_spill] sm:$0xff] }
 0x1ff   : > { %v5044_v46 = vpop.xlane.xlu0 %1472  ;;  %v2159_v12 = vsel %vm429_vm1, %v1885_v5, 0.0  ;;  %v7092_v5 = vld [vmem:[#allocation8_spill] sm:$0xff]  ;;  %v1632_v50 = vmul.f32 0.125, %v7097_v61  ;;  %v7103_v61 = vld [vmem:[#allocation93_spill] sm:$0xff] }
 0x200   : > { %7090 = vst [vmem:[#allocation80_spill] sm:$0xff] %v5072_v10  ;;  %v5083_v28 = vsub.f32 %v7092_v5, %v1569_v44  ;;  %v1890_v4 = vmul.f32 %v5072_v10, %v5072_v10  ;;  %v1574_v10 = vmul.f32 0.125, %v7103_v61  ;;  %v7109_v61 = vld [vmem:[#allocation97_spill] sm:$0xff] }
 0x201   : > { %1968 = vadd.xlane.f32.xlu1 %v1967_v37  ;;  %v1827_v37 = vmul.f32 %v5047_v0, %v5047_v0  ;;  %v7094_v0 = vld [vmem:[#allocation88_spill] sm:$0xff] }
 0x202   : > { %1965 = vadd.xlane.f32.xlu0 %v1964_v56  ;;  %v5060_v45 = vpop.xlane.xlu1 %1301  ;;  %v2156_v56 = vsel %vm429_vm1, %v1884_v6, 0.0  ;;  %7093 = vst [vmem:[#allocation5_spill] sm:$0xff] %v5083_v28  ;;  %v1633_v55 = vmul.f32 0.125, %v7094_v0  ;;  %v5090_v6 = vsub.f32 %v7095_v32, %v1568_v43  ;;  %v7101_v32 = vld [vmem:[#allocation11_spill] sm:$0xff] }
 0x203   : > { %v5062_v52 = vpop.xlane.xlu0 %1298  ;;  %v1985_v18 = vsel %vm429_vm1, %v1827_v37, 0.0  ;;  %v7098_v37 = vld [vmem:[#allocation10_spill] sm:$0xff] }
 0x204   : > { %7096 = vst [vmem:[#allocation81_spill] sm:$0xff] %v5090_v6  ;;  %v5101_v5 = vsub.f32 %v7098_v37, %v1633_v55  ;;  %v1824_v16 = vmul.f32 %v5090_v6, %v5090_v6  ;;  %v1638_v6 = vmul.f32 0.125, %v7109_v61  ;;  %v7115_v61 = vld [vmem:[#allocation101_spill] sm:$0xff] }
 0x205   : > { %2160 = vadd.xlane.f32.xlu1 %v2159_v12  ;;  %v1891_v12 = vmul.f32 %v5065_v58, %v5065_v58  ;;  %v7100_v58 = vld [vmem:[#allocation92_spill] sm:$0xff] }
 0x206   : > { %2157 = vadd.xlane.f32.xlu0 %v2156_v56  ;;  %v5078_v34 = vpop.xlane.xlu1 %1493  ;;  %v1982_v56 = vsel %vm429_vm1, %v1826_v38, 0.0  ;;  %7099 = vst [vmem:[#allocation6_spill] sm:$0xff] %v5101_v5  ;;  %v1575_v39 = vmul.f32 0.125, %v7100_v58  ;;  %v5108_v38 = vsub.f32 %v7101_v32, %v1632_v50  ;;  %v7107_v32 = vld [vmem:[#allocation13_spill] sm:$0xff] }
 0x207   : > { %v5080_v51 = vpop.xlane.xlu0 %1490  ;;  %v2177_v43 = vsel %vm429_vm1, %v1891_v12, 0.0  ;;  %v7104_v12 = vld [vmem:[#allocation12_spill] sm:$0xff] }
 0x208   : > { %7102 = vst [vmem:[#allocation84_spill] sm:$0xff] %v5108_v38  ;;  %v5119_v37 = vsub.f32 %v7104_v12, %v1575_v39  ;;  %v1888_v40 = vmul.f32 %v5108_v38, %v5108_v38  ;;  %v1572_v38 = vmul.f32 0.125, %v7115_v61  ;;  %v7121_v61 = vld [vmem:[#allocation105_spill] sm:$0xff] }
 0x209   : > { %1986 = vadd.xlane.f32.xlu1 %v1985_v18  ;;  %v1825_v18 = vmul.f32 %v5083_v28, %v5083_v28  ;;  %v7106_v28 = vld [vmem:[#allocation96_spill] sm:$0xff] }
 0x20a   : > { %1983 = vadd.xlane.f32.xlu0 %v1982_v56  ;;  %v5096_v44 = vpop.xlane.xlu1 %1295  ;;  %v2174_v56 = vsel %vm429_vm1, %v1890_v4, 0.0  ;;  %7105 = vst [vmem:[#allocation7_spill] sm:$0xff] %v5119_v37  ;;  %v1639_v49 = vmul.f32 0.125, %v7106_v28  ;;  %v5126_v4 = vsub.f32 %v7107_v32, %v1574_v10  ;;  %v7113_v32 = vld [vmem:[#allocation15_spill] sm:$0xff] }
 0x20b   : > { %v5098_v0 = vpop.xlane.xlu0 %1292  ;;  %v1979_v50 = vsel %vm429_vm1, %v1825_v18, 0.0  ;;  %v7110_v18 = vld [vmem:[#allocation14_spill] sm:$0xff] }
 0x20c   : > { %7108 = vst [vmem:[#allocation85_spill] sm:$0xff] %v5126_v4  ;;  %v5137_v12 = vsub.f32 %v7110_v18, %v1639_v49  ;;  %v1830_v23 = vmul.f32 %v5126_v4, %v5126_v4  ;;  %v1636_v4 = vmul.f32 0.125, %v7121_v61  ;;  %v7127_v61 = vld [vmem:[#allocation109_spill] sm:$0xff] }
 0x20d   : > { %2178 = vadd.xlane.f32.xlu1 %v2177_v43  ;;  %v1889_v43 = vmul.f32 %v5101_v5, %v5101_v5  ;;  %v7112_v5 = vld [vmem:[#allocation100_spill] sm:$0xff] }
 0x20e   : > { %2175 = vadd.xlane.f32.xlu0 %v2174_v56  ;;  %v5114_v55 = vpop.xlane.xlu1 %1487  ;;  %v1976_v56 = vsel %vm429_vm1, %v1824_v16, 0.0  ;;  %7111 = vst [vmem:[#allocation8_spill] sm:$0xff] %v5137_v12  ;;  %v1573_v11 = vmul.f32 0.125, %v7112_v5  ;;  %v5144_v16 = vsub.f32 %v7113_v32, %v1638_v6  ;;  %v7119_v32 = vld [vmem:[#allocation17_spill] sm:$0xff] }
 0x20f   : > { %v5116_v58 = vpop.xlane.xlu0 %1484  ;;  %v2171_v10 = vsel %vm429_vm1, %v1889_v43, 0.0  ;;  %v7116_v43 = vld [vmem:[#allocation16_spill] sm:$0xff] }
 0x210   : > { %7114 = vst [vmem:[#allocation88_spill] sm:$0xff] %v5144_v16  ;;  %v5155_v18 = vsub.f32 %v7116_v43, %v1573_v11  ;;  %v1894_v2 = vmul.f32 %v5144_v16, %v5144_v16  ;;  %v1578_v16 = vmul.f32 0.125, %v7127_v61  ;;  %v7133_v61 = vld [vmem:[#allocation113_spill] sm:$0xff] }
 0x211   : > { %1980 = vadd.xlane.f32.xlu1 %v1979_v50  ;;  %v1831_v50 = vmul.f32 %v5119_v37, %v5119_v37  ;;  %v7118_v37 = vld [vmem:[#allocation104_spill] sm:$0xff] }
 0x212   : > { %1977 = vadd.xlane.f32.xlu0 %v1976_v56  ;;  %v5132_v39 = vpop.xlane.xlu1 %1313  ;;  %v2168_v56 = vsel %vm429_vm1, %v1888_v40, 0.0  ;;  %7117 = vst [vmem:[#allocation9_spill] sm:$0xff] %v5155_v18  ;;  %v1637_v15 = vmul.f32 0.125, %v7118_v37  ;;  %v5162_v40 = vsub.f32 %v7119_v32, %v1572_v38  ;;  %v7125_v32 = vld [vmem:[#allocation19_spill] sm:$0xff] }
 0x213   : > { %v5134_v28 = vpop.xlane.xlu0 %1310  ;;  %v1997_v6 = vsel %vm429_vm1, %v1831_v50, 0.0  ;;  %v7122_v50 = vld [vmem:[#allocation18_spill] sm:$0xff] }
 0x214   : > { %7120 = vst [vmem:[#allocation89_spill] sm:$0xff] %v5162_v40  ;;  %v5173_v43 = vsub.f32 %v7122_v50, %v1637_v15  ;;  %v1828_v60 = vmul.f32 %v5162_v40, %v5162_v40  ;;  %v1642_v40 = vmul.f32 0.125, %v7133_v61  ;;  %v7141_v61 = vld [vmem:[#allocation117_spill] sm:$0xff] }
 0x215   : > { %2172 = vadd.xlane.f32.xlu1 %v2171_v10  ;;  %v1895_v10 = vmul.f32 %v5137_v12, %v5137_v12  ;;  %v7124_v12 = vld [vmem:[#allocation108_spill] sm:$0xff] }
 0x216   : > { %2169 = vadd.xlane.f32.xlu0 %v2168_v56  ;;  %v5150_v49 = vpop.xlane.xlu1 %1505  ;;  %v1994_v56 = vsel %vm429_vm1, %v1830_v23, 0.0  ;;  %7123 = vst [vmem:[#allocation10_spill] sm:$0xff] %v5173_v43  ;;  %v1579_v36 = vmul.f32 0.125, %v7124_v12  ;;  %v5180_v23 = vsub.f32 %v7125_v32, %v1636_v4  ;;  %v7131_v32 = vld [vmem:[#allocation21_spill] sm:$0xff] }
 0x217   : > { %v5152_v5 = vpop.xlane.xlu0 %1502  ;;  %v2189_v38 = vsel %vm429_vm1, %v1895_v10, 0.0  ;;  %v7128_v10 = vld [vmem:[#allocation20_spill] sm:$0xff] }
 0x218   : > { %7126 = vst [vmem:[#allocation92_spill] sm:$0xff] %v5180_v23  ;;  %v5191_v50 = vsub.f32 %v7128_v10, %v1579_v36  ;;  %v1892_v31 = vmul.f32 %v5180_v23, %v5180_v23  ;;  %v1576_v23 = vmul.f32 0.125, %v7141_v61  ;;  %v7148_v61 = vld [vmem:[#allocation121_spill] sm:$0xff] }
 0x219   : > { %1998 = vadd.xlane.f32.xlu1 %v1997_v6  ;;  %v1829_v6 = vmul.f32 %v5155_v18, %v5155_v18  ;;  %v7130_v18 = vld [vmem:[#allocation112_spill] sm:$0xff] }
 0x21a   : > { %1995 = vadd.xlane.f32.xlu0 %v1994_v56  ;;  %v5168_v11 = vpop.xlane.xlu1 %1307  ;;  %v2186_v56 = vsel %vm429_vm1, %v1894_v2, 0.0  ;;  %7129 = vst [vmem:[#allocation11_spill] sm:$0xff] %v5191_v50  ;;  %v1643_v21 = vmul.f32 0.125, %v7130_v18  ;;  %v5198_v2 = vsub.f32 %v7131_v32, %v1578_v16  ;;  %v7139_v32 = vld [vmem:[#allocation23_spill] sm:$0xff] }
 0x21b   : > { %v5170_v37 = vpop.xlane.xlu0 %1304  ;;  %v1991_v4 = vsel %vm429_vm1, %v1829_v6, 0.0  ;;  %v7136_v6 = vld [vmem:[#allocation22_spill] sm:$0xff] }
 0x21c   : > { %7132 = vst [vmem:[#allocation93_spill] sm:$0xff] %v5198_v2  ;;  %v5209_v10 = vsub.f32 %v7136_v6, %v1643_v21 }
 0x21d   : > { %2190 = vadd.xlane.f32.xlu1 %v2189_v38  ;;  %v1893_v38 = vmul.f32 %v5173_v43, %v5173_v43  ;;  %v7138_v43 = vld [vmem:[#allocation116_spill] sm:$0xff] }
 0x21e   : > { %2187 = vadd.xlane.f32.xlu0 %v2186_v56  ;;  %v5186_v15 = vpop.xlane.xlu1 %1499  ;;  %v1988_v56 = vsel %vm429_vm1, %v1828_v60, 0.0  ;;  %7137 = vst [vmem:[#allocation13_spill] sm:$0xff] %v5209_v10  ;;  %v1577_v22 = vmul.f32 0.125, %v7138_v43  ;;  %v5216_v60 = vsub.f32 %v7139_v32, %v1642_v40  ;;  %v7146_v32 = vld [vmem:[#allocation25_spill] sm:$0xff] }
 0x21f   : > { %v5188_v12 = vpop.xlane.xlu0 %1496  ;;  %v2183_v16 = vsel %vm429_vm1, %v1893_v38, 0.0  ;;  %v7143_v38 = vld [vmem:[#allocation24_spill] sm:$0xff] }
 0x220   : > { %7140 = vst [vmem:[#allocation97_spill] sm:$0xff] %v5216_v60  ;;  %v5227_v6 = vsub.f32 %v7143_v38, %v1577_v22  ;;  %v7150_v38 = vld [vmem:[#allocation26_spill] sm:$0xff] }
 0x221   : > { %1992 = vadd.xlane.f32.xlu1 %v1991_v4  ;;  %v1835_v4 = vmul.f32 %v5191_v50, %v5191_v50  ;;  %v7145_v50 = vld [vmem:[#allocation120_spill] sm:$0xff] }
 0x222   : > { %1989 = vadd.xlane.f32.xlu0 %v1988_v56  ;;  %v5204_v36 = vpop.xlane.xlu1 %1325  ;;  %v2180_v56 = vsel %vm429_vm1, %v1892_v31, 0.0  ;;  %7144 = vst [vmem:[#allocation100_spill] sm:$0xff] %v5227_v6  ;;  %v5234_v31 = vsub.f32 %v7146_v32, %v1576_v23  ;;  %v7152_v32 = vld [vmem:[#allocation27_spill] sm:$0xff] }
 0x223   : > { %7134 = vst [vmem:[#allocation12_spill] sm:$0xff] %v5204_v36  ;;  %v5206_v18 = vpop.xlane.xlu0 %1322  ;;  %v1641_v36 = vmul.f32 0.125, %v7145_v50  ;;  %v2009_v40 = vsel %vm429_vm1, %v1835_v4, 0.0  ;;  %v1583_v50 = vmul.f32 0.125, %v4784_v3 }
 0x224   : > { %7135 = vst [vmem:[#allocation96_spill] sm:$0xff] %v5206_v18  ;;  %v1834_v18 = vmul.f32 %v5198_v2, %v5198_v2  ;;  %7147 = vst [vmem:[#allocation15_spill] sm:$0xff] %v5234_v31  ;;  %v1640_v2 = vmul.f32 0.125, %v7148_v61  ;;  %v7154_v61 = vld [vmem:[#allocation124_spill] sm:$0xff]  ;;  %v1832_v3 = vmul.f32 %v5234_v31, %v5234_v31 }
 0x225   : > { %2184 = vadd.xlane.f32.xlu1 %v2183_v16  ;;  %v1899_v16 = vmul.f32 %v5209_v10, %v5209_v10  ;;  %v5246_v10 = vsub.f32 %v7150_v38, %v1641_v36  ;;  %v7155_v36 = vld [vmem:[#allocation28_spill] sm:$0xff] }
 0x226   : > { %2181 = vadd.xlane.f32.xlu0 %v2180_v56  ;;  %v5222_v21 = vpop.xlane.xlu1 %1517  ;;  %v2006_v56 = vsel %vm429_vm1, %v1834_v18, 0.0  ;;  %v5252_v18 = vsub.f32 %v7152_v32, %v1640_v2  ;;  %v5261_v38 = vsub.f32 %v7155_v36, %v1583_v50  ;;  %v7158_v32 = vld [vmem:[#allocation29_spill] sm:$0xff]  ;;  %v7161_v36 = vld [vmem:[#allocation30_spill] sm:$0xff] }
 0x227   : > { %v5224_v43 = vpop.xlane.xlu0 %1514  ;;  %7151 = vst [vmem:[#allocation16_spill] sm:$0xff] %v5246_v10  ;;  %v2201_v23 = vsel %vm429_vm1, %v1899_v16, 0.0  ;;  %v1647_v16 = vmul.f32 0.125, %v4796_v42 }
 0x228   : > { %7142 = vst [vmem:[#allocation14_spill] sm:$0xff] %v5224_v43  ;;  %v1898_v43 = vmul.f32 %v5216_v60, %v5216_v60  ;;  %7153 = vst [vmem:[#allocation104_spill] sm:$0xff] %v5252_v18  ;;  %v1582_v60 = vmul.f32 0.125, %v7154_v61  ;;  %v7160_v61 = vld [vmem:[#allocation127_spill] sm:$0xff]  ;;  %v1896_v50 = vmul.f32 %v5252_v18, %v5252_v18 }
 0x229   : > { %2010 = vadd.xlane.f32.xlu1 %v2009_v40  ;;  %v1833_v40 = vmul.f32 %v5227_v6, %v5227_v6  ;;  %7156 = vst [vmem:[#allocation17_spill] sm:$0xff] %v5261_v38  ;;  %v1646_v31 = vmul.f32 0.125, %v7160_v61  ;;  %v7164_v61 = vld [vmem:[#allocation31_spill] sm:$0xff] }
 0x22a   : > { %2007 = vadd.xlane.f32.xlu0 %v2006_v56  ;;  %v5240_v22 = vpop.xlane.xlu1 %1319  ;;  %v2198_v56 = vsel %vm429_vm1, %v1898_v43, 0.0  ;;  %v5270_v43 = vsub.f32 %v7158_v32, %v1582_v60  ;;  %v1839_v60 = vmul.f32 %v5261_v38, %v5261_v38  ;;  %v1581_v32 = vmul.f32 0.125, %v4808_v13 }
 0x22b   : > { %v5243_v4 = vpop.xlane.xlu0 %1316  ;;  %v2003_v2 = vsel %vm429_vm1, %v1833_v40, 0.0  ;;  %v1645_v38 = vmul.f32 0.125, %v4822_v19  ;;  %v1644_v13 = vmul.f32 0.125, %v4824_v47  ;;  %v1650_v47 = vmul.f32 0.125, %v4864_v7 }
 0x22c   : > { %7149 = vst [vmem:[#allocation101_spill] sm:$0xff] %v5243_v4  ;;  %7159 = vst [vmem:[#allocation18_spill] sm:$0xff] %v5270_v43 }
 0x22d   : > { %2202 = vadd.xlane.f32.xlu1 %v2201_v23  ;;  %v1897_v23 = vmul.f32 %v5246_v10, %v5246_v10  ;;  %v7166_v10 = vld [vmem:[#allocation130_spill] sm:$0xff] }
 0x22e   : > { %2199 = vadd.xlane.f32.xlu0 %v2198_v56  ;;  %v5258_v4 = vpop.xlane.xlu1 %1511  ;;  %v2000_v56 = vsel %vm429_vm1, %v1832_v3, 0.0  ;;  %v5288_v3 = vsub.f32 %v7164_v61, %v1646_v31  ;;  %v1580_v18 = vmul.f32 0.125, %v7166_v10  ;;  %v2021_v31 = vsel %vm429_vm1, %v1839_v60, 0.0 }
 0x22f   : > { %v5264_v6 = vpop.xlane.xlu0 %1508  ;;  %v1586_v61 = vmul.f32 0.125, %v4844_v62 }
 0x230   : > { %7157 = vst [vmem:[#allocation105_spill] sm:$0xff] %v5264_v6  ;;  %v5279_v6 = vsub.f32 %v7161_v36, %v1647_v16  ;;  %7165 = vst [vmem:[#allocation109_spill] sm:$0xff] %v5288_v3  ;;  %v1838_v16 = vmul.f32 %v5270_v43, %v5270_v43  ;;  %v7170_v43 = vld [vmem:[#allocation33_spill] sm:$0xff] }
 0x231   : > { %2004 = vadd.xlane.f32.xlu1 %v2003_v2  ;;  %v2195_v2 = vsel %vm429_vm1, %v1897_v23, 0.0  ;;  %v7168_v23 = vld [vmem:[#allocation32_spill] sm:$0xff]  ;;  %v5310_v19 = vsub.f32 %v7170_v43, %v1580_v18  ;;  %v1584_v18 = vmul.f32 0.125, %v4882_v26 }
 0x232   : > { %2001 = vadd.xlane.f32.xlu0 %v2000_v56  ;;  %v5276_v42 = vpop.xlane.xlu1 %1337  ;;  %7162 = vst [vmem:[#allocation108_spill] sm:$0xff] %v5279_v6  ;;  %v2192_v56 = vsel %vm429_vm1, %v1896_v50, 0.0  ;;  %v1903_v10 = vmul.f32 %v5279_v6, %v5279_v6  ;;  %v1587_v50 = vmul.f32 0.125, %v4842_v14  ;;  %v2018_v60 = vsel %vm429_vm1, %v1838_v16, 0.0  ;;  %v7173_v14 = vld [vmem:[#allocation34_spill] sm:$0xff]  ;;  %v7177_v16 = vld [vmem:[#allocation36_spill] sm:$0xff] }
 0x233   : > { %v5281_v40 = vpop.xlane.xlu0 %1334  ;;  %7171 = vst [vmem:[#allocation21_spill] sm:$0xff] %v5310_v19  ;;  %v1902_v6 = vmul.f32 %v5288_v3, %v5288_v3  ;;  %v5320_v62 = vsub.f32 %v7173_v14, %v1645_v38  ;;  %v7179_v3 = vld [vmem:[#allocation37_spill] sm:$0xff] }
 0x234   : > { %7163 = vst [vmem:[#allocation19_spill] sm:$0xff] %v5281_v40  ;;  %v2213_v43 = vsel %vm429_vm1, %v1903_v10, 0.0  ;;  %v1836_v10 = vmul.f32 %v5310_v19, %v5310_v19  ;;  %v7191_v19 = vld [vmem:[#allocation43_spill] sm:$0xff] }
 0x235   : > { %2196 = vadd.xlane.f32.xlu1 %v2195_v2  ;;  %v5304_v2 = vsub.f32 %v7168_v23, %v1581_v32  ;;  %v1585_v32 = vmul.f32 0.125, %v4880_v20  ;;  %7174 = vst [vmem:[#allocation22_spill] sm:$0xff] %v5320_v62  ;;  %v5333_v20 = vsub.f32 %v7179_v3, %v1586_v61  ;;  %v2210_v26 = vsel %vm429_vm1, %v1902_v6, 0.0  ;;  %v7187_v61 = vld [vmem:[#allocation41_spill] sm:$0xff] }
 0x236   : > { %2193 = vadd.xlane.f32.xlu0 %v2192_v56  ;;  %v5294_v36 = vpop.xlane.xlu1 %1529  ;;  %v1651_v56 = vmul.f32 0.125, %v4862_v53  ;;  %v7175_v53 = vld [vmem:[#allocation35_spill] sm:$0xff] }
 0x237   : > { %v5298_v40 = vpop.xlane.xlu0 %1526  ;;  %7169 = vst [vmem:[#allocation112_spill] sm:$0xff] %v5304_v2  ;;  %7180 = vst [vmem:[#allocation117_spill] sm:$0xff] %v5333_v20  ;;  %v1837_v38 = vmul.f32 %v5304_v2, %v5304_v2 }
 0x238   : > { %7167 = vst [vmem:[#allocation20_spill] sm:$0xff] %v5298_v40  ;;  %v5323_v40 = vsub.f32 %v7175_v53, %v1644_v13  ;;  %v7183_v13 = vld [vmem:[#allocation39_spill] sm:$0xff] }
 0x239   : > { %2022 = vadd.xlane.f32.xlu1 %v2021_v31  ;;  %v5330_v31 = vsub.f32 %v7177_v16, %v1587_v50  ;;  %v5341_v14 = vsub.f32 %v7183_v13, %v1650_v47  ;;  %v7185_v50 = vld [vmem:[#allocation40_spill] sm:$0xff]  ;;  %v1901_v47 = vmul.f32 %v5320_v62, %v5320_v62  ;;  %v1649_v13 = vmul.f32 0.125, %v4898_v24 }
 0x23a   : > { %2019 = vadd.xlane.f32.xlu0 %v2018_v60  ;;  %v5317_v23 = vpop.xlane.xlu1 %1331  ;;  %7176 = vst [vmem:[#allocation116_spill] sm:$0xff] %v5323_v40  ;;  %v7181_v60 = vld [vmem:[#allocation38_spill] sm:$0xff]  ;;  %v5347_v53 = vsub.f32 %v7185_v50, %v1585_v32  ;;  %v1900_v6 = vmul.f32 %v5323_v40, %v5323_v40 }
 0x23b   : > { %7172 = vst [vmem:[#allocation113_spill] sm:$0xff] %v5317_v23  ;;  %v5326_v7 = vpop.xlane.xlu0 %1328  ;;  %7178 = vst [vmem:[#allocation23_spill] sm:$0xff] %v5330_v31  ;;  %v5336_v23 = vsub.f32 %v7181_v60, %v1651_v56  ;;  %v5352_v56 = vsub.f32 %v7187_v61, %v1584_v18  ;;  %v1843_v32 = vmul.f32 %v5330_v31, %v5330_v31  ;;  %v1648_v61 = vmul.f32 0.125, %v4900_v63 }
 0x23c   : > { %7184 = vst [vmem:[#allocation120_spill] sm:$0xff] %v5341_v14  ;;  %7186 = vst [vmem:[#allocation25_spill] sm:$0xff] %v5347_v53  ;;  %v1842_v60 = vmul.f32 %v5333_v20, %v5333_v20  ;;  %v1906_v50 = vmul.f32 %v5341_v14, %v5341_v14  ;;  %v1841_v31 = vmul.f32 %v5347_v53, %v5347_v53  ;;  %v1591_v20 = vmul.f32 0.125, %v4916_v30  ;;  %v7189_v53 = vld [vmem:[#allocation42_spill] sm:$0xff] }
 0x23d   : > { %7182 = vst [vmem:[#allocation24_spill] sm:$0xff] %v5336_v23  ;;  %2214 = vadd.xlane.f32.xlu1 %v2213_v43  ;;  %7188 = vst [vmem:[#allocation121_spill] sm:$0xff] %v5352_v56  ;;  %v2015_v43 = vsel %vm429_vm1, %v1837_v38, 0.0  ;;  %v1907_v18 = vmul.f32 %v5336_v23, %v5336_v23  ;;  %v2207_v24 = vsel %vm429_vm1, %v1901_v47, 0.0  ;;  %v1590_v14 = vmul.f32 0.125, %v4918_v9 }
 0x23e   : > { %2211 = vadd.xlane.f32.xlu0 %v2210_v26  ;;  %v5349_v3 = vpop.xlane.xlu1 %1523  ;;  %v2012_v26 = vsel %vm429_vm1, %v1836_v10, 0.0  ;;  %v1840_v10 = vmul.f32 %v5352_v56, %v5352_v56  ;;  %v2033_v63 = vsel %vm429_vm1, %v1843_v32, 0.0  ;;  %v5388_v62 = vsub.f32 %v7189_v53, %v1649_v13 }
 0x23f   : > { %v5354_v16 = vpop.xlane.xlu0 %1520  ;;  %v2225_v23 = vsel %vm429_vm1, %v1907_v18, 0.0  ;;  %v1655_v30 = vmul.f32 0.125, %v4934_v35  ;;  %v1654_v47 = vmul.f32 0.125, %v4936_v33  ;;  %v5394_v56 = vsub.f32 %v7191_v19, %v1648_v61  ;;  %v7193_v18 = vld [vmem:[#allocation44_spill] sm:$0xff]  ;;  %v7195_v61 = vld [vmem:[#allocation45_spill] sm:$0xff] }
 0x240   : > { %7190 = vst [vmem:[#allocation26_spill] sm:$0xff] %v5388_v62  ;;  %v1589_v9 = vmul.f32 0.125, %v4952_v41  ;;  %v1588_v32 = vmul.f32 0.125, %v4954_v25  ;;  %v2027_v53 = vsel %vm429_vm1, %v1841_v31, 0.0  ;;  %v5402_v13 = vsub.f32 %v7193_v18, %v1591_v20  ;;  %v7199_v18 = vld [vmem:[#allocation47_spill] sm:$0xff] }
 0x241   : > { %2016 = vadd.xlane.f32.xlu1 %v2015_v43  ;;  %v2204_v43 = vsel %vm429_vm1, %v1900_v6, 0.0  ;;  %v2222_v6 = vsel %vm429_vm1, %v1906_v50, 0.0  ;;  %7192 = vst [vmem:[#allocation27_spill] sm:$0xff] %v5394_v56  ;;  %v1653_v35 = vmul.f32 0.125, %v4970_v48  ;;  %v1652_v33 = vmul.f32 0.125, %v4972_v27 }
 0x242   : > { %2013 = vadd.xlane.f32.xlu0 %v2012_v26  ;;  %v5372_v38 = vpop.xlane.xlu1 %1349  ;;  %v2030_v26 = vsel %vm429_vm1, %v1842_v60, 0.0  ;;  %7194 = vst [vmem:[#allocation124_spill] sm:$0xff] %v5402_v13  ;;  %v2024_v19 = vsel %vm429_vm1, %v1840_v10, 0.0  ;;  %v5410_v41 = vsub.f32 %v7195_v61, %v1590_v14  ;;  %v1595_v25 = vmul.f32 0.125, %v4988_v54  ;;  %v7201_v14 = vld [vmem:[#allocation48_spill] sm:$0xff]  ;;  %v7203_v54 = vld [vmem:[#allocation49_spill] sm:$0xff] }
 0x243   : > { %v5377_v40 = vpop.xlane.xlu0 %1346  ;;  %v1659_v31 = vmul.f32 0.125, %v5006_v59  ;;  %v5419_v48 = vsub.f32 %v7199_v18, %v1654_v47  ;;  %v1658_v27 = vmul.f32 0.125, %v5008_v29  ;;  %v1905_v10 = vmul.f32 %v5388_v62, %v5388_v62  ;;  %v7205_v47 = vld [vmem:[#allocation50_spill] sm:$0xff] }
 0x244   : > { %7196 = vst [vmem:[#allocation28_spill] sm:$0xff] %v5410_v41  ;;  %v5425_v61 = vsub.f32 %v7201_v14, %v1589_v9  ;;  %v5428_v2 = vsub.f32 %v7203_v54, %v1588_v32  ;;  %v5436_v29 = vsub.f32 %v7205_v47, %v1653_v35  ;;  %v1592_v9 = vmul.f32 0.125, %v5026_v17  ;;  %v7211_v14 = vld [vmem:[#allocation53_spill] sm:$0xff] }
 0x245   : > { %2208 = vadd.xlane.f32.xlu1 %v2207_v24  ;;  %v1594_v24 = vmul.f32 0.125, %v4990_v8  ;;  %7200 = vst [vmem:[#allocation127_spill] sm:$0xff] %v5419_v48  ;;  %v1593_v8 = vmul.f32 0.125, %v5024_v1  ;;  %v1847_v32 = vmul.f32 %v5402_v13, %v5402_v13  ;;  %v7209_v1 = vld [vmem:[#allocation52_spill] sm:$0xff]  ;;  %v1846_v35 = vmul.f32 %v5410_v41, %v5410_v41 }
 0x246   : > { %2205 = vadd.xlane.f32.xlu0 %v2204_v43  ;;  %v5398_v60 = vpop.xlane.xlu1 %1541  ;;  %v7197_v43 = vld [vmem:[#allocation46_spill] sm:$0xff]  ;;  %7202 = vst [vmem:[#allocation30_spill] sm:$0xff] %v5425_v61  ;;  %7204 = vst [vmem:[#allocation31_spill] sm:$0xff] %v5428_v2  ;;  %v2219_v17 = vsel %vm429_vm1, %v1905_v10, 0.0  ;;  %v7219_v10 = vld [vmem:[#allocation57_spill] sm:$0xff] }
 0x247   : > { %v5406_v50 = vpop.xlane.xlu0 %1538  ;;  %v5416_v20 = vsub.f32 %v7197_v43, %v1655_v30  ;;  %v1904_v30 = vmul.f32 %v5394_v56, %v5394_v56  ;;  %7206 = vst [vmem:[#allocation130_spill] sm:$0xff] %v5436_v29  ;;  %v5450_v54 = vsub.f32 %v7211_v14, %v1594_v24  ;;  %v7213_v56 = vld [vmem:[#allocation54_spill] sm:$0xff]  ;;  %v7217_v24 = vld [vmem:[#allocation56_spill] sm:$0xff]  ;;  %v5476_v14 = vsub.f32 %v7219_v10, %v1592_v9 }
 0x248   : > { %v5453_v62 = vsub.f32 %v7213_v56, %v1659_v31  ;;  %v1657_v10 = vmul.f32 0.125, %v5042_v57 }
 0x249   : > { %7198 = vst [vmem:[#allocation29_spill] sm:$0xff] %v5416_v20  ;;  %2034 = vadd.xlane.f32.xlu1 %v2033_v63  ;;  %v7207_v63 = vld [vmem:[#allocation51_spill] sm:$0xff]  ;;  %7212 = vst [vmem:[#allocation34_spill] sm:$0xff] %v5450_v54  ;;  %v2216_v31 = vsel %vm429_vm1, %v1904_v30, 0.0  ;;  %v2042_v30 = vsel %vm429_vm1, %v1846_v35, 0.0 }
 0x24a   : > { %2031 = vadd.xlane.f32.xlu0 %v2030_v26  ;;  %v5431_v59 = vpop.xlane.xlu1 %1343  ;;  %v5439_v43 = vsub.f32 %v7207_v63, %v1652_v33  ;;  %v5447_v26 = vsub.f32 %v7209_v1, %v1595_v25  ;;  %7214 = vst [vmem:[#allocation35_spill] sm:$0xff] %v5453_v62  ;;  %v7215_v33 = vld [vmem:[#allocation55_spill] sm:$0xff]  ;;  %v1911_v63 = vmul.f32 %v5416_v20, %v5416_v20  ;;  %7220 = vst [vmem:[#allocation38_spill] sm:$0xff] %v5476_v14 }
 0x24b   : > { %v5442_v18 = vpop.xlane.xlu0 %1340  ;;  %v5458_v47 = vsub.f32 %v7215_v33, %v1658_v27  ;;  %v1910_v25 = vmul.f32 %v5419_v48, %v5419_v48  ;;  %v5466_v1 = vsub.f32 %v7217_v24, %v1593_v8  ;;  %v1845_v27 = vmul.f32 %v5425_v61, %v5425_v61 }
 0x24c   : > { %7208 = vst [vmem:[#allocation32_spill] sm:$0xff] %v5439_v43  ;;  %7210 = vst [vmem:[#allocation33_spill] sm:$0xff] %v5447_v26  ;;  %v2045_v48 = vsel %vm429_vm1, %v1847_v32, 0.0  ;;  %v1908_v8 = vmul.f32 %v5439_v43, %v5439_v43  ;;  %v1851_v24 = vmul.f32 %v5447_v26, %v5447_v26  ;;  %v1915_v9 = vmul.f32 %v5453_v62, %v5453_v62 }
 0x24d   : > { %7216 = vst [vmem:[#allocation36_spill] sm:$0xff] %v5458_v47  ;;  %2226 = vadd.xlane.f32.xlu1 %v2225_v23  ;;  %7218 = vst [vmem:[#allocation37_spill] sm:$0xff] %v5466_v1  ;;  %v1844_v23 = vmul.f32 %v5428_v2, %v5428_v2  ;;  %v1850_v2 = vmul.f32 %v5450_v54, %v5450_v54  ;;  %v2237_v32 = vsel %vm429_vm1, %v1911_v63, 0.0  ;;  %v1656_v43 = vmul.f32 0.125, %v5044_v46 }
 0x24e   : > { %2223 = vadd.xlane.f32.xlu0 %v2222_v6  ;;  %v5468_v56 = vpop.xlane.xlu1 %1535  ;;  %v1909_v6 = vmul.f32 %v5436_v29, %v5436_v29  ;;  %v5495_v29 = vsel %vm429_vm1, %v1910_v25, 0.0  ;;  %v1914_v35 = vmul.f32 %v5458_v47, %v5458_v47  ;;  %v5503_v54 = vsel %vm429_vm1, %v1845_v27, 0.0  ;;  %v7221_v47 = vld [vmem:[#allocation58_spill] sm:$0xff] }
 0x24f   : > { %v5478_v33 = vpop.xlane.xlu0 %1532  ;;  %v5506_v62 = vsel %vm429_vm1, %v1844_v23, 0.0  ;;  %v1849_v57 = vmul.f32 %v5466_v1, %v5466_v1  ;;  %v5517_v46 = vsel %vm429_vm1, %v1908_v8, 0.0  ;;  %v1598_v27 = vmul.f32 0.125, %v5062_v52  ;;  %v7223_v52 = vld [vmem:[#allocation59_spill] sm:$0xff] }
 0x250   : > { %v5514_v25 = vsel %vm429_vm1, %v1909_v6, 0.0  ;;  %v5523_v23 = vsel %vm429_vm1, %v1851_v24, 0.0  ;;  %v5526_v1 = vsel %vm429_vm1, %v1850_v2, 0.0  ;;  %v5532_v6 = vsub.f32 %v7221_v47, %v1657_v10 }
 0x251   : > { %2028 = vadd.xlane.f32.xlu1 %v2027_v53  ;;  %v1599_v53 = vmul.f32 0.125, %v5060_v45  ;;  %v5529_v45 = vsel %vm429_vm1, %v1915_v9, 0.0  ;;  %v1663_v8 = vmul.f32 0.125, %v5078_v34  ;;  %v1662_v61 = vmul.f32 0.125, %v5080_v51  ;;  %v7226_v34 = vld [vmem:[#allocation60_spill] sm:$0xff] }
 0x252   : > { %2025 = vadd.xlane.f32.xlu0 %v2024_v19  ;;  %v5500_v26 = vpop.xlane.xlu1 %1361  ;;  %v1848_v19 = vmul.f32 %v5476_v14, %v5476_v14  ;;  %7222 = vst [vmem:[#allocation39_spill] sm:$0xff] %v5532_v6  ;;  %v5537_v14 = vsel %vm429_vm1, %v1914_v35, 0.0  ;;  %v5540_v24 = vsub.f32 %v7223_v52, %v1656_v43  ;;  %v1597_v2 = vmul.f32 0.125, %v5096_v44  ;;  %v7229_v44 = vld [vmem:[#allocation61_spill] sm:$0xff] }
 0x253   : > { %v5511_v63 = vpop.xlane.xlu0 %1358  ;;  %v1596_v20 = vmul.f32 0.125, %v5098_v0  ;;  %v5547_v47 = vsel %vm429_vm1, %v1849_v57, 0.0  ;;  %v5550_v10 = vsub.f32 %v7226_v34, %v1599_v53  ;;  %v1661_v51 = vmul.f32 0.125, %v5114_v55  ;;  %v7231_v53 = vld [vmem:[#allocation62_spill] sm:$0xff]  ;;  %v7233_v55 = vld [vmem:[#allocation63_spill] sm:$0xff] }
 0x254   : > { %7224 = vst [vmem:[#allocation40_spill] sm:$0xff] %v5540_v24  ;;  %v5557_v43 = vsel %vm429_vm1, %v1848_v19, 0.0  ;;  %v5560_v0 = vsub.f32 %v7229_v44, %v1598_v27  ;;  %v1602_v57 = vmul.f32 0.125, %v5134_v28  ;;  %v1667_v52 = vmul.f32 0.125, %v5150_v49  ;;  %v7235_v27 = vld [vmem:[#allocation64_spill] sm:$0xff] }
 0x255   : > { %2220 = vadd.xlane.f32.xlu1 %v2219_v17  ;;  %7227 = vst [vmem:[#allocation42_spill] sm:$0xff] %v5550_v10  ;;  %v1660_v17 = vmul.f32 0.125, %v5116_v58  ;;  %v5566_v34 = vsub.f32 %v7231_v53, %v1663_v8  ;;  %v5569_v41 = vsub.f32 %v7233_v55, %v1662_v61  ;;  %v1666_v58 = vmul.f32 0.125, %v5152_v5  ;;  %v7239_v8 = vld [vmem:[#allocation66_spill] sm:$0xff] }
 0x256   : > { %2217 = vadd.xlane.f32.xlu0 %v2216_v31  ;;  %v5544_v9 = vpop.xlane.xlu1 %1553  ;;  %7230 = vst [vmem:[#allocation44_spill] sm:$0xff] %v5560_v0  ;;  %v1603_v31 = vmul.f32 0.125, %v5132_v39  ;;  %v1913_v19 = vmul.f32 %v5532_v6, %v5532_v6  ;;  %v5575_v44 = vsub.f32 %v7235_v27, %v1597_v2  ;;  %v7237_v39 = vld [vmem:[#allocation65_spill] sm:$0xff]  ;;  %v1601_v28 = vmul.f32 0.125, %v5168_v11  ;;  %v7243_v11 = vld [vmem:[#allocation68_spill] sm:$0xff] }
 0x257   : > { %7225 = vst [vmem:[#allocation41_spill] sm:$0xff] %v5544_v9  ;;  %v5554_v35 = vpop.xlane.xlu0 %1550  ;;  %7232 = vst [vmem:[#allocation45_spill] sm:$0xff] %v5566_v34  ;;  %v5578_v13 = vsub.f32 %v7237_v39, %v1596_v20  ;;  %v1912_v61 = vmul.f32 %v5540_v24, %v5540_v24  ;;  %v5586_v5 = vsub.f32 %v7239_v8, %v1661_v51  ;;  %v1600_v2 = vmul.f32 0.125, %v5170_v37  ;;  %v7245_v27 = vld [vmem:[#allocation69_spill] sm:$0xff]  ;;  %v7247_v24 = vld [vmem:[#allocation70_spill] sm:$0xff] }
 0x258   : > { %7228 = vst [vmem:[#allocation43_spill] sm:$0xff] %v5554_v35  ;;  %7234 = vst [vmem:[#allocation46_spill] sm:$0xff] %v5569_v41  ;;  %v1855_v20 = vmul.f32 %v5550_v10, %v5550_v10  ;;  %v5600_v39 = vsub.f32 %v7245_v27, %v1602_v57  ;;  %v5603_v6 = vsub.f32 %v7247_v24, %v1667_v52  ;;  %v5611_v37 = vsel %vm429_vm1, %v1913_v19, 0.0  ;;  %v7253_v19 = vld [vmem:[#allocation73_spill] sm:$0xff] }
 0x259   : > { %2046 = vadd.xlane.f32.xlu1 %v2045_v48  ;;  %7236 = vst [vmem:[#allocation47_spill] sm:$0xff] %v5575_v44  ;;  %7238 = vst [vmem:[#allocation48_spill] sm:$0xff] %v5578_v13  ;;  %v7241_v48 = vld [vmem:[#allocation67_spill] sm:$0xff]  ;;  %v1854_v51 = vmul.f32 %v5560_v0, %v5560_v0  ;;  %v1918_v57 = vmul.f32 %v5569_v41, %v5569_v41  ;;  %v5624_v52 = vsel %vm429_vm1, %v1912_v61, 0.0  ;;  %v7261_v0 = vld [vmem:[#allocation96_spill] sm:$0xff] }
 0x25a   : > { %2043 = vadd.xlane.f32.xlu0 %v2042_v30  ;;  %v5581_v49 = vpop.xlane.xlu1 %1355  ;;  %7240 = vst [vmem:[#allocation49_spill] sm:$0xff] %v5586_v5  ;;  %v5589_v53 = vsub.f32 %v7241_v48, %v1660_v17  ;;  %v5597_v30 = vsub.f32 %v7243_v11, %v1603_v31  ;;  %7246 = vst [vmem:[#allocation52_spill] sm:$0xff] %v5600_v39  ;;  %v7249_v17 = vld [vmem:[#allocation71_spill] sm:$0xff]  ;;  %v1919_v31 = vmul.f32 %v5566_v34, %v5566_v34  ;;  %v7251_v48 = vld [vmem:[#allocation72_spill] sm:$0xff] }
 0x25b   : > { %v5592_v55 = vpop.xlane.xlu0 %1352  ;;  %7248 = vst [vmem:[#allocation53_spill] sm:$0xff] %v5603_v6  ;;  %v5608_v8 = vsub.f32 %v7249_v17, %v1666_v58  ;;  %v5618_v11 = vsub.f32 %v7251_v48, %v1601_v28  ;;  %v1852_v58 = vmul.f32 %v5578_v13, %v5578_v13  ;;  %v5631_v27 = vsub.f32 %v7253_v19, %v1600_v2  ;;  %v7264_v35 = vld [vmem:[#allocation101_spill] sm:$0xff] }
 0x25c   : > { %7242 = vst [vmem:[#allocation50_spill] sm:$0xff] %v5589_v53  ;;  %7244 = vst [vmem:[#allocation51_spill] sm:$0xff] %v5597_v30  ;;  %v5636_v28 = vsel %vm429_vm1, %v1855_v20, 0.0  ;;  %v1916_v61 = vmul.f32 %v5589_v53, %v5589_v53  ;;  %v5643_v48 = vsel %vm429_vm1, %v1854_v51, 0.0  ;;  %v1859_v13 = vmul.f32 %v5597_v30, %v5597_v30 }
 0x25d   : > { %7250 = vst [vmem:[#allocation54_spill] sm:$0xff] %v5608_v8  ;;  %2238 = vadd.xlane.f32.xlu1 %v2237_v32  ;;  %7252 = vst [vmem:[#allocation55_spill] sm:$0xff] %v5618_v11  ;;  %v1853_v32 = vmul.f32 %v5575_v44, %v5575_v44  ;;  %v1858_v2 = vmul.f32 %v5600_v39, %v5600_v39  ;;  %v1923_v19 = vmul.f32 %v5603_v6, %v5603_v6 }
 0x25e   : > { %2235 = vadd.xlane.f32.xlu0 %v5495_v29  ;;  %v5621_v24 = vpop.xlane.xlu1 %1547  ;;  %7254 = vst [vmem:[#allocation56_spill] sm:$0xff] %v5631_v27  ;;  %v1917_v29 = vmul.f32 %v5586_v5, %v5586_v5  ;;  %v1665_v20 = vmul.f32 0.125, %v5186_v15  ;;  %v5654_v5 = vsel %vm429_vm1, %v1919_v31, 0.0  ;;  %v5657_v53 = vsel %vm429_vm1, %v1918_v57, 0.0 }
 0x25f   : > { %v5633_v17 = vpop.xlane.xlu0 %1544  ;;  %v1922_v51 = vmul.f32 %v5608_v8, %v5608_v8  ;;  %v1664_v30 = vmul.f32 0.125, %v5188_v12  ;;  %v5664_v6 = vsel %vm429_vm1, %v1853_v32, 0.0  ;;  %v5667_v15 = vsel %vm429_vm1, %v1852_v58, 0.0 }
 0x260   : > { %7255 = vst [vmem:[#allocation57_spill] sm:$0xff] %v5633_v17  ;;  %v5672_v44 = vsel %vm429_vm1, %v1917_v29, 0.0  ;;  %v5675_v8 = vsel %vm429_vm1, %v1916_v61, 0.0  ;;  %v1856_v12 = vmul.f32 %v5631_v27, %v5631_v27  ;;  %v5680_v32 = vsel %vm429_vm1, %v1859_v13, 0.0  ;;  %v7258_v29 = vld [vmem:[#allocation12_spill] sm:$0xff] }
 0x261   : > { %2040 = vadd.xlane.f32.xlu1 %v5503_v54  ;;  %v1857_v54 = vmul.f32 %v5618_v11, %v5618_v11  ;;  %v5683_v58 = vsel %vm429_vm1, %v1858_v2, 0.0  ;;  %v5686_v11 = vsel %vm429_vm1, %v1923_v19, 0.0  ;;  %v1607_v34 = vmul.f32 0.125, %v7258_v29  ;;  %v7262_v29 = vld [vmem:[#allocation14_spill] sm:$0xff] }
 0x262   : > { %2037 = vadd.xlane.f32.xlu0 %v5506_v62  ;;  %v1951_v39 = vpop.xlane.xlu1 %1950  ;;  %v5694_v27 = vsel %vm429_vm1, %v1922_v51, 0.0  ;;  %v1606_v2 = vmul.f32 0.125, %v7261_v0  ;;  %v5706_v51 = vsel %vm429_vm1, %v1856_v12, 0.0 }
 0x263   : > { %v2327_v31 = vmul.f32 0.125, %v1951_v39  ;;  %v1948_v57 = vpop.xlane.xlu0 %1947  ;;  %v7256_v39 = vld [vmem:[#allocation74_spill] sm:$0xff] }
 0x264   : > { %v2326_v62 = vmul.f32 0.125, %v1948_v57  ;;  %v5689_v41 = vsub.f32 %v7256_v39, %v1665_v20  ;;  %v7259_v57 = vld [vmem:[#allocation75_spill] sm:$0xff]  ;;  %v5702_v20 = vsel %vm429_vm1, %v1857_v54, 0.0  ;;  %v1671_v39 = vmul.f32 0.125, %v5222_v21 }
 0x265   : > { %v2455_v61 = vadd.f32 1e-05, %v2327_v31  ;;  %2232 = vadd.xlane.f32.xlu1 %v5514_v25  ;;  %v5697_v13 = vsub.f32 %v7259_v57, %v1664_v30  ;;  %v1670_v30 = vmul.f32 0.125, %v7262_v29  ;;  %v1605_v57 = vmul.f32 0.125, %v5240_v22 }
 0x266   : > { %7257 = vst [vmem:[#allocation58_spill] sm:$0xff] %v5689_v41  ;;  %v2454_v10 = vadd.f32 1e-05, %v2326_v62  ;;  %2229 = vadd.xlane.f32.xlu0 %v5517_v46  ;;  %v2143_v19 = vpop.xlane.xlu1 %2142  ;;  %v7263_v62 = vld [vmem:[#allocation78_spill] sm:$0xff]  ;;  %v1604_v54 = vmul.f32 0.125, %v7264_v35  ;;  %v1921_v21 = vmul.f32 %v5689_v41, %v5689_v41  ;;  %v7270_v41 = vld [vmem:[#allocation83_spill] sm:$0xff] }
 0x267   : > { %7260 = vst [vmem:[#allocation59_spill] sm:$0xff] %v5697_v13  ;;  %3575 = vrsqrt.f32 %v2455_v61  ;;  %v2391_v31 = vmul.f32 0.125, %v2143_v19  ;;  %v2140_v25 = vpop.xlane.xlu0 %2139  ;;  %v5711_v46 = vsub.f32 %v7263_v62, %v1607_v34  ;;  %v7265_v61 = vld [vmem:[#allocation79_spill] sm:$0xff]  ;;  %v1669_v19 = vmul.f32 0.125, %v5258_v4  ;;  %v7267_v34 = vld [vmem:[#allocation82_spill] sm:$0xff] }
 0x268   : > { %3577 = vrsqrt.f32 %v2454_v10  ;;  %v2390_v0 = vmul.f32 0.125, %v2140_v25  ;;  %v5718_v12 = vsub.f32 %v7265_v61, %v1606_v2  ;;  %v1920_v10 = vmul.f32 %v5697_v13, %v5697_v13  ;;  %v7272_v61 = vld [vmem:[#allocation86_spill] sm:$0xff] }
 0x269   : > { %v2519_v9 = vadd.f32 1e-05, %v2391_v31  ;;  %2058 = vadd.xlane.f32.xlu1 %v5523_v23  ;;  %v5725_v35 = vsub.f32 %v7267_v34, %v1671_v39  ;;  %v7269_v31 = vld [vmem:[#allocation105_spill] sm:$0xff]  ;;  %v5729_v2 = vsub.f32 %v7270_v41, %v1670_v30  ;;  %v5732_v4 = vsub.f32 %v7272_v61, %v1605_v57 }
 0x26a   : > { %7266 = vst [vmem:[#allocation60_spill] sm:$0xff] %v5718_v12  ;;  %v2518_v29 = vadd.f32 1e-05, %v2390_v0  ;;  %2055 = vadd.xlane.f32.xlu0 %v5526_v1  ;;  %v1945_v22 = vpop.xlane.xlu1 %1944  ;;  %v1668_v23 = vmul.f32 0.125, %v7269_v31  ;;  %v7274_v0 = vld [vmem:[#allocation87_spill] sm:$0xff]  ;;  %v5739_v39 = vsel %vm429_vm1, %v1921_v21, 0.0 }
 0x26b   : > { %7268 = vst [vmem:[#allocation61_spill] sm:$0xff] %v5725_v35  ;;  %3579 = vrsqrt.f32 %v2519_v9  ;;  %v2325_v25 = vmul.f32 0.125, %v1945_v22  ;;  %v1942_v62 = vpop.xlane.xlu0 %1941  ;;  %7271 = vst [vmem:[#allocation62_spill] sm:$0xff] %v5729_v2  ;;  %v5735_v17 = vsub.f32 %v7274_v0, %v1604_v54  ;;  %v1863_v9 = vmul.f32 %v5711_v46, %v5711_v46  ;;  %v7276_v22 = vld [vmem:[#allocation90_spill] sm:$0xff] }
 0x26c   : > { %7273 = vst [vmem:[#allocation63_spill] sm:$0xff] %v5732_v4  ;;  %3581 = vrsqrt.f32 %v2518_v29  ;;  %v2324_v1 = vmul.f32 0.125, %v1942_v62  ;;  %v5744_v41 = vsub.f32 %v7276_v22, %v1669_v19  ;;  %v5748_v29 = vsel %vm429_vm1, %v1920_v10, 0.0 }
 0x26d   : > { %7275 = vst [vmem:[#allocation64_spill] sm:$0xff] %v5735_v17  ;;  %v2453_v13 = vadd.f32 1e-05, %v2325_v25  ;;  %2250 = vadd.xlane.f32.xlu1 %v5529_v45  ;;  %v1862_v54 = vmul.f32 %v5718_v12, %v5718_v12  ;;  %v7278_v45 = vld [vmem:[#allocation91_spill] sm:$0xff]  ;;  %v1927_v19 = vmul.f32 %v5725_v35, %v5725_v35  ;;  %v1926_v10 = vmul.f32 %v5729_v2, %v5729_v2  ;;  %v7288_v12 = vld [vmem:[#allocation138_spill] sm:$0xff] }
 0x26e   : > { %7277 = vst [vmem:[#allocation65_spill] sm:$0xff] %v5744_v41  ;;  %v2452_v30 = vadd.f32 1e-05, %v2324_v1  ;;  %2247 = vadd.xlane.f32.xlu0 %v5537_v14  ;;  %v2137_v57 = vpop.xlane.xlu1 %2136  ;;  %v5753_v34 = vsub.f32 %v7278_v45, %v1668_v23  ;;  %v1861_v14 = vmul.f32 %v5732_v4, %v5732_v4  ;;  %v1611_v62 = vmul.f32 0.125, %v5276_v42  ;;  %v7280_v1 = vld [vmem:[#allocation19_spill] sm:$0xff] }
 0x26f   : > { %3583 = vrsqrt.f32 %v2453_v13  ;;  %v2389_v21 = vmul.f32 0.125, %v2137_v57  ;;  %v2134_v31 = vpop.xlane.xlu0 %2133  ;;  %v5764_v13 = vsel %vm429_vm1, %v1863_v9, 0.0  ;;  %v1860_v23 = vmul.f32 %v5735_v17, %v5735_v17  ;;  %v7287_v17 = vld [vmem:[#allocation20_spill] sm:$0xff] }
 0x270   : > { %7279 = vst [vmem:[#allocation66_spill] sm:$0xff] %v5753_v34  ;;  %3585 = vrsqrt.f32 %v2452_v30  ;;  %v2388_v25 = vmul.f32 0.125, %v2134_v31  ;;  %v1610_v0 = vmul.f32 0.125, %v7280_v1  ;;  %v5771_v57 = vsel %vm429_vm1, %v1862_v54, 0.0 }
 0x271   : > { %v2517_v61 = vadd.f32 1e-05, %v2389_v21  ;;  %2052 = vadd.xlane.f32.xlu1 %v5547_v47  ;;  %v1925_v42 = vmul.f32 %v5744_v41, %v5744_v41  ;;  %v1924_v9 = vmul.f32 %v5753_v34, %v5753_v34  ;;  %v5778_v21 = vsel %vm429_vm1, %v1927_v19, 0.0  ;;  %v7283_v19 = vld [vmem:[#allocation133_spill] sm:$0xff] }
 0x272   : > { %v2516_v22 = vadd.f32 1e-05, %v2388_v25  ;;  %2049 = vadd.xlane.f32.xlu0 %v5557_v43  ;;  %v1963_v30 = vpop.xlane.xlu1 %1962  ;;  %v5783_v43 = vld [vmem:[%s6706_s3] ss:$0 sm:$0xff]  ;;  %v5786_v25 = vsel %vm429_vm1, %v1861_v14, 0.0  ;;  %v5797_v41 = vsel %vm429_vm1, %v1860_v23, 0.0 }
 0x273   : > { %3587 = vrsqrt.f32 %v2517_v61  ;;  %v2331_v47 = vmul.f32 0.125, %v1963_v30  ;;  %v1960_v45 = vpop.xlane.xlu0 %1959  ;;  %v5789_v61 = vsel %vm429_vm1, %v1926_v10, 0.0  ;;  %v7281_v30 = vld [vmem:[#allocation94_spill] sm:$0xff]  ;;  %v7285_v10 = vld [vmem:[#allocation135_spill] sm:$0xff]  ;;  %v1674_v4 = vmul.f32 0.125, %v7287_v17 }
 0x274   : > { %v3576_v31 = vpop.eup %3575  ;;  %3589 = vrsqrt.f32 %v2516_v22  ;;  %v2330_v54 = vmul.f32 0.125, %v1960_v45  ;;  %v5792_v2 = vsub.f32 %v7281_v30, %v1611_v62  ;;  %v7284_v22 = vld [vmem:[#allocation95_spill] sm:$0xff]  ;;  %v5805_v14 = vld [vmem:[%s6707_s4] ss:$0 sm:$0xff] }
 0x275   : > { %v3578_v1 = vpop.eup %3577  ;;  %v2711_v35 = vmul.f32 %v3576_v31, %v7283_v19  ;;  %v2459_v34 = vadd.f32 1e-05, %v2331_v47  ;;  %2244 = vadd.xlane.f32.xlu1 %v5611_v37  ;;  %v5800_v45 = vsub.f32 %v7284_v22, %v1610_v0  ;;  %v5810_v31 = vsel %vm429_vm1, %v1925_v42, 0.0  ;;  %v7289_v17 = vld [vmem:[#allocation98_spill] sm:$0xff] }
 0x276   : > { %7282 = vst [vmem:[#allocation67_spill] sm:$0xff] %v5792_v2  ;;  %v2710_v62 = vmul.f32 %v3578_v1, %v7285_v10  ;;  %v2458_v30 = vadd.f32 1e-05, %v2330_v54  ;;  %2241 = vadd.xlane.f32.xlu0 %v5624_v52  ;;  %v2155_v47 = vpop.xlane.xlu1 %2154  ;;  %v5814_v19 = vsel %vm429_vm1, %v1924_v9, 0.0  ;;  %v1675_v52 = vmul.f32 0.125, %v5294_v36  ;;  %v7286_v1 = vld [vmem:[#allocation137_spill] sm:$0xff] }
 0x277   : > { %v2846_v37 = vmul.f32 %v5783_v43, %v2711_v35  ;;  %3591 = vrsqrt.f32 %v2459_v34  ;;  %v2395_v23 = vmul.f32 0.125, %v2155_v47  ;;  %v2152_v0 = vpop.xlane.xlu0 %2151  ;;  %v1867_v47 = vmul.f32 %v5792_v2, %v5792_v2 }
 0x278   : > { %v3580_v22 = vpop.eup %3579  ;;  %v2845_v42 = vmul.f32 %v5783_v43, %v2710_v62  ;;  %3593 = vrsqrt.f32 %v2458_v30  ;;  %v2394_v35 = vmul.f32 0.125, %v2152_v0  ;;  %v5840_v2 = vsub.f32 %v7289_v17, %v1675_v52  ;;  %v7291_v52 = vld [vmem:[#allocation99_spill] sm:$0xff]  ;;  %v7293_v17 = vld [vmem:[#allocation113_spill] sm:$0xff] }
 0x279   : > { %v3582_v34 = vpop.eup %3581  ;;  %v2981_v54 = vadd.f32 %v5805_v14, %v2846_v37  ;;  %v2775_v9 = vmul.f32 %v3580_v22, %v7286_v1  ;;  %v2523_v10 = vadd.f32 1e-05, %v2395_v23  ;;  %2070 = vadd.xlane.f32.xlu1 %v5636_v28  ;;  %v1866_v22 = vmul.f32 %v5800_v45, %v5800_v45 }
 0x27a   : > { %v2980_v36 = vadd.f32 %v5805_v14, %v2845_v42  ;;  %v2774_v62 = vmul.f32 %v3582_v34, %v7288_v12  ;;  %v2522_v30 = vadd.f32 1e-05, %v2394_v35  ;;  %2067 = vadd.xlane.f32.xlu0 %v5643_v48  ;;  %v1957_v0 = vpop.xlane.xlu1 %1956  ;;  %v7290_v34 = vld [vmem:[#allocation139_spill] sm:$0xff] }
 0x27b   : > { %3109 = vst.msk [vmem:[%s5821_s12 + $0x18] sm:$0xff] %vm429_vm1, %v2981_v54  ;;  %v2910_v37 = vmul.f32 %v5783_v43, %v2775_v9  ;;  %3595 = vrsqrt.f32 %v2523_v10  ;;  %v2329_v28 = vmul.f32 0.125, %v1957_v0  ;;  %v1954_v23 = vpop.xlane.xlu0 %1953  ;;  %v5849_v10 = vsel %vm429_vm1, %v1867_v47, 0.0 }
 0x27c   : > { %v3584_v1 = vpop.eup %3583  ;;  %3108 = vst.msk [vmem:[%s5821_s12 + $0x10] sm:$0xff] %vm429_vm1, %v2980_v36  ;;  %v2909_v48 = vmul.f32 %v5783_v43, %v2774_v62  ;;  %3597 = vrsqrt.f32 %v2522_v30  ;;  %v2328_v12 = vmul.f32 0.125, %v1954_v23  ;;  %v5852_v0 = vsub.f32 %v7291_v52, %v1674_v4  ;;  %v7292_v62 = vld [vmem:[#allocation140_spill] sm:$0xff] }
 0x27d   : > { %v3586_v42 = vpop.eup %3585  ;;  %v3045_v35 = vadd.f32 %v5805_v14, %v2910_v37  ;;  %v2709_v54 = vmul.f32 %v3584_v1, %v7290_v34  ;;  %v2457_v9 = vadd.f32 1e-05, %v2329_v28  ;;  %2262 = vadd.xlane.f32.xlu1 %v5654_v5  ;;  %v5861_v47 = vsel %vm429_vm1, %v1866_v22, 0.0 }
 0x27e   : > { %v3044_v36 = vadd.f32 %v5805_v14, %v2909_v48  ;;  %v2708_v30 = vmul.f32 %v3586_v42, %v7292_v62  ;;  %v2456_v23 = vadd.f32 1e-05, %v2328_v12  ;;  %2259 = vadd.xlane.f32.xlu0 %v5657_v53  ;;  %v2149_v37 = vpop.xlane.xlu1 %2148  ;;  %v1609_v34 = vmul.f32 0.125, %v7293_v17  ;;  %v7295_v62 = vld [vmem:[#allocation142_spill] sm:$0xff] }
 0x27f   : > { %3173 = vst.msk [vmem:[%s5821_s12 + $0x218] sm:$0xff] %vm429_vm1, %v3045_v35  ;;  %v2844_v28 = vmul.f32 %v5783_v43, %v2709_v54  ;;  %3599 = vrsqrt.f32 %v2457_v9  ;;  %v2393_v5 = vmul.f32 0.125, %v2149_v37  ;;  %v2146_v1 = vpop.xlane.xlu0 %2145  ;;  %v7294_v35 = vld [vmem:[#allocation141_spill] sm:$0xff]  ;;  %v1931_v22 = vmul.f32 %v5840_v2, %v5840_v2 }
 0x280   : > { %v3588_v4 = vpop.eup %3587  ;;  %3172 = vst.msk [vmem:[%s5821_s12 + $0x210] sm:$0xff] %vm429_vm1, %v3044_v36  ;;  %v2843_v48 = vmul.f32 %v5783_v43, %v2708_v30  ;;  %3601 = vrsqrt.f32 %v2456_v23  ;;  %v2392_v53 = vmul.f32 0.125, %v2146_v1  ;;  %v1608_v52 = vmul.f32 0.125, %v5326_v7  ;;  %v7296_v7 = vld [vmem:[#allocation102_spill] sm:$0xff] }
 0x281   : > { %v3590_v12 = vpop.eup %3589  ;;  %v2979_v42 = vadd.f32 %v5805_v14, %v2844_v28  ;;  %v2773_v54 = vmul.f32 %v3588_v4, %v7294_v35  ;;  %v2521_v9 = vadd.f32 1e-05, %v2393_v5  ;;  %2064 = vadd.xlane.f32.xlu1 %v5664_v6  ;;  %v1930_v1 = vmul.f32 %v5852_v0, %v5852_v0 }
 0x282   : > { %v2978_v36 = vadd.f32 %v5805_v14, %v2843_v48  ;;  %v2772_v30 = vmul.f32 %v3590_v12, %v7295_v62  ;;  %v2520_v23 = vadd.f32 1e-05, %v2392_v53  ;;  %2061 = vadd.xlane.f32.xlu0 %v5667_v15  ;;  %v1975_v37 = vpop.xlane.xlu1 %1974  ;;  %v5882_v17 = vsub.f32 %v7296_v7, %v1609_v34  ;;  %v7298_v34 = vld [vmem:[#allocation103_spill] sm:$0xff] }
 0x283   : > { %3107 = vst.msk [vmem:[%s5821_s12 + $0x8] sm:$0xff] %vm429_vm1, %v2979_v42  ;;  %v2908_v28 = vmul.f32 %v5783_v43, %v2773_v54  ;;  %3603 = vrsqrt.f32 %v2521_v9  ;;  %v2335_v6 = vmul.f32 0.125, %v1975_v37  ;;  %v1972_v5 = vpop.xlane.xlu0 %1971  ;;  %v7297_v42 = vld [vmem:[#allocation143_spill] sm:$0xff]  ;;  %v5891_v9 = vsel %vm429_vm1, %v1931_v22, 0.0 }
 0x284   : > { %v3592_v4 = vpop.eup %3591  ;;  %3106 = vst.msk [vmem:[%s5821_s12] sm:$0xff] %vm429_vm1, %v2978_v36  ;;  %v2907_v15 = vmul.f32 %v5783_v43, %v2772_v30  ;;  %3605 = vrsqrt.f32 %v2520_v23  ;;  %v2334_v48 = vmul.f32 0.125, %v1972_v5  ;;  %v5894_v62 = vsub.f32 %v7298_v34, %v1608_v52  ;;  %v7299_v30 = vld [vmem:[#allocation144_spill] sm:$0xff] }
 0x285   : > { %v3594_v53 = vpop.eup %3593  ;;  %v3043_v12 = vadd.f32 %v5805_v14, %v2908_v28  ;;  %v2715_v35 = vmul.f32 %v3592_v4, %v7297_v42  ;;  %v2463_v54 = vadd.f32 1e-05, %v2335_v6  ;;  %2256 = vadd.xlane.f32.xlu1 %v5672_v44  ;;  %v5903_v22 = vsel %vm429_vm1, %v1930_v1, 0.0 }
 0x286   : > { %v3042_v36 = vadd.f32 %v5805_v14, %v2907_v15  ;;  %v2714_v23 = vmul.f32 %v3594_v53, %v7299_v30  ;;  %v2462_v37 = vadd.f32 1e-05, %v2334_v48  ;;  %2253 = vadd.xlane.f32.xlu0 %v5675_v8  ;;  %v2167_v28 = vpop.xlane.xlu1 %2166  ;;  %v1673_v4 = vmul.f32 0.125, %v5349_v3  ;;  %v7300_v53 = vld [vmem:[#allocation145_spill] sm:$0xff] }
 0x287   : > { %3171 = vst.msk [vmem:[%s5821_s12 + $0x208] sm:$0xff] %vm429_vm1, %v3043_v12  ;;  %v2850_v6 = vmul.f32 %v5783_v43, %v2715_v35  ;;  %3607 = vrsqrt.f32 %v2463_v54  ;;  %v2399_v44 = vmul.f32 0.125, %v2167_v28  ;;  %v2164_v5 = vpop.xlane.xlu0 %2163  ;;  %v1865_v1 = vmul.f32 %v5882_v17, %v5882_v17  ;;  %v7301_v54 = vld [vmem:[#allocation146_spill] sm:$0xff] }
 0x288   : > { %v3596_v52 = vpop.eup %3595  ;;  %3170 = vst.msk [vmem:[%s5821_s12 + $0x200] sm:$0xff] %vm429_vm1, %v3042_v36  ;;  %v2849_v7 = vmul.f32 %v5783_v43, %v2714_v23  ;;  %3609 = vrsqrt.f32 %v2462_v37  ;;  %v2398_v8 = vmul.f32 0.125, %v2164_v5  ;;  %v1672_v3 = vmul.f32 0.125, %v5354_v16  ;;  %v7302_v16 = vld [vmem:[#allocation106_spill] sm:$0xff] }
 0x289   : > { %v3598_v15 = vpop.eup %3597  ;;  %v2985_v48 = vadd.f32 %v5805_v14, %v2850_v6  ;;  %v2779_v12 = vmul.f32 %v3596_v52, %v7300_v53  ;;  %v2527_v42 = vadd.f32 1e-05, %v2399_v44  ;;  %2082 = vadd.xlane.f32.xlu1 %v5680_v32  ;;  %v1864_v28 = vmul.f32 %v5894_v62, %v5894_v62 }
 0x28a   : > { %v2984_v35 = vadd.f32 %v5805_v14, %v2849_v7  ;;  %v2778_v34 = vmul.f32 %v3598_v15, %v7301_v54  ;;  %v2526_v36 = vadd.f32 1e-05, %v2398_v8  ;;  %2079 = vadd.xlane.f32.xlu0 %v5683_v58  ;;  %v1969_v30 = vpop.xlane.xlu1 %1968  ;;  %v5924_v44 = vsub.f32 %v7302_v16, %v1673_v4  ;;  %v7303_v8 = vld [vmem:[#allocation147_spill] sm:$0xff]  ;;  %v7306_v16 = vld [vmem:[#allocation149_spill] sm:$0xff] }
 0x28b   : > { %3113 = vst.msk [vmem:[%s5821_s12 + $0x38] sm:$0xff] %vm429_vm1, %v2985_v48  ;;  %v2914_v23 = vmul.f32 %v5783_v43, %v2779_v12  ;;  %3611 = vrsqrt.f32 %v2527_v42  ;;  %v2333_v32 = vmul.f32 0.125, %v1969_v30  ;;  %v1966_v37 = vpop.xlane.xlu0 %1965  ;;  %v5933_v53 = vsel %vm429_vm1, %v1865_v1, 0.0  ;;  %v7304_v4 = vld [vmem:[#allocation107_spill] sm:$0xff] }
 0x28c   : > { %v3600_v6 = vpop.eup %3599  ;;  %3112 = vst.msk [vmem:[%s5821_s12 + $0x30] sm:$0xff] %vm429_vm1, %v2984_v35  ;;  %v2913_v5 = vmul.f32 %v5783_v43, %v2778_v34  ;;  %3613 = vrsqrt.f32 %v2526_v36  ;;  %v2332_v58 = vmul.f32 0.125, %v1966_v37  ;;  %v5936_v12 = vsub.f32 %v7304_v4, %v1672_v3  ;;  %v7305_v35 = vld [vmem:[#allocation148_spill] sm:$0xff] }
 0x28d   : > { %v3602_v52 = vpop.eup %3601  ;;  %v3049_v7 = vadd.f32 %v5805_v14, %v2914_v23  ;;  %v2713_v15 = vmul.f32 %v3600_v6, %v7303_v8  ;;  %v2461_v48 = vadd.f32 1e-05, %v2333_v32  ;;  %2076 = vadd.xlane.f32.xlu1 %v5702_v20  ;;  %v1615_v30 = vmul.f32 0.125, %v5372_v38 }
 0x28e   : > { %v3048_v42 = vadd.f32 %v5805_v14, %v2913_v5  ;;  %v2712_v54 = vmul.f32 %v3602_v52, %v7305_v35  ;;  %v2460_v34 = vadd.f32 1e-05, %v2332_v58  ;;  %2073 = vadd.xlane.f32.xlu0 %v5706_v51  ;;  %v2161_v36 = vpop.xlane.xlu1 %2160  ;;  %v5949_v51 = vsel %vm429_vm1, %v1864_v28, 0.0 }
 0x28f   : > { %3177 = vst.msk [vmem:[%s5821_s12 + $0x238] sm:$0xff] %vm429_vm1, %v3049_v7  ;;  %v2848_v20 = vmul.f32 %v5783_v43, %v2713_v15  ;;  %3615 = vrsqrt.f32 %v2461_v48  ;;  %v2397_v1 = vmul.f32 0.125, %v2161_v36  ;;  %v2158_v23 = vpop.xlane.xlu0 %2157  ;;  %v5956_v52 = vmul.f32 %v5924_v44, %v5924_v44  ;;  %v7307_v15 = vld [vmem:[#allocation150_spill] sm:$0xff] }
 0x290   : > { %v3604_v32 = vpop.eup %3603  ;;  %3176 = vst.msk [vmem:[%s5821_s12 + $0x230] sm:$0xff] %vm429_vm1, %v3048_v42  ;;  %v2847_v3 = vmul.f32 %v5783_v43, %v2712_v54  ;;  %3617 = vrsqrt.f32 %v2460_v34  ;;  %v2396_v37 = vmul.f32 0.125, %v2158_v23  ;;  %v1614_v7 = vmul.f32 0.125, %v5377_v40  ;;  %v7308_v42 = vld [vmem:[#allocation110_spill] sm:$0xff] }
 0x291   : > { %v3606_v6 = vpop.eup %3605  ;;  %v2983_v38 = vadd.f32 %v5805_v14, %v2848_v20  ;;  %v2777_v5 = vmul.f32 %v3604_v32, %v7306_v16  ;;  %v2525_v58 = vadd.f32 1e-05, %v2397_v1  ;;  %2268 = vadd.xlane.f32.xlu1 %v5739_v39  ;;  %v5963_v35 = vsub.f32 %v7308_v42, %v1615_v30  ;;  %v7309_v32 = vld [vmem:[#allocation151_spill] sm:$0xff] }
 0x292   : > { %v2982_v8 = vadd.f32 %v5805_v14, %v2847_v3  ;;  %v2776_v28 = vmul.f32 %v3606_v6, %v7307_v15  ;;  %v2524_v48 = vadd.f32 1e-05, %v2396_v37  ;;  %2265 = vadd.xlane.f32.xlu0 %v5748_v29  ;;  %v1987_v4 = vpop.xlane.xlu1 %1986  ;;  %v5973_v29 = vmul.f32 %v5936_v12, %v5936_v12  ;;  %v7310_v6 = vld [vmem:[#allocation111_spill] sm:$0xff] }
 0x293   : > { %3111 = vst.msk [vmem:[%s5821_s12 + $0x28] sm:$0xff] %vm429_vm1, %v2983_v38  ;;  %v2912_v39 = vmul.f32 %v5783_v43, %v2777_v5  ;;  %3619 = vrsqrt.f32 %v2525_v58  ;;  %v2339_v54 = vmul.f32 0.125, %v1987_v4  ;;  %v1984_v34 = vpop.xlane.xlu0 %1983  ;;  %v1613_v1 = vmul.f32 0.125, %v5431_v59  ;;  %v7311_v5 = vld [vmem:[#allocation152_spill] sm:$0xff] }
 0x294   : > { %v3608_v36 = vpop.eup %3607  ;;  %3110 = vst.msk [vmem:[%s5821_s12 + $0x20] sm:$0xff] %vm429_vm1, %v2982_v8  ;;  %v2911_v40 = vmul.f32 %v5783_v43, %v2776_v28  ;;  %3621 = vrsqrt.f32 %v2524_v48  ;;  %v2338_v20 = vmul.f32 0.125, %v1984_v34  ;;  %v5980_v38 = vsub.f32 %v7310_v6, %v1614_v7 }
 0x295   : > { %v3610_v30 = vpop.eup %3609  ;;  %v3047_v23 = vadd.f32 %v5805_v14, %v2912_v39  ;;  %v2719_v3 = vmul.f32 %v3608_v36, %v7309_v32  ;;  %v2467_v37 = vadd.f32 1e-05, %v2339_v54  ;;  %2094 = vadd.xlane.f32.xlu1 %v5764_v13  ;;  %v1871_v13 = vmul.f32 %v5963_v35, %v5963_v35  ;;  %v7312_v54 = vld [vmem:[#allocation118_spill] sm:$0xff] }
 0x296   : > { %v3046_v16 = vadd.f32 %v5805_v14, %v2911_v40  ;;  %v2718_v58 = vmul.f32 %v3610_v30, %v7311_v5  ;;  %v2466_v8 = vadd.f32 1e-05, %v2338_v20  ;;  %2091 = vadd.xlane.f32.xlu0 %v5771_v57  ;;  %v2179_v15 = vpop.xlane.xlu1 %2178  ;;  %v1612_v4 = vmul.f32 0.125, %v5442_v18  ;;  %v7313_v40 = vld [vmem:[#allocation153_spill] sm:$0xff] }
 0x297   : > { %3175 = vst.msk [vmem:[%s5821_s12 + $0x228] sm:$0xff] %vm429_vm1, %v3047_v23  ;;  %v2854_v59 = vmul.f32 %v5783_v43, %v2719_v3  ;;  %3623 = vrsqrt.f32 %v2467_v37  ;;  %v2403_v28 = vmul.f32 0.125, %v2179_v15  ;;  %v2176_v48 = vpop.xlane.xlu0 %2175  ;;  %v5995_v34 = vsub.f32 %v7312_v54, %v1613_v1  ;;  %v7314_v23 = vld [vmem:[#allocation154_spill] sm:$0xff] }
 0x298   : > { %v3612_v7 = vpop.eup %3611  ;;  %3174 = vst.msk [vmem:[%s5821_s12 + $0x220] sm:$0xff] %vm429_vm1, %v3046_v16  ;;  %v2853_v42 = vmul.f32 %v5783_v43, %v2718_v58  ;;  %3625 = vrsqrt.f32 %v2466_v8  ;;  %v2402_v57 = vmul.f32 0.125, %v2176_v48  ;;  %v1870_v1 = vmul.f32 %v5980_v38, %v5980_v38  ;;  %v7315_v8 = vld [vmem:[#allocation119_spill] sm:$0xff] }
 0x299   : > { %v3614_v39 = vpop.eup %3613  ;;  %v2989_v36 = vadd.f32 %v5805_v14, %v2854_v59  ;;  %v2783_v20 = vmul.f32 %v3612_v7, %v7313_v40  ;;  %v2531_v30 = vadd.f32 1e-05, %v2403_v28  ;;  %2088 = vadd.xlane.f32.xlu1 %v5786_v25  ;;  %v2117_v25 = vsel %vm429_vm1, %v1871_v13, 0.0  ;;  %v7316_v7 = vld [vmem:[#allocation155_spill] sm:$0xff] }
 0x29a   : > { %v2988_v18 = vadd.f32 %v5805_v14, %v2853_v42  ;;  %v2782_v32 = vmul.f32 %v3614_v39, %v7314_v23  ;;  %v2530_v3 = vadd.f32 1e-05, %v2402_v57  ;;  %2085 = vadd.xlane.f32.xlu0 %v5797_v41  ;;  %v1981_v37 = vpop.xlane.xlu1 %1980  ;;  %v6010_v15 = vsub.f32 %v7315_v8, %v1612_v4  ;;  %v7317_v39 = vld [vmem:[#allocation156_spill] sm:$0xff] }
 0x29b   : > { %3117 = vst.msk [vmem:[%s5821_s12 + $0x58] sm:$0xff] %vm429_vm1, %v2989_v36  ;;  %v2918_v6 = vmul.f32 %v5783_v43, %v2783_v20  ;;  %3627 = vrsqrt.f32 %v2531_v30  ;;  %v2337_v16 = vmul.f32 0.125, %v1981_v37  ;;  %v1978_v5 = vpop.xlane.xlu0 %1977  ;;  %v1869_v13 = vmul.f32 %v5995_v34, %v5995_v34 }
 0x29c   : > { %v3616_v58 = vpop.eup %3615  ;;  %3116 = vst.msk [vmem:[%s5821_s12 + $0x50] sm:$0xff] %vm429_vm1, %v2988_v18  ;;  %v2917_v41 = vmul.f32 %v5783_v43, %v2782_v32  ;;  %3629 = vrsqrt.f32 %v2530_v3  ;;  %v2336_v59 = vmul.f32 0.125, %v1978_v5  ;;  %v2114_v20 = vsel %vm429_vm1, %v1870_v1, 0.0 }
 0x29d   : > { %v3618_v28 = vpop.eup %3617  ;;  %v3053_v48 = vadd.f32 %v5805_v14, %v2918_v6  ;;  %v2717_v42 = vmul.f32 %v3616_v58, %v7316_v7  ;;  %v2465_v57 = vadd.f32 1e-05, %v2337_v16  ;;  %2106 = vadd.xlane.f32.xlu1 %v5849_v10  ;;  %v1618_v30 = vmul.f32 0.125, %v5511_v63  ;;  %v7318_v6 = vld [vmem:[#allocation2_spill] sm:$0xff] }
 0x29e   : > { %v3052_v4 = vadd.f32 %v5805_v14, %v2917_v41  ;;  %v2716_v54 = vmul.f32 %v3618_v28, %v7317_v39  ;;  %v2464_v36 = vadd.f32 1e-05, %v2336_v59  ;;  %2103 = vadd.xlane.f32.xlu0 %v5861_v47  ;;  %v2173_v40 = vpop.xlane.xlu1 %2172  ;;  %v1868_v37 = vmul.f32 %v6010_v15, %v6010_v15  ;;  %v7319_v59 = vld [vmem:[#allocation76_spill] sm:$0xff] }
 0x29f   : > { %3181 = vst.msk [vmem:[%s5821_s12 + $0x258] sm:$0xff] %vm429_vm1, %v3053_v48  ;;  %v2852_v18 = vmul.f32 %v5783_v43, %v2717_v42  ;;  %3631 = vrsqrt.f32 %v2465_v57  ;;  %v2401_v10 = vmul.f32 0.125, %v2173_v40  ;;  %v2170_v23 = vpop.xlane.xlu0 %2169  ;;  %v2111_v58 = vsel %vm429_vm1, %v1869_v13, 0.0  ;;  %v7320_v42 = vld [vmem:[#allocation126_spill] sm:$0xff] }
 0x2a0   : > { %v3620_v32 = vpop.eup %3619  ;;  %3180 = vst.msk [vmem:[%s5821_s12 + $0x250] sm:$0xff] %vm429_vm1, %v3052_v4  ;;  %v2851_v3 = vmul.f32 %v5783_v43, %v2716_v54  ;;  %3633 = vrsqrt.f32 %v2464_v36  ;;  %v2400_v47 = vmul.f32 0.125, %v2170_v23  ;;  %v1619_v8 = vmul.f32 0.125, %v5500_v26 }
 0x2a1   : > { %v3622_v1 = vpop.eup %3621  ;;  %v2987_v63 = vadd.f32 %v5805_v14, %v2852_v18  ;;  %v2781_v16 = vmul.f32 %v3620_v32, %v7318_v6  ;;  %v2529_v5 = vadd.f32 1e-05, %v2401_v10  ;;  %2100 = vadd.xlane.f32.xlu1 %v5933_v53  ;;  %v6042_v57 = vsub.f32 %v7320_v42, %v1618_v30  ;;  %v7321_v18 = vld [vmem:[#allocation3_spill] sm:$0xff]  ;;  %v7322_v32 = vld [vmem:[#allocation125_spill] sm:$0xff] }
 0x2a2   : > { %v2986_v41 = vadd.f32 %v5805_v14, %v2851_v3  ;;  %v2780_v28 = vmul.f32 %v3622_v1, %v7319_v59  ;;  %v2528_v48 = vadd.f32 1e-05, %v2400_v47  ;;  %2097 = vadd.xlane.f32.xlu0 %v5949_v51  ;;  %v1999_v7 = vpop.xlane.xlu1 %1998  ;;  %v2108_v51 = vsel %vm429_vm1, %v1868_v37, 0.0  ;;  %v7323_v1 = vld [vmem:[#allocation77_spill] sm:$0xff] }
 0x2a3   : > { %3115 = vst.msk [vmem:[%s5821_s12 + $0x48] sm:$0xff] %vm429_vm1, %v2987_v63  ;;  %v2916_v4 = vmul.f32 %v5783_v43, %v2781_v16  ;;  %3635 = vrsqrt.f32 %v2529_v5  ;;  %v2343_v53 = vmul.f32 0.125, %v1999_v7  ;;  %v1996_v13 = vpop.xlane.xlu0 %1995  ;;  %v1616_v40 = vmul.f32 0.125, %v5592_v55 }
 0x2a4   : > { %v3624_v39 = vpop.eup %3623  ;;  %3114 = vst.msk [vmem:[%s5821_s12 + $0x40] sm:$0xff] %vm429_vm1, %v2986_v41  ;;  %v2915_v26 = vmul.f32 %v5783_v43, %v2780_v28  ;;  %3637 = vrsqrt.f32 %v2528_v48  ;;  %v2342_v54 = vmul.f32 0.125, %v1996_v13  ;;  %v6055_v3 = vsub.f32 %v7322_v32, %v1619_v8  ;;  %v7324_v48 = vld [vmem:[#allocation132_spill] sm:$0xff]  ;;  %v7327_v32 = vld [vmem:[#allocation131_spill] sm:$0xff] }
 0x2a5   : > { %v3626_v36 = vpop.eup %3625  ;;  %v3051_v30 = vadd.f32 %v5805_v14, %v2916_v4  ;;  %v2723_v10 = vmul.f32 %v3624_v39, %v7321_v18  ;;  %v2471_v23 = vadd.f32 1e-05, %v2343_v53  ;;  %2118 = vadd.xlane.f32.xlu1 %v2117_v25  ;;  %v1874_v25 = vmul.f32 %v6042_v57, %v6042_v57  ;;  %v7325_v4 = vld [vmem:[#allocation4_spill] sm:$0xff] }
 0x2a6   : > { %v3050_v47 = vadd.f32 %v5805_v14, %v2915_v26  ;;  %v2722_v63 = vmul.f32 %v3626_v36, %v7323_v1  ;;  %v2470_v6 = vadd.f32 1e-05, %v2342_v54  ;;  %2115 = vadd.xlane.f32.xlu0 %v2114_v20  ;;  %v2191_v37 = vpop.xlane.xlu1 %2190  ;;  %v1617_v8 = vmul.f32 0.125, %v5581_v49  ;;  %v7326_v39 = vld [vmem:[#allocation80_spill] sm:$0xff] }
 0x2a7   : > { %3179 = vst.msk [vmem:[%s5821_s12 + $0x248] sm:$0xff] %vm429_vm1, %v3051_v30  ;;  %v2858_v55 = vmul.f32 %v5783_v43, %v2723_v10  ;;  %3639 = vrsqrt.f32 %v2471_v23  ;;  %v2407_v16 = vmul.f32 0.125, %v2191_v37  ;;  %v2188_v5 = vpop.xlane.xlu0 %2187  ;;  %v6069_v7 = vsub.f32 %v7324_v48, %v1616_v40  ;;  %v7328_v37 = vld [vmem:[#allocation5_spill] sm:$0xff] }
 0x2a8   : > { %v3628_v41 = vpop.eup %3627  ;;  %3178 = vst.msk [vmem:[%s5821_s12 + $0x240] sm:$0xff] %vm429_vm1, %v3050_v47  ;;  %v2857_v59 = vmul.f32 %v5783_v43, %v2722_v63  ;;  %3641 = vrsqrt.f32 %v2470_v6  ;;  %v2406_v20 = vmul.f32 0.125, %v2188_v5  ;;  %v1875_v30 = vmul.f32 %v6055_v3, %v6055_v3 }
 0x2a9   : > { %v3630_v28 = vpop.eup %3629  ;;  %v2993_v42 = vadd.f32 %v5805_v14, %v2858_v55  ;;  %v2787_v53 = vmul.f32 %v3628_v41, %v7325_v4  ;;  %v2535_v13 = vadd.f32 1e-05, %v2407_v16  ;;  %2112 = vadd.xlane.f32.xlu1 %v2111_v58  ;;  %v2126_v23 = vsel %vm429_vm1, %v1874_v25, 0.0  ;;  %v7329_v41 = vld [vmem:[#allocation81_spill] sm:$0xff] }
 0x2aa   : > { %v2992_v49 = vadd.f32 %v5805_v14, %v2857_v59  ;;  %v2786_v26 = vmul.f32 %v3630_v28, %v7326_v39  ;;  %v2534_v54 = vadd.f32 1e-05, %v2406_v20  ;;  %2109 = vadd.xlane.f32.xlu0 %v2108_v51  ;;  %v1993_v36 = vpop.xlane.xlu1 %1992  ;;  %v6082_v47 = vsub.f32 %v7327_v32, %v1617_v8 }
 0x2ab   : > { %3121 = vst.msk [vmem:[%s5821_s12 + $0x78] sm:$0xff] %vm429_vm1, %v2993_v42  ;;  %v2922_v40 = vmul.f32 %v5783_v43, %v2787_v53  ;;  %3643 = vrsqrt.f32 %v2535_v13  ;;  %v2341_v18 = vmul.f32 0.125, %v1993_v36  ;;  %v1990_v10 = vpop.xlane.xlu0 %1989  ;;  %v1872_v5 = vmul.f32 %v6069_v7, %v6069_v7 }
 0x2ac   : > { %v3632_v58 = vpop.eup %3631  ;;  %3120 = vst.msk [vmem:[%s5821_s12 + $0x70] sm:$0xff] %vm429_vm1, %v2992_v49  ;;  %v2921_v51 = vmul.f32 %v5783_v43, %v2786_v26  ;;  %3645 = vrsqrt.f32 %v2534_v54  ;;  %v2340_v1 = vmul.f32 0.125, %v1990_v10  ;;  %v6096_v28 = vsel %vm429_vm1, %v5956_v52, 0.0  ;;  %v7330_v54 = vld [vmem:[#allocation6_spill] sm:$0xff]  ;;  %v7331_v10 = vld [vmem:[#allocation84_spill] sm:$0xff] }
 0x2ad   : > { %v3634_v63 = vpop.eup %3633  ;;  %v3057_v6 = vadd.f32 %v5805_v14, %v2922_v40  ;;  %v2721_v55 = vmul.f32 %v3632_v58, %v7328_v37  ;;  %v2469_v16 = vadd.f32 1e-05, %v2341_v18  ;;  %2274 = vadd.xlane.f32.xlu1 %v5686_v11  ;;  %v2129_v4 = vsel %vm429_vm1, %v1875_v30, 0.0 }
 0x2ae   : > { %v3056_v25 = vadd.f32 %v5805_v14, %v2921_v51  ;;  %v2720_v8 = vmul.f32 %v3634_v63, %v7329_v41  ;;  %v2468_v59 = vadd.f32 1e-05, %v2340_v1  ;;  %2127 = vadd.xlane.f32.xlu0 %v2126_v23  ;;  %v2185_v20 = vpop.xlane.xlu1 %2184  ;;  %v1873_v52 = vmul.f32 %v6082_v47, %v6082_v47 }
 0x2af   : > { %3185 = vst.msk [vmem:[%s5821_s12 + $0x278] sm:$0xff] %vm429_vm1, %v3057_v6  ;;  %v2856_v48 = vmul.f32 %v5783_v43, %v2721_v55  ;;  %3647 = vrsqrt.f32 %v2469_v16  ;;  %v2405_v11 = vmul.f32 0.125, %v2185_v20  ;;  %v2182_v42 = vpop.xlane.xlu0 %2181  ;;  %v2120_v30 = vsel %vm429_vm1, %v1872_v5, 0.0 }
 0x2b0   : > { %v3636_v53 = vpop.eup %3635  ;;  %3184 = vst.msk [vmem:[%s5821_s12 + $0x270] sm:$0xff] %vm429_vm1, %v3056_v25  ;;  %v2855_v13 = vmul.f32 %v5783_v43, %v2720_v8  ;;  %3649 = vrsqrt.f32 %v2468_v59  ;;  %v2404_v49 = vmul.f32 0.125, %v2182_v42  ;;  %v6114_v51 = vsel %vm429_vm1, %v5973_v29, 0.0  ;;  %v7332_v8 = vld [vmem:[#allocation7_spill] sm:$0xff]  ;;  %v7333_v42 = vld [vmem:[#allocation85_spill] sm:$0xff] }
 0x2b1   : > { %v3638_v39 = vpop.eup %3637  ;;  %v2991_v26 = vadd.f32 %v5805_v14, %v2856_v48  ;;  %v2785_v36 = vmul.f32 %v3636_v53, %v7330_v54  ;;  %v2533_v40 = vadd.f32 1e-05, %v2405_v11  ;;  %2130 = vadd.xlane.f32.xlu1 %v2129_v4  ;;  %v1679_v1 = vmul.f32 0.125, %v5398_v60  ;;  %v7334_v54 = vld [vmem:[#allocation114_spill] sm:$0xff] }
 0x2b2   : > { %v2990_v18 = vadd.f32 %v5805_v14, %v2855_v13  ;;  %v2784_v23 = vmul.f32 %v3638_v39, %v7331_v10  ;;  %v2532_v58 = vadd.f32 1e-05, %v2404_v49  ;;  %2121 = vadd.xlane.f32.xlu0 %v2120_v30  ;;  %v2011_v32 = vpop.xlane.xlu1 %2010  ;;  %v2123_v29 = vsel %vm429_vm1, %v1873_v52, 0.0  ;;  %v7336_v10 = vld [vmem:[#allocation8_spill] sm:$0xff] }
 0x2b3   : > { %3119 = vst.msk [vmem:[%s5821_s12 + $0x68] sm:$0xff] %vm429_vm1, %v2991_v26  ;;  %v2920_v63 = vmul.f32 %v5783_v43, %v2785_v36  ;;  %3651 = vrsqrt.f32 %v2533_v40  ;;  %v2347_v6 = vmul.f32 0.125, %v2011_v32  ;;  %v2008_v37 = vpop.xlane.xlu0 %2007  ;;  %v1678_v60 = vmul.f32 0.125, %v5406_v50  ;;  %v7337_v32 = vld [vmem:[#allocation122_spill] sm:$0xff] }
 0x2b4   : > { %v3640_v55 = vpop.eup %3639  ;;  %3118 = vst.msk [vmem:[%s5821_s12 + $0x60] sm:$0xff] %vm429_vm1, %v2990_v18  ;;  %v2919_v16 = vmul.f32 %v5783_v43, %v2784_v23  ;;  %3653 = vrsqrt.f32 %v2532_v58  ;;  %v2346_v5 = vmul.f32 0.125, %v2008_v37  ;;  %v1677_v48 = vmul.f32 0.125, %v5468_v56 }
 0x2b5   : > { %v3642_v25 = vpop.eup %3641  ;;  %v3055_v41 = vadd.f32 %v5805_v14, %v2920_v63  ;;  %v2727_v59 = vmul.f32 %v3640_v55, %v7332_v8  ;;  %v2475_v20 = vadd.f32 1e-05, %v2347_v6  ;;  %2124 = vadd.xlane.f32.xlu1 %v2123_v29  ;;  %v1676_v49 = vmul.f32 0.125, %v5478_v33  ;;  %v7335_v33 = vld [vmem:[#allocation115_spill] sm:$0xff]  ;;  %v7338_v6 = vld [vmem:[#allocation88_spill] sm:$0xff] }
 0x2b6   : > { %v3054_v11 = vadd.f32 %v5805_v14, %v2919_v16  ;;  %v2726_v4 = vmul.f32 %v3642_v25, %v7333_v42  ;;  %v2474_v53 = vadd.f32 1e-05, %v2346_v5  ;;  %2271 = vadd.xlane.f32.xlu0 %v5694_v27  ;;  %v2203_v13 = vpop.xlane.xlu1 %2202  ;;  %v6136_v56 = vsub.f32 %v7334_v54, %v1679_v1  ;;  %v7339_v5 = vld [vmem:[#allocation123_spill] sm:$0xff] }
 0x2b7   : > { %3183 = vst.msk [vmem:[%s5821_s12 + $0x268] sm:$0xff] %vm429_vm1, %v3055_v41  ;;  %v2862_v50 = vmul.f32 %v5783_v43, %v2727_v59  ;;  %3655 = vrsqrt.f32 %v2475_v20  ;;  %v2411_v52 = vmul.f32 0.125, %v2203_v13  ;;  %v2200_v39 = vpop.xlane.xlu0 %2199  ;;  %v6142_v30 = vsub.f32 %v7335_v33, %v1678_v60 }
 0x2b8   : > { %v3644_v26 = vpop.eup %3643  ;;  %3182 = vst.msk [vmem:[%s5821_s12 + $0x260] sm:$0xff] %vm429_vm1, %v3054_v11  ;;  %v2861_v36 = vmul.f32 %v5783_v43, %v2726_v4  ;;  %3657 = vrsqrt.f32 %v2474_v53  ;;  %v2410_v27 = vmul.f32 0.125, %v2200_v39  ;;  %v6148_v1 = vsub.f32 %v7337_v32, %v1677_v48  ;;  %v7340_v11 = vld [vmem:[#allocation9_spill] sm:$0xff] }
 0x2b9   : > { %v3646_v40 = vpop.eup %3645  ;;  %v2997_v18 = vadd.f32 %v5805_v14, %v2862_v50  ;;  %v2791_v23 = vmul.f32 %v3644_v26, %v7336_v10  ;;  %v2539_v58 = vadd.f32 1e-05, %v2411_v52  ;;  %2280 = vadd.xlane.f32.xlu1 %v5810_v31  ;;  %v6154_v29 = vsub.f32 %v7339_v5, %v1676_v49  ;;  %v7341_v49 = vld [vmem:[#allocation89_spill] sm:$0xff] }
 0x2ba   : > { %v2996_v63 = vadd.f32 %v5805_v14, %v2861_v36  ;;  %v2790_v37 = vmul.f32 %v3646_v40, %v7338_v6  ;;  %v2538_v55 = vadd.f32 1e-05, %v2410_v27  ;;  %2277 = vadd.xlane.f32.xlu0 %v5814_v19  ;;  %v2005_v16 = vpop.xlane.xlu1 %2004  ;;  %v1935_v19 = vmul.f32 %v6136_v56, %v6136_v56 }
 0x2bb   : > { %3125 = vst.msk [vmem:[%s5821_s12 + $0x98] sm:$0xff] %vm429_vm1, %v2997_v18  ;;  %v2926_v25 = vmul.f32 %v5783_v43, %v2791_v23  ;;  %3659 = vrsqrt.f32 %v2539_v58  ;;  %v2345_v31 = vmul.f32 0.125, %v2005_v16  ;;  %v2002_v60 = vpop.xlane.xlu0 %2001  ;;  %v1934_v53 = vmul.f32 %v6142_v30, %v6142_v30  ;;  %v7342_v58 = vld [vmem:[#allocation10_spill] sm:$0xff] }
 0x2bc   : > { %v3648_v41 = vpop.eup %3647  ;;  %3124 = vst.msk [vmem:[%s5821_s12 + $0x90] sm:$0xff] %vm429_vm1, %v2996_v63  ;;  %v2925_v8 = vmul.f32 %v5783_v43, %v2790_v37  ;;  %3661 = vrsqrt.f32 %v2538_v55  ;;  %v2344_v59 = vmul.f32 0.125, %v2002_v60  ;;  %v1933_v26 = vmul.f32 %v6148_v1, %v6148_v1  ;;  %v7343_v55 = vld [vmem:[#allocation92_spill] sm:$0xff] }
 0x2bd   : > { %v3650_v20 = vpop.eup %3649  ;;  %v3061_v48 = vadd.f32 %v5805_v14, %v2926_v25  ;;  %v2725_v42 = vmul.f32 %v3648_v41, %v7340_v11  ;;  %v2473_v4 = vadd.f32 1e-05, %v2345_v31  ;;  %2286 = vadd.xlane.f32.xlu1 %v5778_v21  ;;  %v1932_v27 = vmul.f32 %v6154_v29, %v6154_v29  ;;  %v7344_v11 = vld [vmem:[#allocation57_spill] sm:$0xff] }
 0x2be   : > { %v3060_v13 = vadd.f32 %v5805_v14, %v2925_v8  ;;  %v2724_v50 = vmul.f32 %v3650_v20, %v7341_v49  ;;  %v2472_v52 = vadd.f32 1e-05, %v2344_v59  ;;  %2283 = vadd.xlane.f32.xlu0 %v5789_v61  ;;  %v2197_v39 = vpop.xlane.xlu1 %2196  ;;  %v6183_v18 = vsel %vm429_vm1, %v1935_v19, 0.0 }
 0x2bf   : > { %3189 = vst.msk [vmem:[%s5821_s12 + $0x298] sm:$0xff] %vm429_vm1, %v3061_v48  ;;  %v2860_v54 = vmul.f32 %v5783_v43, %v2725_v42  ;;  %3663 = vrsqrt.f32 %v2473_v4  ;;  %v2409_v21 = vmul.f32 0.125, %v2197_v39  ;;  %v2194_v36 = vpop.xlane.xlu0 %2193  ;;  %v6189_v6 = vsel %vm429_vm1, %v1934_v53, 0.0  ;;  %v7345_v53 = vld [vmem:[#allocation11_spill] sm:$0xff]  ;;  %v7347_v39 = vld [vmem:[#allocation93_spill] sm:$0xff] }
 0x2c0   : > { %v3652_v40 = vpop.eup %3651  ;;  %3188 = vst.msk [vmem:[%s5821_s12 + $0x290] sm:$0xff] %vm429_vm1, %v3060_v13  ;;  %v2859_v33 = vmul.f32 %v5783_v43, %v2724_v50  ;;  %3665 = vrsqrt.f32 %v2472_v52  ;;  %v2408_v61 = vmul.f32 0.125, %v2194_v36  ;;  %v2303_v31 = vsel %vm429_vm1, %v1933_v26, 0.0  ;;  %v7346_v50 = vld [vmem:[#allocation41_spill] sm:$0xff]  ;;  %v7348_v36 = vld [vmem:[#allocation43_spill] sm:$0xff] }
 0x2c1   : > { %v3654_v10 = vpop.eup %3653  ;;  %v2995_v23 = vadd.f32 %v5805_v14, %v2860_v54  ;;  %v2789_v32 = vmul.f32 %v3652_v40, %v7342_v58  ;;  %v2537_v63 = vadd.f32 1e-05, %v2409_v21  ;;  %2292 = vadd.xlane.f32.xlu1 %v6096_v28  ;;  %v2300_v8 = vsel %vm429_vm1, %v1932_v27, 0.0 }
 0x2c2   : > { %v2994_v37 = vadd.f32 %v5805_v14, %v2859_v33  ;;  %v2788_v16 = vmul.f32 %v3654_v10, %v7343_v55  ;;  %v2536_v5 = vadd.f32 1e-05, %v2408_v61  ;;  %2289 = vadd.xlane.f32.xlu0 %v6114_v51  ;;  %v2023_v25 = vpop.xlane.xlu1 %2022  ;;  %v1681_v19 = vmul.f32 0.125, %v5621_v24  ;;  %v7349_v10 = vld [vmem:[#allocation134_spill] sm:$0xff] }
 0x2c3   : > { %3123 = vst.msk [vmem:[%s5821_s12 + $0x88] sm:$0xff] %vm429_vm1, %v2995_v23  ;;  %v2924_v60 = vmul.f32 %v5783_v43, %v2789_v32  ;;  %3667 = vrsqrt.f32 %v2537_v63  ;;  %v2351_v28 = vmul.f32 0.125, %v2023_v25  ;;  %v2020_v41 = vpop.xlane.xlu0 %2019  ;;  %v1680_v42 = vmul.f32 0.125, %v7344_v11  ;;  %v7350_v63 = vld [vmem:[#allocation136_spill] sm:$0xff]  ;;  %v6239_v11 = vld [vmem:[%s6706_s3] ss:$0 sm:$0xff] }
 0x2c4   : > { %v3656_v59 = vpop.eup %3655  ;;  %3122 = vst.msk [vmem:[%s5821_s12 + $0x80] sm:$0xff] %vm429_vm1, %v2994_v37  ;;  %v2923_v20 = vmul.f32 %v5783_v43, %v2788_v16  ;;  %3669 = vrsqrt.f32 %v2536_v5  ;;  %v2350_v51 = vmul.f32 0.125, %v2020_v41  ;;  %v1683_v24 = vmul.f32 0.125, %v7346_v50  ;;  %v7351_v16 = vld [vmem:[#allocation13_spill] sm:$0xff]  ;;  %v6250_v50 = vld [vmem:[%s6707_s4] ss:$0 sm:$0xff] }
 0x2c5   : > { %v3658_v48 = vpop.eup %3657  ;;  %v3059_v4 = vadd.f32 %v5805_v14, %v2924_v60  ;;  %v2731_v13 = vmul.f32 %v3656_v59, %v7345_v53  ;;  %v2479_v49 = vadd.f32 1e-05, %v2351_v28  ;;  %2298 = vadd.xlane.f32.xlu1 %v5891_v9  ;;  %v1682_v27 = vmul.f32 0.125, %v7348_v36  ;;  %v7352_v60 = vld [vmem:[#allocation128_spill] sm:$0xff]  ;;  %v7356_v36 = vld [vmem:[#allocation15_spill] sm:$0xff] }
 0x2c6   : > { %v3058_v52 = vadd.f32 %v5805_v14, %v2923_v20  ;;  %v2730_v26 = vmul.f32 %v3658_v48, %v7347_v39  ;;  %v2478_v54 = vadd.f32 1e-05, %v2350_v51  ;;  %2295 = vadd.xlane.f32.xlu0 %v5903_v22  ;;  %v2215_v21 = vpop.xlane.xlu1 %2214  ;;  %v6216_v23 = vsub.f32 %v7349_v10, %v1681_v19  ;;  %v7354_v51 = vld [vmem:[#allocation129_spill] sm:$0xff] }
 0x2c7   : > { %3187 = vst.msk [vmem:[%s5821_s12 + $0x288] sm:$0xff] %vm429_vm1, %v3059_v4  ;;  %v2866_v40 = vmul.f32 %v5783_v43, %v2731_v13  ;;  %3671 = vrsqrt.f32 %v2479_v49  ;;  %v2415_v33 = vmul.f32 0.125, %v2215_v21  ;;  %v2212_v61 = vpop.xlane.xlu0 %2211  ;;  %v6222_v37 = vsub.f32 %v7350_v63, %v1680_v42 }
 0x2c8   : > { %v3660_v9 = vpop.eup %3659  ;;  %3186 = vst.msk [vmem:[%s5821_s12 + $0x280] sm:$0xff] %vm429_vm1, %v3058_v52  ;;  %v2865_v58 = vmul.f32 %v5783_v43, %v2730_v26  ;;  %3673 = vrsqrt.f32 %v2478_v54  ;;  %v2414_v22 = vmul.f32 0.125, %v2212_v61  ;;  %v6227_v28 = vsub.f32 %v7352_v60, %v1683_v24  ;;  %v7353_v43 = vld [vmem:[#allocation97_spill] sm:$0xff]  ;;  %v7355_v52 = vld [vmem:[#allocation100_spill] sm:$0xff] }
 0x2c9   : > { %v3662_v32 = vpop.eup %3661  ;;  %v3001_v55 = vadd.f32 %v5805_v14, %v2866_v40  ;;  %v2795_v5 = vmul.f32 %v3660_v9, %v7351_v16  ;;  %v2543_v25 = vadd.f32 1e-05, %v2415_v33  ;;  %2304 = vadd.xlane.f32.xlu1 %v2303_v31  ;;  %v6232_v48 = vsub.f32 %v7354_v51, %v1682_v27 }
 0x2ca   : > { %v3000_v41 = vadd.f32 %v5805_v14, %v2865_v58  ;;  %v2794_v59 = vmul.f32 %v3662_v32, %v7353_v43  ;;  %v2542_v19 = vadd.f32 1e-05, %v2414_v22  ;;  %2301 = vadd.xlane.f32.xlu0 %v2300_v8  ;;  %v2017_v20 = vpop.xlane.xlu1 %2016  ;;  %v1937_v13 = vmul.f32 %v6216_v23, %v6216_v23 }
 0x2cb   : > { %3129 = vst.msk [vmem:[%s5821_s12 + $0xb8] sm:$0xff] %vm429_vm1, %v3001_v55  ;;  %v2930_v31 = vmul.f32 %v6239_v11, %v2795_v5  ;;  %3675 = vrsqrt.f32 %v2543_v25  ;;  %v2349_v42 = vmul.f32 0.125, %v2017_v20  ;;  %v2014_v14 = vpop.xlane.xlu0 %2013  ;;  %v1936_v54 = vmul.f32 %v6222_v37, %v6222_v37  ;;  %v7357_v5 = vld [vmem:[#allocation16_spill] sm:$0xff] }
 0x2cc   : > { %v3664_v4 = vpop.eup %3663  ;;  %3128 = vst.msk [vmem:[%s5821_s12 + $0xb0] sm:$0xff] %vm429_vm1, %v3000_v41  ;;  %v2929_v8 = vmul.f32 %v6239_v11, %v2794_v59  ;;  %3677 = vrsqrt.f32 %v2542_v19  ;;  %v2348_v53 = vmul.f32 0.125, %v2014_v14  ;;  %v1939_v61 = vmul.f32 %v6227_v28, %v6227_v28  ;;  %v7358_v59 = vld [vmem:[#allocation104_spill] sm:$0xff] }
 0x2cd   : > { %v3666_v49 = vpop.eup %3665  ;;  %v3065_v24 = vadd.f32 %v6250_v50, %v2930_v31  ;;  %v2729_v39 = vmul.f32 %v3664_v4, %v7355_v52  ;;  %v2477_v26 = vadd.f32 1e-05, %v2349_v42  ;;  %2310 = vadd.xlane.f32.xlu1 %v6183_v18  ;;  %v1938_v58 = vmul.f32 %v6232_v48, %v6232_v48  ;;  %v7359_v52 = vld [vmem:[#allocation17_spill] sm:$0xff] }
 0x2ce   : > { %v3064_v21 = vadd.f32 %v6250_v50, %v2929_v8  ;;  %v2728_v27 = vmul.f32 %v3666_v49, %v7356_v36  ;;  %v2476_v40 = vadd.f32 1e-05, %v2348_v53  ;;  %2307 = vadd.xlane.f32.xlu0 %v6189_v6  ;;  %v2209_v33 = vpop.xlane.xlu1 %2208  ;;  %v2315_v63 = vsel %vm429_vm1, %v1937_v13, 0.0  ;;  %v7360_v36 = vld [vmem:[#allocation18_spill] sm:$0xff] }
 0x2cf   : > { %3193 = vst.msk [vmem:[%s5821_s12 + $0x2b8] sm:$0xff] %vm429_vm1, %v3065_v24  ;;  %v2864_v9 = vmul.f32 %v6239_v11, %v2729_v39  ;;  %3679 = vrsqrt.f32 %v2477_v26  ;;  %v2413_v18 = vmul.f32 0.125, %v2209_v33  ;;  %v2206_v10 = vpop.xlane.xlu0 %2205  ;;  %v2312_v41 = vsel %vm429_vm1, %v1936_v54, 0.0 }
 0x2d0   : > { %v3668_v22 = vpop.eup %3667  ;;  %3192 = vst.msk [vmem:[%s5821_s12 + $0x2b0] sm:$0xff] %vm429_vm1, %v3064_v21  ;;  %v2863_v6 = vmul.f32 %v6239_v11, %v2728_v27  ;;  %3681 = vrsqrt.f32 %v2476_v40  ;;  %v2412_v32 = vmul.f32 0.125, %v2206_v10  ;;  %v2321_v13 = vsel %vm429_vm1, %v1939_v61, 0.0 }
 0x2d1   : > { %v3670_v55 = vpop.eup %3669  ;;  %v2999_v16 = vadd.f32 %v6250_v50, %v2864_v9  ;;  %v2793_v25 = vmul.f32 %v3668_v22, %v7357_v5  ;;  %v2541_v60 = vadd.f32 1e-05, %v2413_v18  ;;  %2316 = vadd.xlane.f32.xlu1 %v2315_v63  ;;  %v2318_v54 = vsel %vm429_vm1, %v1938_v58, 0.0  ;;  %v7361_v63 = vld [vmem:[#allocation108_spill] sm:$0xff] }
 0x2d2   : > { %v2998_v43 = vadd.f32 %v6250_v50, %v2863_v6  ;;  %v2792_v19 = vmul.f32 %v3670_v55, %v7358_v59  ;;  %v2540_v20 = vadd.f32 1e-05, %v2412_v32  ;;  %2313 = vadd.xlane.f32.xlu0 %v2312_v41  ;;  %v2035_v51 = vpop.xlane.xlu1 %2034 }
 0x2d3   : > { %3127 = vst.msk [vmem:[%s5821_s12 + $0xa8] sm:$0xff] %vm429_vm1, %v2999_v16  ;;  %v2928_v31 = vmul.f32 %v6239_v11, %v2793_v25  ;;  %3683 = vrsqrt.f32 %v2541_v60  ;;  %v2355_v42 = vmul.f32 0.125, %v2035_v51  ;;  %v2032_v14 = vpop.xlane.xlu0 %2031  ;;  %v7362_v25 = vld [vmem:[#allocation109_spill] sm:$0xff] }
 0x2d4   : > { %v3672_v4 = vpop.eup %3671  ;;  %3126 = vst.msk [vmem:[%s5821_s12 + $0xa0] sm:$0xff] %vm429_vm1, %v2998_v43  ;;  %v2927_v8 = vmul.f32 %v6239_v11, %v2792_v19  ;;  %3685 = vrsqrt.f32 %v2540_v20  ;;  %v2354_v53 = vmul.f32 0.125, %v2032_v14 }
 0x2d5   : > { %v3674_v49 = vpop.eup %3673  ;;  %v3063_v24 = vadd.f32 %v6250_v50, %v2928_v31  ;;  %v2735_v39 = vmul.f32 %v3672_v4, %v7359_v52  ;;  %v2483_v26 = vadd.f32 1e-05, %v2355_v42  ;;  %2322 = vadd.xlane.f32.xlu1 %v2321_v13 }
 0x2d6   : > { %v3062_v21 = vadd.f32 %v6250_v50, %v2927_v8  ;;  %v2734_v27 = vmul.f32 %v3674_v49, %v7360_v36  ;;  %v2482_v40 = vadd.f32 1e-05, %v2354_v53  ;;  %2319 = vadd.xlane.f32.xlu0 %v2318_v54  ;;  %v2227_v33 = vpop.xlane.xlu1 %2226  ;;  %v7363_v8 = vld [vmem:[#allocation112_spill] sm:$0xff] }
 0x2d7   : > { %3191 = vst.msk [vmem:[%s5821_s12 + $0x2a8] sm:$0xff] %vm429_vm1, %v3063_v24  ;;  %v2870_v61 = vmul.f32 %v6239_v11, %v2735_v39  ;;  %3687 = vrsqrt.f32 %v2483_v26  ;;  %v2419_v9 = vmul.f32 0.125, %v2227_v33  ;;  %v2224_v18 = vpop.xlane.xlu0 %2223  ;;  %v7364_v24 = vld [vmem:[#allocation21_spill] sm:$0xff] }
 0x2d8   : > { %v3676_v10 = vpop.eup %3675  ;;  %3190 = vst.msk [vmem:[%s5821_s12 + $0x2a0] sm:$0xff] %vm429_vm1, %v3062_v21  ;;  %v2869_v58 = vmul.f32 %v6239_v11, %v2734_v27  ;;  %3689 = vrsqrt.f32 %v2482_v40  ;;  %v2418_v22 = vmul.f32 0.125, %v2224_v18  ;;  %v7365_v18 = vld [vmem:[#allocation22_spill] sm:$0xff] }
 0x2d9   : > { %v3678_v6 = vpop.eup %3677  ;;  %v3005_v32 = vadd.f32 %v6250_v50, %v2870_v61  ;;  %v2799_v55 = vmul.f32 %v3676_v10, %v7361_v63  ;;  %v2547_v16 = vadd.f32 1e-05, %v2419_v9 }
 0x2da   : > { %v3004_v5 = vadd.f32 %v6250_v50, %v2869_v58  ;;  %v2798_v60 = vmul.f32 %v3678_v6, %v7362_v25  ;;  %v2546_v41 = vadd.f32 1e-05, %v2418_v22  ;;  %v2029_v43 = vpop.xlane.xlu1 %2028  ;;  %v7366_v6 = vld [vmem:[#allocation116_spill] sm:$0xff] }
 0x2db   : > { %3133 = vst.msk [vmem:[%s5821_s12 + $0xd8] sm:$0xff] %vm429_vm1, %v3005_v32  ;;  %v2934_v59 = vmul.f32 %v6239_v11, %v2799_v55  ;;  %3691 = vrsqrt.f32 %v2547_v16  ;;  %v2353_v19 = vmul.f32 0.125, %v2029_v43  ;;  %v2026_v20 = vpop.xlane.xlu0 %2025 }
 0x2dc   : > { %v3680_v51 = vpop.eup %3679  ;;  %3132 = vst.msk [vmem:[%s5821_s12 + $0xd0] sm:$0xff] %vm429_vm1, %v3004_v5  ;;  %v2933_v31 = vmul.f32 %v6239_v11, %v2798_v60  ;;  %3693 = vrsqrt.f32 %v2546_v41  ;;  %v2352_v42 = vmul.f32 0.125, %v2026_v20  ;;  %v7367_v20 = vld [vmem:[#allocation23_spill] sm:$0xff] }
 0x2dd   : > { %v3682_v14 = vpop.eup %3681  ;;  %v3069_v4 = vadd.f32 %v6250_v50, %v2934_v59  ;;  %v2733_v53 = vmul.f32 %v3680_v51, %v7363_v8  ;;  %v2481_v13 = vadd.f32 1e-05, %v2353_v19 }
 0x2de   : > { %v3068_v49 = vadd.f32 %v6250_v50, %v2933_v31  ;;  %v2732_v52 = vmul.f32 %v3682_v14, %v7364_v24  ;;  %v2480_v39 = vadd.f32 1e-05, %v2352_v42  ;;  %v2221_v26 = vpop.xlane.xlu1 %2220  ;;  %v7368_v14 = vld [vmem:[#allocation117_spill] sm:$0xff] }
 0x2df   : > { %3197 = vst.msk [vmem:[%s5821_s12 + $0x2d8] sm:$0xff] %vm429_vm1, %v3069_v4  ;;  %v2868_v54 = vmul.f32 %v6239_v11, %v2733_v53  ;;  %3695 = vrsqrt.f32 %v2481_v13  ;;  %v2417_v21 = vmul.f32 0.125, %v2221_v26  ;;  %v2218_v36 = vpop.xlane.xlu0 %2217 }
 0x2e0   : > { %v3684_v27 = vpop.eup %3683  ;;  %3196 = vst.msk [vmem:[%s5821_s12 + $0x2d0] sm:$0xff] %vm429_vm1, %v3068_v49  ;;  %v2867_v40 = vmul.f32 %v6239_v11, %v2732_v52  ;;  %3697 = vrsqrt.f32 %v2480_v39  ;;  %v2416_v33 = vmul.f32 0.125, %v2218_v36  ;;  %v7369_v36 = vld [vmem:[#allocation24_spill] sm:$0xff] }
 0x2e1   : > { %v3686_v61 = vpop.eup %3685  ;;  %v3003_v9 = vadd.f32 %v6250_v50, %v2868_v54  ;;  %v2797_v10 = vmul.f32 %v3684_v27, %v7365_v18  ;;  %v2545_v58 = vadd.f32 1e-05, %v2417_v21 }
 0x2e2   : > { %v3002_v22 = vadd.f32 %v6250_v50, %v2867_v40  ;;  %v2796_v32 = vmul.f32 %v3686_v61, %v7366_v6  ;;  %v2544_v63 = vadd.f32 1e-05, %v2416_v33  ;;  %v2047_v55 = vpop.xlane.xlu1 %2046  ;;  %v7370_v61 = vld [vmem:[#allocation120_spill] sm:$0xff] }
 0x2e3   : > { %3131 = vst.msk [vmem:[%s5821_s12 + $0xc8] sm:$0xff] %vm429_vm1, %v3003_v9  ;;  %v2932_v16 = vmul.f32 %v6239_v11, %v2797_v10  ;;  %3699 = vrsqrt.f32 %v2545_v58  ;;  %v2359_v5 = vmul.f32 0.125, %v2047_v55  ;;  %v2044_v25 = vpop.xlane.xlu0 %2043 }
 0x2e4   : > { %v3688_v60 = vpop.eup %3687  ;;  %3130 = vst.msk [vmem:[%s5821_s12 + $0xc0] sm:$0xff] %vm429_vm1, %v3002_v22  ;;  %v2931_v41 = vmul.f32 %v6239_v11, %v2796_v32  ;;  %3701 = vrsqrt.f32 %v2544_v63  ;;  %v2358_v43 = vmul.f32 0.125, %v2044_v25  ;;  %v7371_v25 = vld [vmem:[#allocation25_spill] sm:$0xff] }
 0x2e5   : > { %v3690_v59 = vpop.eup %3689  ;;  %v3067_v19 = vadd.f32 %v6250_v50, %v2932_v16  ;;  %v2739_v51 = vmul.f32 %v3688_v60, %v7367_v20  ;;  %v2487_v31 = vadd.f32 1e-05, %v2359_v5 }
 0x2e6   : > { %v3066_v42 = vadd.f32 %v6250_v50, %v2931_v41  ;;  %v2738_v4 = vmul.f32 %v3690_v59, %v7368_v14  ;;  %v2486_v8 = vadd.f32 1e-05, %v2358_v43  ;;  %v2239_v53 = vpop.xlane.xlu1 %2238  ;;  %v7372_v59 = vld [vmem:[#allocation121_spill] sm:$0xff] }
 0x2e7   : > { %3195 = vst.msk [vmem:[%s5821_s12 + $0x2c8] sm:$0xff] %vm429_vm1, %v3067_v19  ;;  %v2874_v13 = vmul.f32 %v6239_v11, %v2739_v51  ;;  %3703 = vrsqrt.f32 %v2487_v31  ;;  %v2423_v49 = vmul.f32 0.125, %v2239_v53  ;;  %v2236_v24 = vpop.xlane.xlu0 %2235 }
 0x2e8   : > { %v3692_v52 = vpop.eup %3691  ;;  %3194 = vst.msk [vmem:[%s5821_s12 + $0x2c0] sm:$0xff] %vm429_vm1, %v3066_v42  ;;  %v2873_v39 = vmul.f32 %v6239_v11, %v2738_v4  ;;  %3705 = vrsqrt.f32 %v2486_v8  ;;  %v2422_v26 = vmul.f32 0.125, %v2236_v24  ;;  %v7373_v24 = vld [vmem:[#allocation26_spill] sm:$0xff] }
 0x2e9   : > { %v3694_v54 = vpop.eup %3693  ;;  %v3009_v21 = vadd.f32 %v6250_v50, %v2874_v13  ;;  %v2803_v27 = vmul.f32 %v3692_v52, %v7369_v36  ;;  %v2551_v40 = vadd.f32 1e-05, %v2423_v49 }
 0x2ea   : > { %v3008_v33 = vadd.f32 %v6250_v50, %v2873_v39  ;;  %v2802_v9 = vmul.f32 %v3694_v54, %v7370_v61  ;;  %v2550_v18 = vadd.f32 1e-05, %v2422_v26  ;;  %v2041_v10 = vpop.xlane.xlu1 %2040  ;;  %v7374_v54 = vld [vmem:[#allocation27_spill] sm:$0xff] }
 0x2eb   : > { %3137 = vst.msk [vmem:[%s5821_s12 + $0xf8] sm:$0xff] %vm429_vm1, %v3009_v21  ;;  %v2938_v58 = vmul.f32 %v6239_v11, %v2803_v27  ;;  %3707 = vrsqrt.f32 %v2551_v40  ;;  %v2357_v22 = vmul.f32 0.125, %v2041_v10  ;;  %v2038_v6 = vpop.xlane.xlu0 %2037 }
 0x2ec   : > { %v3696_v32 = vpop.eup %3695  ;;  %3136 = vst.msk [vmem:[%s5821_s12 + $0xf0] sm:$0xff] %vm429_vm1, %v3008_v33  ;;  %v2937_v63 = vmul.f32 %v6239_v11, %v2802_v9  ;;  %3709 = vrsqrt.f32 %v2550_v18  ;;  %v2356_v55 = vmul.f32 0.125, %v2038_v6  ;;  %v7375_v6 = vld [vmem:[#allocation124_spill] sm:$0xff] }
 0x2ed   : > { %v3698_v16 = vpop.eup %3697  ;;  %v3073_v5 = vadd.f32 %v6250_v50, %v2938_v58  ;;  %v2737_v60 = vmul.f32 %v3696_v32, %v7371_v25  ;;  %v2485_v41 = vadd.f32 1e-05, %v2357_v22 }
 0x2ee   : > { %v3072_v43 = vadd.f32 %v6250_v50, %v2937_v63  ;;  %v2736_v19 = vmul.f32 %v3698_v16, %v7372_v59  ;;  %v2484_v20 = vadd.f32 1e-05, %v2356_v55  ;;  %v2233_v51 = vpop.xlane.xlu1 %2232  ;;  %v7376_v16 = vld [vmem:[#allocation28_spill] sm:$0xff] }
 0x2ef   : > { %3201 = vst.msk [vmem:[%s5821_s12 + $0x2f8] sm:$0xff] %vm429_vm1, %v3073_v5  ;;  %v2872_v31 = vmul.f32 %v6239_v11, %v2737_v60  ;;  %3711 = vrsqrt.f32 %v2485_v41  ;;  %v2421_v42 = vmul.f32 0.125, %v2233_v51  ;;  %v2230_v14 = vpop.xlane.xlu0 %2229 }
 0x2f0   : > { %v3700_v4 = vpop.eup %3699  ;;  %3200 = vst.msk [vmem:[%s5821_s12 + $0x2f0] sm:$0xff] %vm429_vm1, %v3072_v43  ;;  %v2871_v8 = vmul.f32 %v6239_v11, %v2736_v19  ;;  %3713 = vrsqrt.f32 %v2484_v20  ;;  %v2420_v53 = vmul.f32 0.125, %v2230_v14  ;;  %v7377_v14 = vld [vmem:[#allocation29_spill] sm:$0xff] }
 0x2f1   : > { %v3702_v13 = vpop.eup %3701  ;;  %v3007_v49 = vadd.f32 %v6250_v50, %v2872_v31  ;;  %v2801_v52 = vmul.f32 %v3700_v4, %v7373_v24  ;;  %v2549_v39 = vadd.f32 1e-05, %v2421_v42 }
 0x2f2   : > { %v3006_v26 = vadd.f32 %v6250_v50, %v2871_v8  ;;  %v2800_v21 = vmul.f32 %v3702_v13, %v7374_v54  ;;  %v2548_v36 = vadd.f32 1e-05, %v2420_v53  ;;  %v2059_v27 = vpop.xlane.xlu1 %2058  ;;  %v7378_v13 = vld [vmem:[#allocation127_spill] sm:$0xff] }
 0x2f3   : > { %3135 = vst.msk [vmem:[%s5821_s12 + $0xe8] sm:$0xff] %vm429_vm1, %v3007_v49  ;;  %v2936_v40 = vmul.f32 %v6239_v11, %v2801_v52  ;;  %3715 = vrsqrt.f32 %v2549_v39  ;;  %v2363_v33 = vmul.f32 0.125, %v2059_v27  ;;  %v2056_v61 = vpop.xlane.xlu0 %2055 }
 0x2f4   : > { %v3704_v9 = vpop.eup %3703  ;;  %3134 = vst.msk [vmem:[%s5821_s12 + $0xe0] sm:$0xff] %vm429_vm1, %v3006_v26  ;;  %v2935_v18 = vmul.f32 %v6239_v11, %v2800_v21  ;;  %3717 = vrsqrt.f32 %v2548_v36  ;;  %v2362_v10 = vmul.f32 0.125, %v2056_v61  ;;  %v7379_v61 = vld [vmem:[#allocation30_spill] sm:$0xff] }
 0x2f5   : > { %v3706_v58 = vpop.eup %3705  ;;  %v3071_v22 = vadd.f32 %v6250_v50, %v2936_v40  ;;  %v2743_v32 = vmul.f32 %v3704_v9, %v7375_v6  ;;  %v2491_v63 = vadd.f32 1e-05, %v2363_v33 }
 0x2f6   : > { %v3070_v55 = vadd.f32 %v6250_v50, %v2935_v18  ;;  %v2742_v5 = vmul.f32 %v3706_v58, %v7376_v16  ;;  %v2490_v25 = vadd.f32 1e-05, %v2362_v10  ;;  %v2251_v60 = vpop.xlane.xlu1 %2250  ;;  %v7380_v58 = vld [vmem:[#allocation31_spill] sm:$0xff] }
 0x2f7   : > { %3199 = vst.msk [vmem:[%s5821_s12 + $0x2e8] sm:$0xff] %vm429_vm1, %v3071_v22  ;;  %v2878_v41 = vmul.f32 %v6239_v11, %v2743_v32  ;;  %3719 = vrsqrt.f32 %v2491_v63  ;;  %v2427_v43 = vmul.f32 0.125, %v2251_v60  ;;  %v2248_v59 = vpop.xlane.xlu0 %2247 }
 0x2f8   : > { %v3708_v19 = vpop.eup %3707  ;;  %3198 = vst.msk [vmem:[%s5821_s12 + $0x2e0] sm:$0xff] %vm429_vm1, %v3070_v55  ;;  %v2877_v20 = vmul.f32 %v6239_v11, %v2742_v5  ;;  %3721 = vrsqrt.f32 %v2490_v25  ;;  %v2426_v51 = vmul.f32 0.125, %v2248_v59  ;;  %v7381_v59 = vld [vmem:[#allocation130_spill] sm:$0xff] }
 0x2f9   : > { %v3710_v31 = vpop.eup %3709  ;;  %v3013_v42 = vadd.f32 %v6250_v50, %v2878_v41  ;;  %v2807_v4 = vmul.f32 %v3708_v19, %v7377_v14  ;;  %v2555_v8 = vadd.f32 1e-05, %v2427_v43 }
 0x2fa   : > { %v3012_v53 = vadd.f32 %v6250_v50, %v2877_v20  ;;  %v2806_v49 = vmul.f32 %v3710_v31, %v7378_v13  ;;  %v2554_v24 = vadd.f32 1e-05, %v2426_v51  ;;  %v2053_v52 = vpop.xlane.xlu1 %2052  ;;  %v7382_v31 = vld [vmem:[#allocation32_spill] sm:$0xff] }
 0x2fb   : > { %3141 = vst.msk [vmem:[%s5821_s12 + $0x118] sm:$0xff] %vm429_vm1, %v3013_v42  ;;  %v2942_v39 = vmul.f32 %v6239_v11, %v2807_v4  ;;  %3723 = vrsqrt.f32 %v2555_v8  ;;  %v2361_v26 = vmul.f32 0.125, %v2053_v52  ;;  %v2050_v54 = vpop.xlane.xlu0 %2049 }
 0x2fc   : > { %v3712_v21 = vpop.eup %3711  ;;  %3140 = vst.msk [vmem:[%s5821_s12 + $0x110] sm:$0xff] %vm429_vm1, %v3012_v53  ;;  %v2941_v36 = vmul.f32 %v6239_v11, %v2806_v49  ;;  %3725 = vrsqrt.f32 %v2554_v24  ;;  %v2360_v27 = vmul.f32 0.125, %v2050_v54  ;;  %v7383_v54 = vld [vmem:[#allocation33_spill] sm:$0xff] }
 0x2fd   : > { %v3714_v40 = vpop.eup %3713  ;;  %v3077_v33 = vadd.f32 %v6250_v50, %v2942_v39  ;;  %v2741_v9 = vmul.f32 %v3712_v21, %v7379_v61  ;;  %v2489_v18 = vadd.f32 1e-05, %v2361_v26 }
 0x2fe   : > { %v3076_v10 = vadd.f32 %v6250_v50, %v2941_v36  ;;  %v2740_v22 = vmul.f32 %v3714_v40, %v7380_v58  ;;  %v2488_v6 = vadd.f32 1e-05, %v2360_v27  ;;  %v2245_v32 = vpop.xlane.xlu1 %2244  ;;  %v7384_v40 = vld [vmem:[#allocation34_spill] sm:$0xff] }
 0x2ff   : > { %3205 = vst.msk [vmem:[%s5821_s12 + $0x318] sm:$0xff] %vm429_vm1, %v3077_v33  ;;  %v2876_v63 = vmul.f32 %v6239_v11, %v2741_v9  ;;  %3727 = vrsqrt.f32 %v2489_v18  ;;  %v2425_v55 = vmul.f32 0.125, %v2245_v32  ;;  %v2242_v16 = vpop.xlane.xlu0 %2241 }
 0x300   : > { %v3716_v5 = vpop.eup %3715  ;;  %3204 = vst.msk [vmem:[%s5821_s12 + $0x310] sm:$0xff] %vm429_vm1, %v3076_v10  ;;  %v2875_v25 = vmul.f32 %v6239_v11, %v2740_v22  ;;  %3729 = vrsqrt.f32 %v2488_v6  ;;  %v2424_v60 = vmul.f32 0.125, %v2242_v16  ;;  %v7385_v16 = vld [vmem:[#allocation35_spill] sm:$0xff] }
 0x301   : > { %v3718_v41 = vpop.eup %3717  ;;  %v3011_v43 = vadd.f32 %v6250_v50, %v2876_v63  ;;  %v2805_v19 = vmul.f32 %v3716_v5, %v7381_v59  ;;  %v2553_v20 = vadd.f32 1e-05, %v2425_v55 }
 0x302   : > { %v3010_v51 = vadd.f32 %v6250_v50, %v2875_v25  ;;  %v2804_v42 = vmul.f32 %v3718_v41, %v7382_v31  ;;  %v2552_v14 = vadd.f32 1e-05, %v2424_v60  ;;  %v2071_v4 = vpop.xlane.xlu1 %2070  ;;  %v7386_v41 = vld [vmem:[#allocation36_spill] sm:$0xff] }
 0x303   : > { %3139 = vst.msk [vmem:[%s5821_s12 + $0x108] sm:$0xff] %vm429_vm1, %v3011_v43  ;;  %v2940_v8 = vmul.f32 %v6239_v11, %v2805_v19  ;;  %3731 = vrsqrt.f32 %v2553_v20  ;;  %v2367_v53 = vmul.f32 0.125, %v2071_v4  ;;  %v2068_v13 = vpop.xlane.xlu0 %2067 }
 0x304   : > { %v3720_v49 = vpop.eup %3719  ;;  %3138 = vst.msk [vmem:[%s5821_s12 + $0x100] sm:$0xff] %vm429_vm1, %v3010_v51  ;;  %v2939_v24 = vmul.f32 %v6239_v11, %v2804_v42  ;;  %3733 = vrsqrt.f32 %v2552_v14  ;;  %v2366_v52 = vmul.f32 0.125, %v2068_v13  ;;  %v7387_v13 = vld [vmem:[#allocation37_spill] sm:$0xff] }
 0x305   : > { %v3722_v39 = vpop.eup %3721  ;;  %v3075_v26 = vadd.f32 %v6250_v50, %v2940_v8  ;;  %v2747_v21 = vmul.f32 %v3720_v49, %v7383_v54  ;;  %v2495_v36 = vadd.f32 1e-05, %v2367_v53 }
 0x306   : > { %v3074_v27 = vadd.f32 %v6250_v50, %v2939_v24  ;;  %v2746_v33 = vmul.f32 %v3722_v39, %v7384_v40  ;;  %v2494_v61 = vadd.f32 1e-05, %v2366_v52  ;;  %v2263_v9 = vpop.xlane.xlu1 %2262  ;;  %v7388_v39 = vld [vmem:[#allocation38_spill] sm:$0xff] }
 0x307   : > { %3203 = vst.msk [vmem:[%s5821_s12 + $0x308] sm:$0xff] %vm429_vm1, %v3075_v26  ;;  %v2882_v18 = vmul.f32 %v6239_v11, %v2747_v21  ;;  %3735 = vrsqrt.f32 %v2495_v36  ;;  %v2431_v10 = vmul.f32 0.125, %v2263_v9  ;;  %v2260_v58 = vpop.xlane.xlu0 %2259 }
 0x308   : > { %v3724_v22 = vpop.eup %3723  ;;  %3202 = vst.msk [vmem:[%s5821_s12 + $0x300] sm:$0xff] %vm429_vm1, %v3074_v27  ;;  %v2881_v6 = vmul.f32 %v6239_v11, %v2746_v33  ;;  %3737 = vrsqrt.f32 %v2494_v61  ;;  %v2430_v32 = vmul.f32 0.125, %v2260_v58  ;;  %v7389_v58 = vld [vmem:[#allocation39_spill] sm:$0xff] }
 0x309   : > { %v3726_v63 = vpop.eup %3725  ;;  %v3017_v55 = vadd.f32 %v6250_v50, %v2882_v18  ;;  %v2811_v5 = vmul.f32 %v3724_v22, %v7385_v16  ;;  %v2559_v25 = vadd.f32 1e-05, %v2431_v10 }
 0x30a   : > { %v3016_v60 = vadd.f32 %v6250_v50, %v2881_v6  ;;  %v2810_v43 = vmul.f32 %v3726_v63, %v7386_v41  ;;  %v2558_v59 = vadd.f32 1e-05, %v2430_v32  ;;  %v2065_v19 = vpop.xlane.xlu1 %2064  ;;  %v7390_v63 = vld [vmem:[#allocation40_spill] sm:$0xff] }
 0x30b   : > { %3145 = vst.msk [vmem:[%s5821_s12 + $0x138] sm:$0xff] %vm429_vm1, %v3017_v55  ;;  %v2946_v20 = vmul.f32 %v6239_v11, %v2811_v5  ;;  %3739 = vrsqrt.f32 %v2559_v25  ;;  %v2365_v51 = vmul.f32 0.125, %v2065_v19  ;;  %v2062_v31 = vpop.xlane.xlu0 %2061 }
 0x30c   : > { %v3728_v42 = vpop.eup %3727  ;;  %3144 = vst.msk [vmem:[%s5821_s12 + $0x130] sm:$0xff] %vm429_vm1, %v3016_v60  ;;  %v2945_v14 = vmul.f32 %v6239_v11, %v2810_v43  ;;  %3741 = vrsqrt.f32 %v2558_v59  ;;  %v2364_v4 = vmul.f32 0.125, %v2062_v31  ;;  %v7391_v31 = vld [vmem:[#allocation42_spill] sm:$0xff] }
 0x30d   : > { %v3730_v8 = vpop.eup %3729  ;;  %v3081_v53 = vadd.f32 %v6250_v50, %v2946_v20  ;;  %v2745_v49 = vmul.f32 %v3728_v42, %v7387_v13  ;;  %v2493_v24 = vadd.f32 1e-05, %v2365_v51 }
 0x30e   : > { %v3080_v52 = vadd.f32 %v6250_v50, %v2945_v14  ;;  %v2744_v26 = vmul.f32 %v3730_v8, %v7388_v39  ;;  %v2492_v54 = vadd.f32 1e-05, %v2364_v4  ;;  %v2257_v21 = vpop.xlane.xlu1 %2256  ;;  %v7392_v8 = vld [vmem:[#allocation44_spill] sm:$0xff] }
 0x30f   : > { %3209 = vst.msk [vmem:[%s5821_s12 + $0x338] sm:$0xff] %vm429_vm1, %v3081_v53  ;;  %v2880_v36 = vmul.f32 %v6239_v11, %v2745_v49  ;;  %3743 = vrsqrt.f32 %v2493_v24  ;;  %v2429_v27 = vmul.f32 0.125, %v2257_v21  ;;  %v2254_v40 = vpop.xlane.xlu0 %2253 }
 0x310   : > { %v3732_v33 = vpop.eup %3731  ;;  %3208 = vst.msk [vmem:[%s5821_s12 + $0x330] sm:$0xff] %vm429_vm1, %v3080_v52  ;;  %v2879_v61 = vmul.f32 %v6239_v11, %v2744_v26  ;;  %3745 = vrsqrt.f32 %v2492_v54  ;;  %v2428_v9 = vmul.f32 0.125, %v2254_v40  ;;  %v7393_v40 = vld [vmem:[#allocation45_spill] sm:$0xff] }
 0x311   : > { %v3734_v18 = vpop.eup %3733  ;;  %v3015_v10 = vadd.f32 %v6250_v50, %v2880_v36  ;;  %v2809_v22 = vmul.f32 %v3732_v33, %v7389_v58  ;;  %v2557_v6 = vadd.f32 1e-05, %v2429_v27 }
 0x312   : > { %v3014_v32 = vadd.f32 %v6250_v50, %v2879_v61  ;;  %v2808_v55 = vmul.f32 %v3734_v18, %v7390_v63  ;;  %v2556_v16 = vadd.f32 1e-05, %v2428_v9  ;;  %v2083_v5 = vpop.xlane.xlu1 %2082  ;;  %v7394_v18 = vld [vmem:[#allocation46_spill] sm:$0xff] }
 0x313   : > { %3143 = vst.msk [vmem:[%s5821_s12 + $0x128] sm:$0xff] %vm429_vm1, %v3015_v10  ;;  %v2944_v25 = vmul.f32 %v6239_v11, %v2809_v22  ;;  %3747 = vrsqrt.f32 %v2557_v6  ;;  %v2371_v60 = vmul.f32 0.125, %v2083_v5  ;;  %v2080_v41 = vpop.xlane.xlu0 %2079 }
 0x314   : > { %v3736_v43 = vpop.eup %3735  ;;  %3142 = vst.msk [vmem:[%s5821_s12 + $0x120] sm:$0xff] %vm429_vm1, %v3014_v32  ;;  %v2943_v59 = vmul.f32 %v6239_v11, %v2808_v55  ;;  %3749 = vrsqrt.f32 %v2556_v16  ;;  %v2370_v19 = vmul.f32 0.125, %v2080_v41  ;;  %v7395_v41 = vld [vmem:[#allocation47_spill] sm:$0xff] }
 0x315   : > { %v3738_v20 = vpop.eup %3737  ;;  %v3079_v51 = vadd.f32 %v6250_v50, %v2944_v25  ;;  %v2751_v42 = vmul.f32 %v3736_v43, %v7391_v31  ;;  %v2499_v14 = vadd.f32 1e-05, %v2371_v60 }
 0x316   : > { %v3078_v4 = vadd.f32 %v6250_v50, %v2943_v59  ;;  %v2750_v53 = vmul.f32 %v3738_v20, %v7392_v8  ;;  %v2498_v13 = vadd.f32 1e-05, %v2370_v19  ;;  %v2077_v49 = vpop.xlane.xlu1 %2076  ;;  %v7396_v20 = vld [vmem:[#allocation48_spill] sm:$0xff] }
 0x317   : > { %3207 = vst.msk [vmem:[%s5821_s12 + $0x328] sm:$0xff] %vm429_vm1, %v3079_v51  ;;  %v2886_v24 = vmul.f32 %v6239_v11, %v2751_v42  ;;  %3751 = vrsqrt.f32 %v2499_v14  ;;  %v2369_v52 = vmul.f32 0.125, %v2077_v49  ;;  %v2074_v39 = vpop.xlane.xlu0 %2073 }
 0x318   : > { %v3740_v26 = vpop.eup %3739  ;;  %3206 = vst.msk [vmem:[%s5821_s12 + $0x320] sm:$0xff] %vm429_vm1, %v3078_v4  ;;  %v2885_v54 = vmul.f32 %v6239_v11, %v2750_v53  ;;  %3753 = vrsqrt.f32 %v2498_v13  ;;  %v2368_v21 = vmul.f32 0.125, %v2074_v39  ;;  %v7397_v39 = vld [vmem:[#allocation49_spill] sm:$0xff] }
 0x319   : > { %v3742_v36 = vpop.eup %3741  ;;  %v3021_v27 = vadd.f32 %v6250_v50, %v2886_v24  ;;  %v2815_v33 = vmul.f32 %v3740_v26, %v7393_v40  ;;  %v2497_v61 = vadd.f32 1e-05, %v2369_v52 }
 0x31a   : > { %v3020_v9 = vadd.f32 %v6250_v50, %v2885_v54  ;;  %v2814_v10 = vmul.f32 %v3742_v36, %v7394_v18  ;;  %v2496_v58 = vadd.f32 1e-05, %v2368_v21  ;;  %v2269_v22 = vpop.xlane.xlu1 %2268  ;;  %v7398_v36 = vld [vmem:[#allocation50_spill] sm:$0xff] }
 0x31b   : > { %3149 = vst.msk [vmem:[%s5821_s12 + $0x158] sm:$0xff] %vm429_vm1, %v3021_v27  ;;  %v2950_v6 = vmul.f32 %v6239_v11, %v2815_v33  ;;  %3755 = vrsqrt.f32 %v2497_v61  ;;  %v2433_v32 = vmul.f32 0.125, %v2269_v22  ;;  %v2266_v63 = vpop.xlane.xlu0 %2265 }
 0x31c   : > { %v3744_v55 = vpop.eup %3743  ;;  %3148 = vst.msk [vmem:[%s5821_s12 + $0x150] sm:$0xff] %vm429_vm1, %v3020_v9  ;;  %v2949_v16 = vmul.f32 %v6239_v11, %v2814_v10  ;;  %3757 = vrsqrt.f32 %v2496_v58  ;;  %v2432_v5 = vmul.f32 0.125, %v2266_v63  ;;  %v7399_v63 = vld [vmem:[#allocation51_spill] sm:$0xff] }
 0x31d   : > { %v3746_v25 = vpop.eup %3745  ;;  %v3085_v60 = vadd.f32 %v6250_v50, %v2950_v6  ;;  %v2749_v43 = vmul.f32 %v3744_v55, %v7395_v41  ;;  %v2561_v59 = vadd.f32 1e-05, %v2433_v32 }
 0x31e   : > { %v3084_v19 = vadd.f32 %v6250_v50, %v2949_v16  ;;  %v2748_v51 = vmul.f32 %v3746_v25, %v7396_v20  ;;  %v2560_v31 = vadd.f32 1e-05, %v2432_v5  ;;  %v2095_v42 = vpop.xlane.xlu1 %2094  ;;  %v7400_v25 = vld [vmem:[#allocation52_spill] sm:$0xff] }
 0x31f   : > { %3213 = vst.msk [vmem:[%s5821_s12 + $0x358] sm:$0xff] %vm429_vm1, %v3085_v60  ;;  %v2884_v14 = vmul.f32 %v6239_v11, %v2749_v43  ;;  %3759 = vrsqrt.f32 %v2561_v59  ;;  %v2375_v4 = vmul.f32 0.125, %v2095_v42  ;;  %v2092_v8 = vpop.xlane.xlu0 %2091 }
 0x320   : > { %v3748_v53 = vpop.eup %3747  ;;  %3212 = vst.msk [vmem:[%s5821_s12 + $0x350] sm:$0xff] %vm429_vm1, %v3084_v19  ;;  %v2883_v13 = vmul.f32 %v6239_v11, %v2748_v51  ;;  %3761 = vrsqrt.f32 %v2560_v31  ;;  %v2374_v49 = vmul.f32 0.125, %v2092_v8  ;;  %v7401_v8 = vld [vmem:[#allocation55_spill] sm:$0xff] }
 0x321   : > { %v3750_v24 = vpop.eup %3749  ;;  %v3019_v52 = vadd.f32 %v6250_v50, %v2884_v14  ;;  %v2813_v26 = vmul.f32 %v3748_v53, %v7397_v39  ;;  %v2503_v54 = vadd.f32 1e-05, %v2375_v4 }
 0x322   : > { %v3018_v21 = vadd.f32 %v6250_v50, %v2883_v13  ;;  %v2812_v27 = vmul.f32 %v3750_v24, %v7398_v36  ;;  %v2502_v40 = vadd.f32 1e-05, %v2374_v49  ;;  %v2089_v33 = vpop.xlane.xlu1 %2088  ;;  %v7402_v24 = vld [vmem:[#allocation56_spill] sm:$0xff] }
 0x323   : > { %3147 = vst.msk [vmem:[%s5821_s12 + $0x148] sm:$0xff] %vm429_vm1, %v3019_v52  ;;  %v2948_v61 = vmul.f32 %v6239_v11, %v2813_v26  ;;  %3763 = vrsqrt.f32 %v2503_v54  ;;  %v2373_v9 = vmul.f32 0.125, %v2089_v33  ;;  %v2086_v18 = vpop.xlane.xlu0 %2085 }
 0x324   : > { %v3752_v10 = vpop.eup %3751  ;;  %3146 = vst.msk [vmem:[%s5821_s12 + $0x140] sm:$0xff] %vm429_vm1, %v3018_v21  ;;  %v2947_v58 = vmul.f32 %v6239_v11, %v2812_v27  ;;  %3765 = vrsqrt.f32 %v2502_v40  ;;  %v2372_v22 = vmul.f32 0.125, %v2086_v18  ;;  %v7403_v18 = vld [vmem:[#allocation58_spill] sm:$0xff] }
 0x325   : > { %v3754_v6 = vpop.eup %3753  ;;  %v3083_v32 = vadd.f32 %v6250_v50, %v2948_v61  ;;  %v2755_v55 = vmul.f32 %v3752_v10, %v7399_v63  ;;  %v2501_v16 = vadd.f32 1e-05, %v2373_v9 }
 0x326   : > { %v3082_v5 = vadd.f32 %v6250_v50, %v2947_v58  ;;  %v2754_v60 = vmul.f32 %v3754_v6, %v7400_v25  ;;  %v2500_v41 = vadd.f32 1e-05, %v2372_v22  ;;  %v2107_v43 = vpop.xlane.xlu1 %2106  ;;  %v7404_v6 = vld [vmem:[#allocation59_spill] sm:$0xff] }
 0x327   : > { %3211 = vst.msk [vmem:[%s5821_s12 + $0x348] sm:$0xff] %vm429_vm1, %v3083_v32  ;;  %v2890_v59 = vmul.f32 %v6239_v11, %v2755_v55  ;;  %3767 = vrsqrt.f32 %v2501_v16  ;;  %v2379_v19 = vmul.f32 0.125, %v2107_v43  ;;  %v2104_v20 = vpop.xlane.xlu0 %2103 }
 0x328   : > { %v3756_v51 = vpop.eup %3755  ;;  %3210 = vst.msk [vmem:[%s5821_s12 + $0x340] sm:$0xff] %vm429_vm1, %v3082_v5  ;;  %v2889_v31 = vmul.f32 %v6239_v11, %v2754_v60  ;;  %3769 = vrsqrt.f32 %v2500_v41  ;;  %v2378_v42 = vmul.f32 0.125, %v2104_v20 }
 0x329   : > { %v3758_v14 = vpop.eup %3757  ;;  %v3025_v4 = vadd.f32 %v6250_v50, %v2890_v59  ;;  %v2753_v53 = vmul.f32 %v3756_v51, %v7401_v8  ;;  %v2507_v13 = vadd.f32 1e-05, %v2379_v19 }
 0x32a   : > { %v3024_v49 = vadd.f32 %v6250_v50, %v2889_v31  ;;  %v2752_v52 = vmul.f32 %v3758_v14, %v7402_v24  ;;  %v2506_v39 = vadd.f32 1e-05, %v2378_v42  ;;  %v2101_v26 = vpop.xlane.xlu1 %2100  ;;  %v7405_v42 = vld [vmem:[#allocation60_spill] sm:$0xff] }
 0x32b   : > { %3153 = vst.msk [vmem:[%s5821_s12 + $0x178] sm:$0xff] %vm429_vm1, %v3025_v4  ;;  %v2888_v54 = vmul.f32 %v6239_v11, %v2753_v53  ;;  %3771 = vrsqrt.f32 %v2507_v13  ;;  %v2377_v21 = vmul.f32 0.125, %v2101_v26  ;;  %v2098_v36 = vpop.xlane.xlu0 %2097 }
 0x32c   : > { %v3760_v27 = vpop.eup %3759  ;;  %3152 = vst.msk [vmem:[%s5821_s12 + $0x170] sm:$0xff] %vm429_vm1, %v3024_v49  ;;  %v2887_v40 = vmul.f32 %v6239_v11, %v2752_v52  ;;  %3773 = vrsqrt.f32 %v2506_v39  ;;  %v2376_v33 = vmul.f32 0.125, %v2098_v36 }
 0x32d   : > { %v3762_v61 = vpop.eup %3761  ;;  %v3023_v9 = vadd.f32 %v6250_v50, %v2888_v54  ;;  %v2817_v10 = vmul.f32 %v3760_v27, %v7403_v18  ;;  %v2505_v58 = vadd.f32 1e-05, %v2377_v21  ;;  %v7406_v54 = vld [vmem:[#allocation63_spill] sm:$0xff] }
 0x32e   : > { %v3022_v22 = vadd.f32 %v6250_v50, %v2887_v40  ;;  %v2816_v32 = vmul.f32 %v3762_v61, %v7404_v6  ;;  %v2504_v63 = vadd.f32 1e-05, %v2376_v33  ;;  %v2119_v55 = vpop.xlane.xlu1 %2118  ;;  %v7407_v40 = vld [vmem:[#allocation64_spill] sm:$0xff] }
 0x32f   : > { %3151 = vst.msk [vmem:[%s5821_s12 + $0x168] sm:$0xff] %vm429_vm1, %v3023_v9  ;;  %v2952_v16 = vmul.f32 %v6239_v11, %v2817_v10  ;;  %3775 = vrsqrt.f32 %v2505_v58  ;;  %v2383_v5 = vmul.f32 0.125, %v2119_v55  ;;  %v2116_v25 = vpop.xlane.xlu0 %2115 }
 0x330   : > { %v3764_v60 = vpop.eup %3763  ;;  %3150 = vst.msk [vmem:[%s5821_s12 + $0x160] sm:$0xff] %vm429_vm1, %v3022_v22  ;;  %v2951_v41 = vmul.f32 %v6239_v11, %v2816_v32  ;;  %3777 = vrsqrt.f32 %v2504_v63  ;;  %v2382_v43 = vmul.f32 0.125, %v2116_v25 }
 0x331   : > { %v3766_v59 = vpop.eup %3765  ;;  %v3087_v19 = vadd.f32 %v6250_v50, %v2952_v16  ;;  %v2759_v20 = vmul.f32 %v3764_v60, %v5711_v46  ;;  %v2511_v51 = vadd.f32 1e-05, %v2383_v5  ;;  %v7408_v16 = vld [vmem:[#allocation67_spill] sm:$0xff] }
 0x332   : > { %v3086_v31 = vadd.f32 %v6250_v50, %v2951_v41  ;;  %v2758_v14 = vmul.f32 %v3766_v59, %v7405_v42  ;;  %v2510_v4 = vadd.f32 1e-05, %v2382_v43  ;;  %v2113_v8 = vpop.xlane.xlu1 %2112 }
 0x333   : > { %3215 = vst.msk [vmem:[%s5821_s12 + $0x368] sm:$0xff] %vm429_vm1, %v3087_v19  ;;  %v2894_v53 = vmul.f32 %v6239_v11, %v2759_v20  ;;  %3779 = vrsqrt.f32 %v2511_v51  ;;  %v2381_v13 = vmul.f32 0.125, %v2113_v8  ;;  %v2110_v49 = vpop.xlane.xlu0 %2109 }
 0x334   : > { %v3768_v24 = vpop.eup %3767  ;;  %3214 = vst.msk [vmem:[%s5821_s12 + $0x360] sm:$0xff] %vm429_vm1, %v3086_v31  ;;  %v2893_v46 = vmul.f32 %v6239_v11, %v2758_v14  ;;  %3781 = vrsqrt.f32 %v2510_v4  ;;  %v2380_v52 = vmul.f32 0.125, %v2110_v49  ;;  %v6552_v14 = vld [vmem:[%s6707_s4] ss:$0 sm:$0xff] }
 0x335   : > { %v3770_v39 = vpop.eup %3769  ;;  %v3029_v26 = vadd.f32 %v6250_v50, %v2894_v53  ;;  %v2757_v21 = vmul.f32 %v3768_v24, %v7406_v54  ;;  %v2509_v36 = vadd.f32 1e-05, %v2381_v13 }
 0x336   : > { %v3028_v27 = vadd.f32 %v6250_v50, %v2893_v46  ;;  %v2756_v33 = vmul.f32 %v3770_v39, %v7407_v40  ;;  %v2508_v61 = vadd.f32 1e-05, %v2380_v52  ;;  %v2275_v9 = vpop.xlane.xlu1 %2274 }
 0x337   : > { %3157 = vst.msk [vmem:[%s5821_s12 + $0x198] sm:$0xff] %vm429_vm1, %v3029_v26  ;;  %v2892_v18 = vmul.f32 %v6239_v11, %v2757_v21  ;;  %3783 = vrsqrt.f32 %v2509_v36  ;;  %v2435_v10 = vmul.f32 0.125, %v2275_v9  ;;  %v2128_v58 = vpop.xlane.xlu0 %2127 }
 0x338   : > { %v3772_v22 = vpop.eup %3771  ;;  %3156 = vst.msk [vmem:[%s5821_s12 + $0x190] sm:$0xff] %vm429_vm1, %v3028_v27  ;;  %v2891_v6 = vmul.f32 %v6239_v11, %v2756_v33  ;;  %3785 = vrsqrt.f32 %v2508_v61  ;;  %v2386_v32 = vmul.f32 0.125, %v2128_v58  ;;  %v6543_v11 = vld [vmem:[%s6706_s3] ss:$0 sm:$0xff] }
 0x339   : > { %v3774_v63 = vpop.eup %3773  ;;  %v3027_v55 = vadd.f32 %v6250_v50, %v2892_v18  ;;  %v2763_v5 = vmul.f32 %v3772_v22, %v7408_v16  ;;  %v2563_v25 = vadd.f32 1e-05, %v2435_v10 }
 0x33a   : > { %v3026_v60 = vadd.f32 %v6250_v50, %v2891_v6  ;;  %v2762_v41 = vmul.f32 %v3774_v63, %v5800_v45  ;;  %v2514_v43 = vadd.f32 1e-05, %v2386_v32  ;;  %v2131_v59 = vpop.xlane.xlu1 %2130 }
 0x33b   : > { %3155 = vst.msk [vmem:[%s5821_s12 + $0x188] sm:$0xff] %vm429_vm1, %v3027_v55  ;;  %v2898_v19 = vmul.f32 %v6543_v11, %v2763_v5  ;;  %3787 = vrsqrt.f32 %v2563_v25  ;;  %v2387_v20 = vmul.f32 0.125, %v2131_v59  ;;  %v2122_v51 = vpop.xlane.xlu0 %2121 }
 0x33c   : > { %v3776_v31 = vpop.eup %3775  ;;  %3154 = vst.msk [vmem:[%s5821_s12 + $0x180] sm:$0xff] %vm429_vm1, %v3026_v60  ;;  %v2897_v45 = vmul.f32 %v6543_v11, %v2762_v41  ;;  %3789 = vrsqrt.f32 %v2514_v43  ;;  %v2384_v50 = vmul.f32 0.125, %v2122_v51 }
 0x33d   : > { %v3778_v42 = vpop.eup %3777  ;;  %v3033_v4 = vadd.f32 %v6552_v14, %v2898_v19  ;;  %v2761_v8 = vmul.f32 %v3776_v31, %v5882_v17  ;;  %v2515_v53 = vadd.f32 1e-05, %v2387_v20 }
 0x33e   : > { %v3032_v13 = vadd.f32 %v6552_v14, %v2897_v45  ;;  %v2760_v49 = vmul.f32 %v3778_v42, %v5894_v62  ;;  %v2512_v24 = vadd.f32 1e-05, %v2384_v50  ;;  %v2125_v46 = vpop.xlane.xlu1 %2124  ;;  %v7409_v45 = vld [vmem:[#allocation53_spill] sm:$0xff] }
 0x33f   : > { %3161 = vst.msk [vmem:[%s5821_s12 + $0x1b8] sm:$0xff] %vm429_vm1, %v3033_v4  ;;  %v2896_v52 = vmul.f32 %v6543_v11, %v2761_v8  ;;  %3791 = vrsqrt.f32 %v2515_v53  ;;  %v2385_v39 = vmul.f32 0.125, %v2125_v46  ;;  %v2272_v26 = vpop.xlane.xlu0 %2271 }
 0x340   : > { %v3780_v54 = vpop.eup %3779  ;;  %3160 = vst.msk [vmem:[%s5821_s12 + $0x1b0] sm:$0xff] %vm429_vm1, %v3032_v13  ;;  %v2895_v17 = vmul.f32 %v6543_v11, %v2760_v49  ;;  %3793 = vrsqrt.f32 %v2512_v24  ;;  %v2434_v21 = vmul.f32 0.125, %v2272_v26 }
 0x341   : > { %v3782_v36 = vpop.eup %3781  ;;  %v3031_v62 = vadd.f32 %v6552_v14, %v2896_v52  ;;  %v2767_v27 = vmul.f32 %v3780_v54, %v5963_v35  ;;  %v2513_v40 = vadd.f32 1e-05, %v2385_v39 }
 0x342   : > { %v3030_v33 = vadd.f32 %v6552_v14, %v2895_v17  ;;  %v2766_v61 = vmul.f32 %v3782_v36, %v5980_v38  ;;  %v2562_v9 = vadd.f32 1e-05, %v2434_v21  ;;  %v2281_v18 = vpop.xlane.xlu1 %2280 }
 0x343   : > { %3159 = vst.msk [vmem:[%s5821_s12 + $0x1a8] sm:$0xff] %vm429_vm1, %v3031_v62  ;;  %v2902_v10 = vmul.f32 %v6543_v11, %v2767_v27  ;;  %3795 = vrsqrt.f32 %v2513_v40  ;;  %v2437_v58 = vmul.f32 0.125, %v2281_v18  ;;  %v2278_v22 = vpop.xlane.xlu0 %2277 }
 0x344   : > { %v3784_v6 = vpop.eup %3783  ;;  %3158 = vst.msk [vmem:[%s5821_s12 + $0x1a0] sm:$0xff] %vm429_vm1, %v3030_v33  ;;  %v2901_v35 = vmul.f32 %v6543_v11, %v2766_v61  ;;  %3797 = vrsqrt.f32 %v2562_v9  ;;  %v2436_v32 = vmul.f32 0.125, %v2278_v22 }
 0x345   : > { %v3786_v63 = vpop.eup %3785  ;;  %v3037_v38 = vadd.f32 %v6552_v14, %v2902_v10  ;;  %v2765_v55 = vmul.f32 %v3784_v6, %v5995_v34  ;;  %v2565_v16 = vadd.f32 1e-05, %v2437_v58 }
 0x346   : > { %v3036_v5 = vadd.f32 %v6552_v14, %v2901_v35  ;;  %v2764_v25 = vmul.f32 %v3786_v63, %v6010_v15  ;;  %v2564_v60 = vadd.f32 1e-05, %v2436_v32  ;;  %v2287_v41 = vpop.xlane.xlu1 %2286  ;;  %v7410_v32 = vld [vmem:[#allocation54_spill] sm:$0xff] }
 0x347   : > { %3165 = vst.msk [vmem:[%s5821_s12 + $0x1d8] sm:$0xff] %vm429_vm1, %v3037_v38  ;;  %v2900_v43 = vmul.f32 %v6543_v11, %v2765_v55  ;;  %3799 = vrsqrt.f32 %v2565_v16  ;;  %v2439_v59 = vmul.f32 0.125, %v2287_v41  ;;  %v2284_v19 = vpop.xlane.xlu0 %2283 }
 0x348   : > { %v3788_v20 = vpop.eup %3787  ;;  %3164 = vst.msk [vmem:[%s5821_s12 + $0x1d0] sm:$0xff] %vm429_vm1, %v3036_v5  ;;  %v2899_v34 = vmul.f32 %v6543_v11, %v2764_v25  ;;  %3801 = vrsqrt.f32 %v2564_v60  ;;  %v2438_v51 = vmul.f32 0.125, %v2284_v19  ;;  %v7411_v19 = vld [vmem:[#allocation65_spill] sm:$0xff] }
 0x349   : > { %v3790_v31 = vpop.eup %3789  ;;  %v3035_v15 = vadd.f32 %v6552_v14, %v2900_v43  ;;  %v2819_v50 = vmul.f32 %v3788_v20, %v7409_v45  ;;  %v2567_v42 = vadd.f32 1e-05, %v2439_v59 }
 0x34a   : > { %v3034_v4 = vadd.f32 %v6552_v14, %v2899_v34  ;;  %v2770_v8 = vmul.f32 %v3790_v31, %v6042_v57  ;;  %v2566_v53 = vadd.f32 1e-05, %v2438_v51  ;;  %v2293_v13 = vpop.xlane.xlu1 %2292  ;;  %v7412_v31 = vld [vmem:[#allocation66_spill] sm:$0xff] }
 0x34b   : > { %3163 = vst.msk [vmem:[%s5821_s12 + $0x1c8] sm:$0xff] %vm429_vm1, %v3035_v15  ;;  %v2954_v49 = vmul.f32 %v6543_v11, %v2819_v50  ;;  %3803 = vrsqrt.f32 %v2567_v42  ;;  %v2441_v24 = vmul.f32 0.125, %v2293_v13  ;;  %v2290_v46 = vpop.xlane.xlu0 %2289 }
 0x34c   : > { %v3792_v52 = vpop.eup %3791  ;;  %3162 = vst.msk [vmem:[%s5821_s12 + $0x1c0] sm:$0xff] %vm429_vm1, %v3034_v4  ;;  %v2905_v39 = vmul.f32 %v6543_v11, %v2770_v8  ;;  %3805 = vrsqrt.f32 %v2566_v53  ;;  %v2440_v26 = vmul.f32 0.125, %v2290_v46 }
 0x34d   : > { %v3794_v54 = vpop.eup %3793  ;;  %v3089_v57 = vadd.f32 %v6552_v14, %v2954_v49  ;;  %v2771_v17 = vmul.f32 %v3792_v52, %v6055_v3  ;;  %v2569_v21 = vadd.f32 1e-05, %v2441_v24  ;;  %v7413_v52 = vld [vmem:[#allocation61_spill] sm:$0xff] }
 0x34e   : > { %v3040_v36 = vadd.f32 %v6552_v14, %v2905_v39  ;;  %v2768_v62 = vmul.f32 %v3794_v54, %v6069_v7  ;;  %v2568_v27 = vadd.f32 1e-05, %v2440_v26  ;;  %v2299_v40 = vpop.xlane.xlu1 %2298 }
 0x34f   : > { %3217 = vst.msk [vmem:[%s5821_s12 + $0x378] sm:$0xff] %vm429_vm1, %v3089_v57  ;;  %v2906_v33 = vmul.f32 %v6543_v11, %v2771_v17  ;;  %3807 = vrsqrt.f32 %v2569_v21  ;;  %v2443_v61 = vmul.f32 0.125, %v2299_v40  ;;  %v2296_v9 = vpop.xlane.xlu0 %2295  ;;  %v7414_v57 = vld [vmem:[#allocation62_spill] sm:$0xff] }
 0x350   : > { %v3796_v18 = vpop.eup %3795  ;;  %3168 = vst.msk [vmem:[%s5821_s12 + $0x1f0] sm:$0xff] %vm429_vm1, %v3040_v36  ;;  %v2903_v3 = vmul.f32 %v6543_v11, %v2768_v62  ;;  %3809 = vrsqrt.f32 %v2568_v27  ;;  %v2442_v10 = vmul.f32 0.125, %v2296_v9 }
 0x351   : > { %v3798_v58 = vpop.eup %3797  ;;  %v3041_v7 = vadd.f32 %v6552_v14, %v2906_v33  ;;  %v2769_v22 = vmul.f32 %v3796_v18, %v6082_v47  ;;  %v2571_v6 = vadd.f32 1e-05, %v2443_v61 }
 0x352   : > { %v3038_v35 = vadd.f32 %v6552_v14, %v2903_v3  ;;  %v2818_v63 = vmul.f32 %v3798_v58, %v7410_v32  ;;  %v2570_v38 = vadd.f32 1e-05, %v2442_v10  ;;  %v2305_v55 = vpop.xlane.xlu1 %2304 }
 0x353   : > { %3169 = vst.msk [vmem:[%s5821_s12 + $0x1f8] sm:$0xff] %vm429_vm1, %v3041_v7  ;;  %v2904_v16 = vmul.f32 %v6543_v11, %v2769_v22  ;;  %3811 = vrsqrt.f32 %v2571_v6  ;;  %v2445_v5 = vmul.f32 0.125, %v2305_v55  ;;  %v2302_v25 = vpop.xlane.xlu0 %2301 }
 0x354   : > { %v3800_v60 = vpop.eup %3799  ;;  %3166 = vst.msk [vmem:[%s5821_s12 + $0x1e0] sm:$0xff] %vm429_vm1, %v3038_v35  ;;  %v2953_v47 = vmul.f32 %v6543_v11, %v2818_v63  ;;  %3813 = vrsqrt.f32 %v2570_v38  ;;  %v2444_v41 = vmul.f32 0.125, %v2302_v25 }
 0x355   : > { %v3802_v43 = vpop.eup %3801  ;;  %v3039_v59 = vadd.f32 %v6552_v14, %v2904_v16  ;;  %v2821_v20 = vmul.f32 %v3800_v60, %v7411_v19  ;;  %v2573_v34 = vadd.f32 1e-05, %v2445_v5 }
 0x356   : > { %v3088_v51 = vadd.f32 %v6552_v14, %v2953_v47  ;;  %v2820_v15 = vmul.f32 %v3802_v43, %v7412_v31  ;;  %v2572_v45 = vadd.f32 1e-05, %v2444_v41  ;;  %v2311_v50 = vpop.xlane.xlu1 %2310 }
 0x357   : > { %3167 = vst.msk [vmem:[%s5821_s12 + $0x1e8] sm:$0xff] %vm429_vm1, %v3039_v59  ;;  %v2956_v42 = vmul.f32 %v6543_v11, %v2821_v20  ;;  %3815 = vrsqrt.f32 %v2573_v34  ;;  %v2447_v4 = vmul.f32 0.125, %v2311_v50  ;;  %v2308_v8 = vpop.xlane.xlu0 %2307 }
 0x358   : > { %v3804_v53 = vpop.eup %3803  ;;  %3216 = vst.msk [vmem:[%s5821_s12 + $0x370] sm:$0xff] %vm429_vm1, %v3088_v51  ;;  %v2955_v13 = vmul.f32 %v6543_v11, %v2820_v15  ;;  %3817 = vrsqrt.f32 %v2572_v45  ;;  %v2446_v49 = vmul.f32 0.125, %v2308_v8 }
 0x359   : > { %v3806_v24 = vpop.eup %3805  ;;  %v3091_v46 = vadd.f32 %v6552_v14, %v2956_v42  ;;  %v2823_v39 = vmul.f32 %v3804_v53, %v7413_v52  ;;  %v2575_v26 = vadd.f32 1e-05, %v2447_v4 }
 0x35a   : > { %v3090_v54 = vadd.f32 %v6552_v14, %v2955_v13  ;;  %v2822_v17 = vmul.f32 %v3806_v24, %v7414_v57  ;;  %v2574_v21 = vadd.f32 1e-05, %v2446_v49  ;;  %v2317_v36 = vpop.xlane.xlu1 %2316 }
 0x35b   : > { %3219 = vst.msk [vmem:[%s5821_s12 + $0x388] sm:$0xff] %vm429_vm1, %v3091_v46  ;;  %v2958_v62 = vmul.f32 %v6543_v11, %v2823_v39  ;;  %3819 = vrsqrt.f32 %v2575_v26  ;;  %v2449_v27 = vmul.f32 0.125, %v2317_v36  ;;  %v2314_v40 = vpop.xlane.xlu0 %2313 }
 0x35c   : > { %v3808_v33 = vpop.eup %3807  ;;  %3218 = vst.msk [vmem:[%s5821_s12 + $0x380] sm:$0xff] %vm429_vm1, %v3090_v54  ;;  %v2957_v61 = vmul.f32 %v6543_v11, %v2822_v17  ;;  %3821 = vrsqrt.f32 %v2574_v21  ;;  %v2448_v9 = vmul.f32 0.125, %v2314_v40 }
 0x35d   : > { %v3810_v18 = vpop.eup %3809  ;;  %v3093_v3 = vadd.f32 %v6552_v14, %v2958_v62  ;;  %v2825_v10 = vmul.f32 %v3808_v33, %v5924_v44  ;;  %v2577_v58 = vadd.f32 1e-05, %v2449_v27 }
 0x35e   : > { %v3092_v7 = vadd.f32 %v6552_v14, %v2957_v61  ;;  %v2824_v22 = vmul.f32 %v3810_v18, %v5936_v12  ;;  %v2576_v6 = vadd.f32 1e-05, %v2448_v9  ;;  %v2323_v35 = vpop.xlane.xlu1 %2322 }
 0x35f   : > { %3221 = vst.msk [vmem:[%s5821_s12 + $0x398] sm:$0xff] %vm429_vm1, %v3093_v3  ;;  %v2960_v32 = vmul.f32 %v6543_v11, %v2825_v10  ;;  %3823 = vrsqrt.f32 %v2577_v58  ;;  %v2451_v63 = vmul.f32 0.125, %v2323_v35  ;;  %v2320_v38 = vpop.xlane.xlu0 %2319 }
 0x360   : > { %v3812_v55 = vpop.eup %3811  ;;  %3220 = vst.msk [vmem:[%s5821_s12 + $0x390] sm:$0xff] %vm429_vm1, %v3092_v7  ;;  %v2959_v44 = vmul.f32 %v6543_v11, %v2824_v22  ;;  %3825 = vrsqrt.f32 %v2576_v6  ;;  %v2450_v16 = vmul.f32 0.125, %v2320_v38 }
 0x361   : > { %v3814_v5 = vpop.eup %3813  ;;  %v3095_v12 = vadd.f32 %v6552_v14, %v2960_v32  ;;  %v2827_v25 = vmul.f32 %v3812_v55, %v5840_v2  ;;  %v2579_v60 = vadd.f32 1e-05, %v2451_v63 }
 0x362   : > { %v3094_v47 = vadd.f32 %v6552_v14, %v2959_v44  ;;  %v2826_v41 = vmul.f32 %v3814_v5, %v5852_v0  ;;  %v2578_v43 = vadd.f32 1e-05, %v2450_v16 }
 0x363   : > { %3223 = vst.msk [vmem:[%s5821_s12 + $0x3a8] sm:$0xff] %vm429_vm1, %v3095_v12  ;;  %v2962_v59 = vmul.f32 %v6543_v11, %v2827_v25  ;;  %3827 = vrsqrt.f32 %v2579_v60 }
 0x364   : > { %v3816_v19 = vpop.eup %3815  ;;  %3222 = vst.msk [vmem:[%s5821_s12 + $0x3a0] sm:$0xff] %vm429_vm1, %v3094_v47  ;;  %v2961_v20 = vmul.f32 %v6543_v11, %v2826_v41  ;;  %3829 = vrsqrt.f32 %v2578_v43 }
 0x365   : > { %v3818_v2 = vpop.eup %3817  ;;  %v3097_v34 = vadd.f32 %v6552_v14, %v2962_v59  ;;  %v2829_v51 = vmul.f32 %v3816_v19, %v6148_v1 }
 0x366   : > { %v3096_v0 = vadd.f32 %v6552_v14, %v2961_v20  ;;  %v2828_v31 = vmul.f32 %v3818_v2, %v6154_v29 }
 0x367   : > { %3225 = vst.msk [vmem:[%s5821_s12 + $0x3b8] sm:$0xff] %vm429_vm1, %v3097_v34  ;;  %v2964_v15 = vmul.f32 %v6543_v11, %v2829_v51 }
 0x368   : > { %v3820_v45 = vpop.eup %3819  ;;  %3224 = vst.msk [vmem:[%s5821_s12 + $0x3b0] sm:$0xff] %vm429_vm1, %v3096_v0  ;;  %v2963_v50 = vmul.f32 %v6543_v11, %v2828_v31 }
 0x369   : > { %v3822_v42 = vpop.eup %3821  ;;  %v3099_v4 = vadd.f32 %v6552_v14, %v2964_v15  ;;  %v2831_v1 = vmul.f32 %v3820_v45, %v6136_v56 }
 0x36a   : > { %v3098_v8 = vadd.f32 %v6552_v14, %v2963_v50  ;;  %v2830_v29 = vmul.f32 %v3822_v42, %v6142_v30 }
 0x36b   : > { %3227 = vst.msk [vmem:[%s5821_s12 + $0x3c8] sm:$0xff] %vm429_vm1, %v3099_v4  ;;  %v2966_v53 = vmul.f32 %v6543_v11, %v2831_v1 }
 0x36c   : > { %v3824_v13 = vpop.eup %3823  ;;  %3226 = vst.msk [vmem:[%s5821_s12 + $0x3c0] sm:$0xff] %vm429_vm1, %v3098_v8  ;;  %v2965_v49 = vmul.f32 %v6543_v11, %v2830_v29 }
 0x36d   : > { %v3826_v24 = vpop.eup %3825  ;;  %v3101_v46 = vadd.f32 %v6552_v14, %v2966_v53  ;;  %v2833_v56 = vmul.f32 %v3824_v13, %v6216_v23 }
 0x36e   : > { %v3100_v52 = vadd.f32 %v6552_v14, %v2965_v49  ;;  %v2832_v30 = vmul.f32 %v3826_v24, %v6222_v37 }
 0x36f   : > { %3229 = vst.msk [vmem:[%s5821_s12 + $0x3d8] sm:$0xff] %vm429_vm1, %v3101_v46  ;;  %v2968_v39 = vmul.f32 %v6543_v11, %v2833_v56 }
 0x370   : > { %v3828_v26 = vpop.eup %3827  ;;  %3228 = vst.msk [vmem:[%s5821_s12 + $0x3d0] sm:$0xff] %vm429_vm1, %v3100_v52  ;;  %v2967_v54 = vmul.f32 %v6543_v11, %v2832_v30 }
 0x371   : > { %v3830_v57 = vpop.eup %3829  ;;  %v3103_v17 = vadd.f32 %v6552_v14, %v2968_v39  ;;  %v2835_v23 = vmul.f32 %v3828_v26, %v6227_v28 }
 0x372   : > { %v3102_v21 = vadd.f32 %v6552_v14, %v2967_v54  ;;  %v2834_v37 = vmul.f32 %v3830_v57, %v6232_v48 }
 0x373   : > { %3231 = vst.msk [vmem:[%s5821_s12 + $0x3e8] sm:$0xff] %vm429_vm1, %v3103_v17  ;;  %v2970_v36 = vmul.f32 %v6543_v11, %v2835_v23 }
 0x374   : > { %3230 = vst.msk [vmem:[%s5821_s12 + $0x3e0] sm:$0xff] %vm429_vm1, %v3102_v21  ;;  %v2969_v62 = vmul.f32 %v6543_v11, %v2834_v37 }
 0x375   : > { %v3105_v27 = vadd.f32 %v6552_v14, %v2970_v36 }
 0x376   : > { %v3104_v40 = vadd.f32 %v6552_v14, %v2969_v62 }
 0x377   : > { %3233 = vst.msk [vmem:[%s5821_s12 + $0x3f8] sm:$0xff] %vm429_vm1, %v3105_v27 }
 0x378   : > { %3232 = vst.msk [vmem:[%s5821_s12 + $0x3f0] sm:$0xff] %vm429_vm1, %v3104_v40 }
 0x379 PF: > { %s15_s18 = sadd.s32 1, %s3842_s18  }
 0x37a   : > { %p12_p4 = scmp.ge.s32.totalorder %s15_s18, 6  }
 0x37c   :  { %14 = sbr.rel (!%p12_p4) target bundleno = 1 (0x1), region = 70 }

</bundles_post_ra>
